<compile_context>
chip_gen: v7x
topology: tpu7x:2x2x1
jax: 0.10.0
libtpu: 0.0.40
codegen_flags: <defaults>
</compile_context>

<pallas_src>
import functools
import math

import jax
import jax.numpy as jnp
from jax import lax
from jax.experimental import pallas as pl
from jax.experimental.pallas import tpu as pltpu

_LANE = 128
_SUBLANE = 8


def _round_up(x, m):
    return (x + m - 1) // m * m


# ------------------------------- Pallas kernel -------------------------------
def _recurrent_kernel(gx_ref, whh_ref, out_ref, h_sc, c_sc, *, t_chunk, hidden_p):
    """One (direction, time-chunk) grid step of the LSTM recurrence.

    gx_ref : (t_chunk, Bp, 4*Hp)  precomputed x @ W_ih^T + b for this chunk
    whh_ref: (Hp, 4*Hp)           W_hh^T for this direction
    out_ref: (t_chunk, Bp, Hp)    hidden states for this chunk
    h_sc/c_sc : (Bp, Hp) f32 scratch carried across the chunk grid axis.
    """
    d = pl.program_id(0)          # 0 = forward, 1 = backward

    @pl.when(pl.program_id(1) == 0)
    def _():
        h_sc[...] = jnp.zeros_like(h_sc)
        c_sc[...] = jnp.zeros_like(c_sc)

    whh = whh_ref[...]
    Hp = hidden_p

    def step(j, carry):
        # forward walks the chunk 0..t_chunk-1, backward walks it t_chunk-1..0
        t = j + d * (t_chunk - 1 - 2 * j)
        gates = gx_ref[t].astype(jnp.float32) + jnp.dot(
            h_sc[...].astype(whh.dtype), whh, preferred_element_type=jnp.float32)
        i = jax.nn.sigmoid(gates[:, 0 * Hp:1 * Hp])
        f = jax.nn.sigmoid(gates[:, 1 * Hp:2 * Hp])
        g = jnp.tanh(gates[:, 2 * Hp:3 * Hp])
        o = jax.nn.sigmoid(gates[:, 3 * Hp:4 * Hp])
        c_new = f * c_sc[...] + i * g
        h_new = o * jnp.tanh(c_new)
        c_sc[...] = c_new
        h_sc[...] = h_new
        out_ref[t] = h_new.astype(out_ref.dtype)
        return carry

    lax.fori_loop(0, t_chunk, step, 0, unroll=True)


def _lstm_recurrence(gx, whh, hidden_p, t_chunk, out_dtype):
    """gx: (2, Sp, Bp, 4*Hp), whh: (2, Hp, 4*Hp) -> (2, Sp, Bp, Hp)."""
    _, sp, bp, gp = gx.shape
    assert sp % t_chunk == 0
    nc = sp // t_chunk

    def tmap(d, c):  # forward reads chunk c, backward reads chunk nc-1-c
        return (d, c + d * (nc - 1 - 2 * c), 0, 0)

    kernel = functools.partial(_recurrent_kernel, t_chunk=t_chunk, hidden_p=hidden_p)

    dt_bytes = jnp.dtype(gx.dtype).itemsize
    est = (2 * dt_bytes * (t_chunk * bp * gp + hidden_p * gp + t_chunk * bp * hidden_p)
           + 2 * 4 * bp * hidden_p)
    vmem_limit = int(min(100 * 2**20, max(32 * 2**20, est + 16 * 2**20)))

    return pl.pallas_call(
        kernel,
        out_shape=jax.ShapeDtypeStruct((2, sp, bp, hidden_p), out_dtype),
        grid_spec=pltpu.PrefetchScalarGridSpec(
            num_scalar_prefetch=0,
            grid=(2, nc),
            in_specs=[
                pl.BlockSpec((None, t_chunk, bp, gp), tmap),
                pl.BlockSpec((None, hidden_p, gp), lambda d, c: (d, 0, 0)),
            ],
            out_specs=pl.BlockSpec((None, t_chunk, bp, hidden_p), tmap),
            scratch_shapes=[
                pltpu.VMEM((bp, hidden_p), jnp.float32),  # h
                pltpu.VMEM((bp, hidden_p), jnp.float32),  # c
            ],
        ),
        compiler_params=pltpu.CompilerParams(
            dimension_semantics=("parallel", "arbitrary"),
            vmem_limit_bytes=vmem_limit,
        ),
    )(gx, whh)


# ------------------------------- parameters -------------------------------
def init_bilstm_params(key, input_size, hidden_size, num_layers):
    """PyTorch-layout LSTM weights, U(-1/sqrt(H), 1/sqrt(H)); gate order [i, f, g, o]."""
    k = 1.0 / math.sqrt(hidden_size)
    layers = []
    for layer in range(num_layers):
        layer_in = input_size if layer == 0 else 2 * hidden_size
        dirs = []
        for _ in range(2):  # forward, backward
            key, k1, k2, k3, k4 = jax.random.split(key, 5)
            dirs.append({
                "w_ih": jax.random.uniform(k1, (4 * hidden_size, layer_in), jnp.float32, -k, k),
                "w_hh": jax.random.uniform(k2, (4 * hidden_size, hidden_size), jnp.float32, -k, k),
                "b_ih": jax.random.uniform(k3, (4 * hidden_size,), jnp.float32, -k, k),
                "b_hh": jax.random.uniform(k4, (4 * hidden_size,), jnp.float32, -k, k),
            })
        layers.append(dirs)
    return layers


def prepare_params(torch_params, input_size, hidden_size, compute_dtype=jnp.bfloat16):
    """Convert PyTorch-layout weights into the padded / stacked / bf16 kernel layout.

    Hidden size is padded to Hp = round_up(H, 128); each gate block [i|f|g|o] is padded
    from H to Hp columns with zeros, and padded hidden rows are zeroed so padded units
    stay identically zero through the recurrence.
    """
    H = hidden_size
    Hp = _round_up(H, _LANE)

    def pad_gates(w):  # (4H, cols) -> (4Hp, cols), per-gate zero padding
        blocks = w.reshape(4, H, -1)
        return jnp.pad(blocks, ((0, 0), (0, Hp - H), (0, 0))).reshape(4 * Hp, -1)

    prepared = []
    for li, dirs in enumerate(torch_params):
        w_ih_t, w_hh_t, bias = [], [], []
        for p in dirs:
            wih = pad_gates(p["w_ih"])                            # (4Hp, layer_in)
            whh = jnp.pad(pad_gates(p["w_hh"]), ((0, 0), (0, Hp - H)))  # (4Hp, Hp)
            b = pad_gates((p["b_ih"] + p["b_hh"])[:, None])[:, 0]       # (4Hp,)

            if li == 0:
                w_ih_t.append(wih.T.astype(compute_dtype))        # (in, 4Hp)
            else:
                # split the 2H input columns into (prev_direction, H) and pad H -> Hp
                wih = wih.reshape(4 * Hp, 2, H).transpose(1, 2, 0)      # (2, H, 4Hp)
                wih = jnp.pad(wih, ((0, 0), (0, Hp - H), (0, 0)))       # (2, Hp, 4Hp)
                w_ih_t.append(wih.astype(compute_dtype))
            w_hh_t.append(whh.T.astype(compute_dtype))            # (Hp, 4Hp)
            bias.append(b.astype(jnp.float32))
        prepared.append({
            "w_ih_t": jnp.stack(w_ih_t),
            "w_hh_t": jnp.stack(w_hh_t),
            "bias": jnp.stack(bias),
        })
    return prepared, Hp


# ------------------------------- forward wrapper -------------------------------
def bilstm_forward(x, params, *, hidden_size, hidden_p,
                   compute_dtype=jnp.bfloat16, time_chunk=64):
    """x: (batch, seq, input_size) -> (batch, seq, 2*hidden_size). Eval-mode nn.LSTM."""
    B, S, _ = x.shape
    H, Hp = hidden_size, hidden_p
    Bp = _round_up(B, _SUBLANE)

    # Pick the time chunk: as large as possible but cap the gx block at ~8 MiB of VMEM.
    bytes_per_row = Bp * 4 * Hp * jnp.dtype(compute_dtype).itemsize
    t_chunk = max(1, min(S, time_chunk, (8 * 2**20) // max(1, bytes_per_row)))
    Sp = _round_up(S, t_chunk)

    x_tm = jnp.transpose(x, (1, 0, 2)).astype(compute_dtype)      # (S, B, in)
    x_tm = jnp.pad(x_tm, ((0, 0), (0, Bp - B), (0, 0)))           # (S, Bp, in)
    time_mask = (jnp.arange(Sp) < S)[None, :, None, None] if Sp != S else None

    prev = None                                                   # (2, Sp, Bp, Hp)
    for li, lp in enumerate(params):
        if li == 0:
            gx = jnp.einsum("sbi,dig->dsbg", x_tm, lp["w_ih_t"],
                            preferred_element_type=jnp.float32)   # (2, S, Bp, 4Hp)
            gx = gx + lp["bias"][:, None, None, :]
            if Sp != S:  # zero padded timesteps -> the recurrence keeps zero state there
                gx = jnp.pad(gx, ((0, 0), (0, Sp - S), (0, 0), (0, 0)))
        else:
            gx = jnp.einsum("psbh,dphg->dsbg", prev, lp["w_ih_t"],
                            preferred_element_type=jnp.float32)   # (2, Sp, Bp, 4Hp)
            gx = gx + lp["bias"][:, None, None, :]
            if time_mask is not None:
                gx = jnp.where(time_mask, gx, 0.0)
        gx = gx.astype(compute_dtype)
        prev = _lstm_recurrence(gx, lp["w_hh_t"], Hp, t_chunk, compute_dtype)

    out = prev[:, :S, :B, :H]                                     # (2, S, B, H)
    out = jnp.concatenate([out[0], out[1]], axis=-1)              # (S, B, 2H)
    return jnp.transpose(out, (1, 0, 2)).astype(x.dtype)          # (B, S, 2H)


# --------------------- pure-JAX reference (same dtype policy) ---------------------
def bilstm_reference(x, params, *, hidden_size, hidden_p, compute_dtype=jnp.bfloat16):
    B, S, _ = x.shape
    H, Hp = hidden_size, hidden_p
    inp = jnp.transpose(x, (1, 0, 2)).astype(compute_dtype)       # (S, B, in)

    def run_direction(gx, whh):  # gx: (S, B, 4Hp) f32, whh: (Hp, 4Hp)
        def step(carry, g):
            h, c = carry
            gates = g + jnp.dot(h.astype(whh.dtype), whh, preferred_element_type=jnp.float32)
            i = jax.nn.sigmoid(gates[:, 0 * Hp:1 * Hp])
            f = jax.nn.sigmoid(gates[:, 1 * Hp:2 * Hp])
            gg = jnp.tanh(gates[:, 2 * Hp:3 * Hp])
            o = jax.nn.sigmoid(gates[:, 3 * Hp:4 * Hp])
            c = f * c + i * gg
            h = o * jnp.tanh(c)
            return (h, c), h

        h0 = jnp.zeros((gx.shape[1], Hp), jnp.float32)
        _, hs = lax.scan(step, (h0, h0), gx)
        return hs

    for li, lp in enumerate(params):
        outs = []
        for d in range(2):
            if li == 0:
                gx = jnp.einsum("sbi,ig->sbg", inp, lp["w_ih_t"][d],
                                preferred_element_type=jnp.float32)
            else:
                gx = jnp.einsum("psbh,phg->sbg", inp, lp["w_ih_t"][d],
                                preferred_element_type=jnp.float32)
            gx = (gx + lp["bias"][d][None, None, :]).astype(compute_dtype).astype(jnp.float32)
            if d == 1:
                gx = gx[::-1]
            hs = run_direction(gx, lp["w_hh_t"][d])
            if d == 1:
                hs = hs[::-1]
            outs.append(hs.astype(compute_dtype))
        inp = jnp.stack(outs)                                     # (2, S, B, Hp)

    out = jnp.concatenate([inp[0][:, :, :H], inp[1][:, :, :H]], axis=-1)
    return jnp.transpose(out, (1, 0, 2)).astype(x.dtype)


if __name__ == "__main__":
    batch, seq, input_size, hidden_size, num_layers = 2, 8, 32, 32, 2

    key = jax.random.PRNGKey(0)
    kx, kp = jax.random.split(key)
    x = jax.random.normal(kx, (batch, seq, input_size), jnp.float32)

    torch_params = init_bilstm_params(kp, input_size, hidden_size, num_layers)
    params, hidden_p = prepare_params(torch_params, input_size, hidden_size)

    fwd = jax.jit(functools.partial(bilstm_forward,
                                    hidden_size=hidden_size, hidden_p=hidden_p))
    out = jax.block_until_ready(fwd(x, params))
    assert out.shape == (batch, seq, 2 * hidden_size), out.shape

    ref = jax.block_until_ready(
        bilstm_reference(x, params, hidden_size=hidden_size, hidden_p=hidden_p))
    err = float(jnp.max(jnp.abs(out.astype(jnp.float32) - ref.astype(jnp.float32))))
    assert err < 3e-2, f"max abs err {err}"

    print("KERNEL_OK")
</pallas_src>

<mosaic_0001>
module attributes {stable_mosaic.version = 11 : i64} {
  func.func @_recurrent_kernel(%arg0: i32, %arg1: i32, %arg2: memref<1x8x8x512xbf16, #tpu.memory_space<vmem>>, %arg3: memref<1x128x512xbf16, #tpu.memory_space<vmem>>, %arg4: memref<1x8x8x128xbf16, #tpu.memory_space<vmem>>, %arg5: memref<8x128xf32, #tpu.memory_space<vmem>>, %arg6: memref<8x128xf32, #tpu.memory_space<vmem>>) attributes {dimension_semantics = [#tpu.dimension_semantics<parallel>, #tpu.dimension_semantics<arbitrary>], iteration_bounds = array<i64: 2, 1>, scalar_prefetch = 0 : i64, scratch_operands = 2 : i64, tpu.core_type = #tpu.core_type<tc>, window_params = [{transform_indices = @transform_0, window_bounds = array<i64: 1, 8, 8, 512>}, {transform_indices = @transform_1, window_bounds = array<i64: 1, 128, 512>}, {transform_indices = @transform_2, window_bounds = array<i64: 1, 8, 8, 128>}]} {
    %c0_i32 = arith.constant 0 : i32
    %0 = arith.cmpi eq, %arg1, %c0_i32 : i32
    %1 = arith.extui %0 : i1 to i32
    %c0_i32_0 = arith.constant 0 : i32
    %2 = arith.cmpi ne, %1, %c0_i32_0 : i32
    scf.if %2 {
      %cst_163 = arith.constant 0.000000e+00 : f32
      %365 = vector.broadcast %cst_163 : f32 to vector<8x128xf32>
      %c0_164 = arith.constant 0 : index
      %c0_165 = arith.constant 0 : index
      %366 = vector.load %arg5[%c0_164, %c0_165] : memref<8x128xf32, #tpu.memory_space<vmem>>, vector<8x128xf32>
      tpu.vector_store %arg5[%c0_164, %c0_165], %365 {strides = array<i32>} : memref<8x128xf32, #tpu.memory_space<vmem>>, vector<8x128xf32>,
      %cst_166 = arith.constant 0.000000e+00 : f32
      %367 = vector.broadcast %cst_166 : f32 to vector<8x128xf32>
      %c0_167 = arith.constant 0 : index
      %c0_168 = arith.constant 0 : index
      %368 = vector.load %arg6[%c0_167, %c0_168] : memref<8x128xf32, #tpu.memory_space<vmem>>, vector<8x128xf32>
      tpu.vector_store %arg6[%c0_167, %c0_168], %367 {strides = array<i32>} : memref<8x128xf32, #tpu.memory_space<vmem>>, vector<8x128xf32>,
    } else {
    }
    %c0 = arith.constant 0 : index
    %c0_1 = arith.constant 0 : index
    %c0_2 = arith.constant 0 : index
    %3 = vector.load %arg3[%c0, %c0_1, %c0_2] : memref<1x128x512xbf16, #tpu.memory_space<vmem>>, vector<1x128x512xbf16>
    %4 = vector.shape_cast %3 : vector<1x128x512xbf16> to vector<128x512xbf16>
    %c0_i32_3 = arith.constant 0 : i32
    %c2_i32 = arith.constant 2 : i32
    %5 = arith.muli %c2_i32, %c0_i32_3 : i32
    %c7_i32 = arith.constant 7 : i32
    %6 = arith.subi %c7_i32, %5 : i32
    %7 = arith.muli %arg0, %6 : i32
    %8 = arith.addi %c0_i32_3, %7 : i32
    %c0_4 = arith.constant 0 : index
    %9 = arith.index_cast %8 : i32 to index
    %c0_5 = arith.constant 0 : index
    %c0_6 = arith.constant 0 : index
    %10 = vector.load %arg2[%c0_4, %9, %c0_5, %c0_6] : memref<1x8x8x512xbf16, #tpu.memory_space<vmem>>, vector<1x1x8x512xbf16>
    %11 = vector.shape_cast %10 : vector<1x1x8x512xbf16> to vector<8x512xbf16>
    %12 = arith.extf %11 : vector<8x512xbf16> to vector<8x512xf32>
    %c0_7 = arith.constant 0 : index
    %c0_8 = arith.constant 0 : index
    %13 = vector.load %arg5[%c0_7, %c0_8] : memref<8x128xf32, #tpu.memory_space<vmem>>, vector<8x128xf32>
    %14 = arith.truncf %13 : vector<8x128xf32> to vector<8x128xbf16>
    %cst = arith.constant dense<0.000000e+00> : vector<8x512xf32>
    %15 = tpu.matmul %14, %4, %cst {dimension_numbers = #tpu.dot_dimension_numbers<[1], [0], [0], [1], [0, 0, 1, 1], [], []>} : vector<8x128xbf16>, vector<128x512xbf16>, vector<8x512xf32> -> vector<8x512xf32>
    %16 = arith.addf %12, %15 : vector<8x512xf32>
    %17 = vector.extract_strided_slice %16 {offsets = [0, 0], sizes = [8, 128], strides = [1, 1]} : vector<8x512xf32> to vector<8x128xf32>
    %18 = arith.negf %17 : vector<8x128xf32>
    %19 = math.exp %18 : vector<8x128xf32>
    %cst_9 = arith.constant 1.000000e+00 : f32
    %20 = vector.broadcast %cst_9 : f32 to vector<8x128xf32>
    %21 = arith.addf %20, %19 : vector<8x128xf32>
    %22 = arith.divf %20, %21 : vector<8x128xf32>
    %23 = vector.extract_strided_slice %16 {offsets = [0, 128], sizes = [8, 128], strides = [1, 1]} : vector<8x512xf32> to vector<8x128xf32>
    %24 = arith.negf %23 : vector<8x128xf32>
    %25 = math.exp %24 : vector<8x128xf32>
    %cst_10 = arith.constant 1.000000e+00 : f32
    %26 = vector.broadcast %cst_10 : f32 to vector<8x128xf32>
    %27 = arith.addf %26, %25 : vector<8x128xf32>
    %28 = arith.divf %26, %27 : vector<8x128xf32>
    %29 = vector.extract_strided_slice %16 {offsets = [0, 256], sizes = [8, 128], strides = [1, 1]} : vector<8x512xf32> to vector<8x128xf32>
    %30 = math.tanh %29 : vector<8x128xf32>
    %31 = vector.extract_strided_slice %16 {offsets = [0, 384], sizes = [8, 128], strides = [1, 1]} : vector<8x512xf32> to vector<8x128xf32>
    %32 = arith.negf %31 : vector<8x128xf32>
    %33 = math.exp %32 : vector<8x128xf32>
    %cst_11 = arith.constant 1.000000e+00 : f32
    %34 = vector.broadcast %cst_11 : f32 to vector<8x128xf32>
    %35 = arith.addf %34, %33 : vector<8x128xf32>
    %36 = arith.divf %34, %35 : vector<8x128xf32>
    %c0_12 = arith.constant 0 : index
    %c0_13 = arith.constant 0 : index
    %37 = vector.load %arg6[%c0_12, %c0_13] : memref<8x128xf32, #tpu.memory_space<vmem>>, vector<8x128xf32>
    %38 = arith.mulf %28, %37 : vector<8x128xf32>
    %39 = arith.mulf %22, %30 : vector<8x128xf32>
    %40 = arith.addf %38, %39 : vector<8x128xf32>
    %41 = math.tanh %40 : vector<8x128xf32>
    %42 = arith.mulf %36, %41 : vector<8x128xf32>
    %c0_14 = arith.constant 0 : index
    %c0_15 = arith.constant 0 : index
    %43 = vector.load %arg6[%c0_14, %c0_15] : memref<8x128xf32, #tpu.memory_space<vmem>>, vector<8x128xf32>
    tpu.vector_store %arg6[%c0_14, %c0_15], %40 {strides = array<i32>} : memref<8x128xf32, #tpu.memory_space<vmem>>, vector<8x128xf32>,
    %c0_16 = arith.constant 0 : index
    %c0_17 = arith.constant 0 : index
    %44 = vector.load %arg5[%c0_16, %c0_17] : memref<8x128xf32, #tpu.memory_space<vmem>>, vector<8x128xf32>
    tpu.vector_store %arg5[%c0_16, %c0_17], %42 {strides = array<i32>} : memref<8x128xf32, #tpu.memory_space<vmem>>, vector<8x128xf32>,
    %45 = arith.truncf %42 : vector<8x128xf32> to vector<8x128xbf16>
    %c0_18 = arith.constant 0 : index
    %46 = arith.index_cast %8 : i32 to index
    %c0_19 = arith.constant 0 : index
    %c0_20 = arith.constant 0 : index
    %47 = vector.load %arg4[%c0_18, %46, %c0_19, %c0_20] : memref<1x8x8x128xbf16, #tpu.memory_space<vmem>>, vector<1x1x8x128xbf16>
    %48 = vector.shape_cast %47 : vector<1x1x8x128xbf16> to vector<8x128xbf16>
    %49 = vector.shape_cast %45 : vector<8x128xbf16> to vector<1x1x8x128xbf16>
    tpu.vector_store %arg4[%c0_18, %46, %c0_19, %c0_20], %49 {strides = array<i32>} : memref<1x8x8x128xbf16, #tpu.memory_space<vmem>>, vector<1x1x8x128xbf16>,
    %c1_i32 = arith.constant 1 : i32
    %c2_i32_21 = arith.constant 2 : i32
    %50 = arith.muli %c2_i32_21, %c1_i32 : i32
    %c7_i32_22 = arith.constant 7 : i32
    %51 = arith.subi %c7_i32_22, %50 : i32
    %52 = arith.muli %arg0, %51 : i32
    %53 = arith.addi %c1_i32, %52 : i32
    %c0_23 = arith.constant 0 : index
    %54 = arith.index_cast %53 : i32 to index
    %c0_24 = arith.constant 0 : index
    %c0_25 = arith.constant 0 : index
    %55 = vector.load %arg2[%c0_23, %54, %c0_24, %c0_25] : memref<1x8x8x512xbf16, #tpu.memory_space<vmem>>, vector<1x1x8x512xbf16>
    %56 = vector.shape_cast %55 : vector<1x1x8x512xbf16> to vector<8x512xbf16>
    %57 = arith.extf %56 : vector<8x512xbf16> to vector<8x512xf32>
    %c0_26 = arith.constant 0 : index
    %c0_27 = arith.constant 0 : index
    %58 = vector.load %arg5[%c0_26, %c0_27] : memref<8x128xf32, #tpu.memory_space<vmem>>, vector<8x128xf32>
    %59 = arith.truncf %58 : vector<8x128xf32> to vector<8x128xbf16>
    %cst_28 = arith.constant dense<0.000000e+00> : vector<8x512xf32>
    %60 = tpu.matmul %59, %4, %cst_28 {dimension_numbers = #tpu.dot_dimension_numbers<[1], [0], [0], [1], [0, 0, 1, 1], [], []>} : vector<8x128xbf16>, vector<128x512xbf16>, vector<8x512xf32> -> vector<8x512xf32>
    %61 = arith.addf %57, %60 : vector<8x512xf32>
    %62 = vector.extract_strided_slice %61 {offsets = [0, 0], sizes = [8, 128], strides = [1, 1]} : vector<8x512xf32> to vector<8x128xf32>
    %63 = arith.negf %62 : vector<8x128xf32>
    %64 = math.exp %63 : vector<8x128xf32>
    %cst_29 = arith.constant 1.000000e+00 : f32
    %65 = vector.broadcast %cst_29 : f32 to vector<8x128xf32>
    %66 = arith.addf %65, %64 : vector<8x128xf32>
    %67 = arith.divf %65, %66 : vector<8x128xf32>
    %68 = vector.extract_strided_slice %61 {offsets = [0, 128], sizes = [8, 128], strides = [1, 1]} : vector<8x512xf32> to vector<8x128xf32>
    %69 = arith.negf %68 : vector<8x128xf32>
    %70 = math.exp %69 : vector<8x128xf32>
    %cst_30 = arith.constant 1.000000e+00 : f32
    %71 = vector.broadcast %cst_30 : f32 to vector<8x128xf32>
    %72 = arith.addf %71, %70 : vector<8x128xf32>
    %73 = arith.divf %71, %72 : vector<8x128xf32>
    %74 = vector.extract_strided_slice %61 {offsets = [0, 256], sizes = [8, 128], strides = [1, 1]} : vector<8x512xf32> to vector<8x128xf32>
    %75 = math.tanh %74 : vector<8x128xf32>
    %76 = vector.extract_strided_slice %61 {offsets = [0, 384], sizes = [8, 128], strides = [1, 1]} : vector<8x512xf32> to vector<8x128xf32>
    %77 = arith.negf %76 : vector<8x128xf32>
    %78 = math.exp %77 : vector<8x128xf32>
    %cst_31 = arith.constant 1.000000e+00 : f32
    %79 = vector.broadcast %cst_31 : f32 to vector<8x128xf32>
    %80 = arith.addf %79, %78 : vector<8x128xf32>
    %81 = arith.divf %79, %80 : vector<8x128xf32>
    %c0_32 = arith.constant 0 : index
    %c0_33 = arith.constant 0 : index
    %82 = vector.load %arg6[%c0_32, %c0_33] : memref<8x128xf32, #tpu.memory_space<vmem>>, vector<8x128xf32>
    %83 = arith.mulf %73, %82 : vector<8x128xf32>
    %84 = arith.mulf %67, %75 : vector<8x128xf32>
    %85 = arith.addf %83, %84 : vector<8x128xf32>
    %86 = math.tanh %85 : vector<8x128xf32>
    %87 = arith.mulf %81, %86 : vector<8x128xf32>
    %c0_34 = arith.constant 0 : index
    %c0_35 = arith.constant 0 : index
    %88 = vector.load %arg6[%c0_34, %c0_35] : memref<8x128xf32, #tpu.memory_space<vmem>>, vector<8x128xf32>
    tpu.vector_store %arg6[%c0_34, %c0_35], %85 {strides = array<i32>} : memref<8x128xf32, #tpu.memory_space<vmem>>, vector<8x128xf32>,
    %c0_36 = arith.constant 0 : index
    %c0_37 = arith.constant 0 : index
    %89 = vector.load %arg5[%c0_36, %c0_37] : memref<8x128xf32, #tpu.memory_space<vmem>>, vector<8x128xf32>
    tpu.vector_store %arg5[%c0_36, %c0_37], %87 {strides = array<i32>} : memref<8x128xf32, #tpu.memory_space<vmem>>, vector<8x128xf32>,
    %90 = arith.truncf %87 : vector<8x128xf32> to vector<8x128xbf16>
    %c0_38 = arith.constant 0 : index
    %91 = arith.index_cast %53 : i32 to index
    %c0_39 = arith.constant 0 : index
    %c0_40 = arith.constant 0 : index
    %92 = vector.load %arg4[%c0_38, %91, %c0_39, %c0_40] : memref<1x8x8x128xbf16, #tpu.memory_space<vmem>>, vector<1x1x8x128xbf16>
    %93 = vector.shape_cast %92 : vector<1x1x8x128xbf16> to vector<8x128xbf16>
    %94 = vector.shape_cast %90 : vector<8x128xbf16> to vector<1x1x8x128xbf16>
    tpu.vector_store %arg4[%c0_38, %91, %c0_39, %c0_40], %94 {strides = array<i32>} : memref<1x8x8x128xbf16, #tpu.memory_space<vmem>>, vector<1x1x8x128xbf16>,
    %c2_i32_41 = arith.constant 2 : i32
    %c2_i32_42 = arith.constant 2 : i32
    %95 = arith.muli %c2_i32_42, %c2_i32_41 : i32
    %c7_i32_43 = arith.constant 7 : i32
    %96 = arith.subi %c7_i32_43, %95 : i32
    %97 = arith.muli %arg0, %96 : i32
    %98 = arith.addi %c2_i32_41, %97 : i32
    %c0_44 = arith.constant 0 : index
    %99 = arith.index_cast %98 : i32 to index
    %c0_45 = arith.constant 0 : index
    %c0_46 = arith.constant 0 : index
    %100 = vector.load %arg2[%c0_44, %99, %c0_45, %c0_46] : memref<1x8x8x512xbf16, #tpu.memory_space<vmem>>, vector<1x1x8x512xbf16>
    %101 = vector.shape_cast %100 : vector<1x1x8x512xbf16> to vector<8x512xbf16>
    %102 = arith.extf %101 : vector<8x512xbf16> to vector<8x512xf32>
    %c0_47 = arith.constant 0 : index
    %c0_48 = arith.constant 0 : index
    %103 = vector.load %arg5[%c0_47, %c0_48] : memref<8x128xf32, #tpu.memory_space<vmem>>, vector<8x128xf32>
    %104 = arith.truncf %103 : vector<8x128xf32> to vector<8x128xbf16>
    %cst_49 = arith.constant dense<0.000000e+00> : vector<8x512xf32>
    %105 = tpu.matmul %104, %4, %cst_49 {dimension_numbers = #tpu.dot_dimension_numbers<[1], [0], [0], [1], [0, 0, 1, 1], [], []>} : vector<8x128xbf16>, vector<128x512xbf16>, vector<8x512xf32> -> vector<8x512xf32>
    %106 = arith.addf %102, %105 : vector<8x512xf32>
    %107 = vector.extract_strided_slice %106 {offsets = [0, 0], sizes = [8, 128], strides = [1, 1]} : vector<8x512xf32> to vector<8x128xf32>
    %108 = arith.negf %107 : vector<8x128xf32>
    %109 = math.exp %108 : vector<8x128xf32>
    %cst_50 = arith.constant 1.000000e+00 : f32
    %110 = vector.broadcast %cst_50 : f32 to vector<8x128xf32>
    %111 = arith.addf %110, %109 : vector<8x128xf32>
    %112 = arith.divf %110, %111 : vector<8x128xf32>
    %113 = vector.extract_strided_slice %106 {offsets = [0, 128], sizes = [8, 128], strides = [1, 1]} : vector<8x512xf32> to vector<8x128xf32>
    %114 = arith.negf %113 : vector<8x128xf32>
    %115 = math.exp %114 : vector<8x128xf32>
    %cst_51 = arith.constant 1.000000e+00 : f32
    %116 = vector.broadcast %cst_51 : f32 to vector<8x128xf32>
    %117 = arith.addf %116, %115 : vector<8x128xf32>
    %118 = arith.divf %116, %117 : vector<8x128xf32>
    %119 = vector.extract_strided_slice %106 {offsets = [0, 256], sizes = [8, 128], strides = [1, 1]} : vector<8x512xf32> to vector<8x128xf32>
    %120 = math.tanh %119 : vector<8x128xf32>
    %121 = vector.extract_strided_slice %106 {offsets = [0, 384], sizes = [8, 128], strides = [1, 1]} : vector<8x512xf32> to vector<8x128xf32>
    %122 = arith.negf %121 : vector<8x128xf32>
    %123 = math.exp %122 : vector<8x128xf32>
    %cst_52 = arith.constant 1.000000e+00 : f32
    %124 = vector.broadcast %cst_52 : f32 to vector<8x128xf32>
    %125 = arith.addf %124, %123 : vector<8x128xf32>
    %126 = arith.divf %124, %125 : vector<8x128xf32>
    %c0_53 = arith.constant 0 : index
    %c0_54 = arith.constant 0 : index
    %127 = vector.load %arg6[%c0_53, %c0_54] : memref<8x128xf32, #tpu.memory_space<vmem>>, vector<8x128xf32>
    %128 = arith.mulf %118, %127 : vector<8x128xf32>
    %129 = arith.mulf %112, %120 : vector<8x128xf32>
    %130 = arith.addf %128, %129 : vector<8x128xf32>
    %131 = math.tanh %130 : vector<8x128xf32>
    %132 = arith.mulf %126, %131 : vector<8x128xf32>
    %c0_55 = arith.constant 0 : index
    %c0_56 = arith.constant 0 : index
    %133 = vector.load %arg6[%c0_55, %c0_56] : memref<8x128xf32, #tpu.memory_space<vmem>>, vector<8x128xf32>
    tpu.vector_store %arg6[%c0_55, %c0_56], %130 {strides = array<i32>} : memref<8x128xf32, #tpu.memory_space<vmem>>, vector<8x128xf32>,
    %c0_57 = arith.constant 0 : index
    %c0_58 = arith.constant 0 : index
    %134 = vector.load %arg5[%c0_57, %c0_58] : memref<8x128xf32, #tpu.memory_space<vmem>>, vector<8x128xf32>
    tpu.vector_store %arg5[%c0_57, %c0_58], %132 {strides = array<i32>} : memref<8x128xf32, #tpu.memory_space<vmem>>, vector<8x128xf32>,
    %135 = arith.truncf %132 : vector<8x128xf32> to vector<8x128xbf16>
    %c0_59 = arith.constant 0 : index
    %136 = arith.index_cast %98 : i32 to index
    %c0_60 = arith.constant 0 : index
    %c0_61 = arith.constant 0 : index
    %137 = vector.load %arg4[%c0_59, %136, %c0_60, %c0_61] : memref<1x8x8x128xbf16, #tpu.memory_space<vmem>>, vector<1x1x8x128xbf16>
    %138 = vector.shape_cast %137 : vector<1x1x8x128xbf16> to vector<8x128xbf16>
    %139 = vector.shape_cast %135 : vector<8x128xbf16> to vector<1x1x8x128xbf16>
    tpu.vector_store %arg4[%c0_59, %136, %c0_60, %c0_61], %139 {strides = array<i32>} : memref<1x8x8x128xbf16, #tpu.memory_space<vmem>>, vector<1x1x8x128xbf16>,
    %c3_i32 = arith.constant 3 : i32
    %c2_i32_62 = arith.constant 2 : i32
    %140 = arith.muli %c2_i32_62, %c3_i32 : i32
    %c7_i32_63 = arith.constant 7 : i32
    %141 = arith.subi %c7_i32_63, %140 : i32
    %142 = arith.muli %arg0, %141 : i32
    %143 = arith.addi %c3_i32, %142 : i32
    %c0_64 = arith.constant 0 : index
    %144 = arith.index_cast %143 : i32 to index
    %c0_65 = arith.constant 0 : index
    %c0_66 = arith.constant 0 : index
    %145 = vector.load %arg2[%c0_64, %144, %c0_65, %c0_66] : memref<1x8x8x512xbf16, #tpu.memory_space<vmem>>, vector<1x1x8x512xbf16>
    %146 = vector.shape_cast %145 : vector<1x1x8x512xbf16> to vector<8x512xbf16>
    %147 = arith.extf %146 : vector<8x512xbf16> to vector<8x512xf32>
    %c0_67 = arith.constant 0 : index
    %c0_68 = arith.constant 0 : index
    %148 = vector.load %arg5[%c0_67, %c0_68] : memref<8x128xf32, #tpu.memory_space<vmem>>, vector<8x128xf32>
    %149 = arith.truncf %148 : vector<8x128xf32> to vector<8x128xbf16>
    %cst_69 = arith.constant dense<0.000000e+00> : vector<8x512xf32>
    %150 = tpu.matmul %149, %4, %cst_69 {dimension_numbers = #tpu.dot_dimension_numbers<[1], [0], [0], [1], [0, 0, 1, 1], [], []>} : vector<8x128xbf16>, vector<128x512xbf16>, vector<8x512xf32> -> vector<8x512xf32>
    %151 = arith.addf %147, %150 : vector<8x512xf32>
    %152 = vector.extract_strided_slice %151 {offsets = [0, 0], sizes = [8, 128], strides = [1, 1]} : vector<8x512xf32> to vector<8x128xf32>
    %153 = arith.negf %152 : vector<8x128xf32>
    %154 = math.exp %153 : vector<8x128xf32>
    %cst_70 = arith.constant 1.000000e+00 : f32
    %155 = vector.broadcast %cst_70 : f32 to vector<8x128xf32>
    %156 = arith.addf %155, %154 : vector<8x128xf32>
    %157 = arith.divf %155, %156 : vector<8x128xf32>
    %158 = vector.extract_strided_slice %151 {offsets = [0, 128], sizes = [8, 128], strides = [1, 1]} : vector<8x512xf32> to vector<8x128xf32>
    %159 = arith.negf %158 : vector<8x128xf32>
    %160 = math.exp %159 : vector<8x128xf32>
    %cst_71 = arith.constant 1.000000e+00 : f32
    %161 = vector.broadcast %cst_71 : f32 to vector<8x128xf32>
    %162 = arith.addf %161, %160 : vector<8x128xf32>
    %163 = arith.divf %161, %162 : vector<8x128xf32>
    %164 = vector.extract_strided_slice %151 {offsets = [0, 256], sizes = [8, 128], strides = [1, 1]} : vector<8x512xf32> to vector<8x128xf32>
    %165 = math.tanh %164 : vector<8x128xf32>
    %166 = vector.extract_strided_slice %151 {offsets = [0, 384], sizes = [8, 128], strides = [1, 1]} : vector<8x512xf32> to vector<8x128xf32>
    %167 = arith.negf %166 : vector<8x128xf32>
    %168 = math.exp %167 : vector<8x128xf32>
    %cst_72 = arith.constant 1.000000e+00 : f32
    %169 = vector.broadcast %cst_72 : f32 to vector<8x128xf32>
    %170 = arith.addf %169, %168 : vector<8x128xf32>
    %171 = arith.divf %169, %170 : vector<8x128xf32>
    %c0_73 = arith.constant 0 : index
    %c0_74 = arith.constant 0 : index
    %172 = vector.load %arg6[%c0_73, %c0_74] : memref<8x128xf32, #tpu.memory_space<vmem>>, vector<8x128xf32>
    %173 = arith.mulf %163, %172 : vector<8x128xf32>
    %174 = arith.mulf %157, %165 : vector<8x128xf32>
    %175 = arith.addf %173, %174 : vector<8x128xf32>
    %176 = math.tanh %175 : vector<8x128xf32>
    %177 = arith.mulf %171, %176 : vector<8x128xf32>
    %c0_75 = arith.constant 0 : index
    %c0_76 = arith.constant 0 : index
    %178 = vector.load %arg6[%c0_75, %c0_76] : memref<8x128xf32, #tpu.memory_space<vmem>>, vector<8x128xf32>
    tpu.vector_store %arg6[%c0_75, %c0_76], %175 {strides = array<i32>} : memref<8x128xf32, #tpu.memory_space<vmem>>, vector<8x128xf32>,
    %c0_77 = arith.constant 0 : index
    %c0_78 = arith.constant 0 : index
    %179 = vector.load %arg5[%c0_77, %c0_78] : memref<8x128xf32, #tpu.memory_space<vmem>>, vector<8x128xf32>
    tpu.vector_store %arg5[%c0_77, %c0_78], %177 {strides = array<i32>} : memref<8x128xf32, #tpu.memory_space<vmem>>, vector<8x128xf32>,
    %180 = arith.truncf %177 : vector<8x128xf32> to vector<8x128xbf16>
    %c0_79 = arith.constant 0 : index
    %181 = arith.index_cast %143 : i32 to index
    %c0_80 = arith.constant 0 : index
    %c0_81 = arith.constant 0 : index
    %182 = vector.load %arg4[%c0_79, %181, %c0_80, %c0_81] : memref<1x8x8x128xbf16, #tpu.memory_space<vmem>>, vector<1x1x8x128xbf16>
    %183 = vector.shape_cast %182 : vector<1x1x8x128xbf16> to vector<8x128xbf16>
    %184 = vector.shape_cast %180 : vector<8x128xbf16> to vector<1x1x8x128xbf16>
    tpu.vector_store %arg4[%c0_79, %181, %c0_80, %c0_81], %184 {strides = array<i32>} : memref<1x8x8x128xbf16, #tpu.memory_space<vmem>>, vector<1x1x8x128xbf16>,
    %c4_i32 = arith.constant 4 : i32
    %c2_i32_82 = arith.constant 2 : i32
    %185 = arith.muli %c2_i32_82, %c4_i32 : i32
    %c7_i32_83 = arith.constant 7 : i32
    %186 = arith.subi %c7_i32_83, %185 : i32
    %187 = arith.muli %arg0, %186 : i32
    %188 = arith.addi %c4_i32, %187 : i32
    %c0_84 = arith.constant 0 : index
    %189 = arith.index_cast %188 : i32 to index
    %c0_85 = arith.constant 0 : index
    %c0_86 = arith.constant 0 : index
    %190 = vector.load %arg2[%c0_84, %189, %c0_85, %c0_86] : memref<1x8x8x512xbf16, #tpu.memory_space<vmem>>, vector<1x1x8x512xbf16>
    %191 = vector.shape_cast %190 : vector<1x1x8x512xbf16> to vector<8x512xbf16>
    %192 = arith.extf %191 : vector<8x512xbf16> to vector<8x512xf32>
    %c0_87 = arith.constant 0 : index
    %c0_88 = arith.constant 0 : index
    %193 = vector.load %arg5[%c0_87, %c0_88] : memref<8x128xf32, #tpu.memory_space<vmem>>, vector<8x128xf32>
    %194 = arith.truncf %193 : vector<8x128xf32> to vector<8x128xbf16>
    %cst_89 = arith.constant dense<0.000000e+00> : vector<8x512xf32>
    %195 = tpu.matmul %194, %4, %cst_89 {dimension_numbers = #tpu.dot_dimension_numbers<[1], [0], [0], [1], [0, 0, 1, 1], [], []>} : vector<8x128xbf16>, vector<128x512xbf16>, vector<8x512xf32> -> vector<8x512xf32>
    %196 = arith.addf %192, %195 : vector<8x512xf32>
    %197 = vector.extract_strided_slice %196 {offsets = [0, 0], sizes = [8, 128], strides = [1, 1]} : vector<8x512xf32> to vector<8x128xf32>
    %198 = arith.negf %197 : vector<8x128xf32>
    %199 = math.exp %198 : vector<8x128xf32>
    %cst_90 = arith.constant 1.000000e+00 : f32
    %200 = vector.broadcast %cst_90 : f32 to vector<8x128xf32>
    %201 = arith.addf %200, %199 : vector<8x128xf32>
    %202 = arith.divf %200, %201 : vector<8x128xf32>
    %203 = vector.extract_strided_slice %196 {offsets = [0, 128], sizes = [8, 128], strides = [1, 1]} : vector<8x512xf32> to vector<8x128xf32>
    %204 = arith.negf %203 : vector<8x128xf32>
    %205 = math.exp %204 : vector<8x128xf32>
    %cst_91 = arith.constant 1.000000e+00 : f32
    %206 = vector.broadcast %cst_91 : f32 to vector<8x128xf32>
    %207 = arith.addf %206, %205 : vector<8x128xf32>
    %208 = arith.divf %206, %207 : vector<8x128xf32>
    %209 = vector.extract_strided_slice %196 {offsets = [0, 256], sizes = [8, 128], strides = [1, 1]} : vector<8x512xf32> to vector<8x128xf32>
    %210 = math.tanh %209 : vector<8x128xf32>
    %211 = vector.extract_strided_slice %196 {offsets = [0, 384], sizes = [8, 128], strides = [1, 1]} : vector<8x512xf32> to vector<8x128xf32>
    %212 = arith.negf %211 : vector<8x128xf32>
    %213 = math.exp %212 : vector<8x128xf32>
    %cst_92 = arith.constant 1.000000e+00 : f32
    %214 = vector.broadcast %cst_92 : f32 to vector<8x128xf32>
    %215 = arith.addf %214, %213 : vector<8x128xf32>
    %216 = arith.divf %214, %215 : vector<8x128xf32>
    %c0_93 = arith.constant 0 : index
    %c0_94 = arith.constant 0 : index
    %217 = vector.load %arg6[%c0_93, %c0_94] : memref<8x128xf32, #tpu.memory_space<vmem>>, vector<8x128xf32>
    %218 = arith.mulf %208, %217 : vector<8x128xf32>
    %219 = arith.mulf %202, %210 : vector<8x128xf32>
    %220 = arith.addf %218, %219 : vector<8x128xf32>
    %221 = math.tanh %220 : vector<8x128xf32>
    %222 = arith.mulf %216, %221 : vector<8x128xf32>
    %c0_95 = arith.constant 0 : index
    %c0_96 = arith.constant 0 : index
    %223 = vector.load %arg6[%c0_95, %c0_96] : memref<8x128xf32, #tpu.memory_space<vmem>>, vector<8x128xf32>
    tpu.vector_store %arg6[%c0_95, %c0_96], %220 {strides = array<i32>} : memref<8x128xf32, #tpu.memory_space<vmem>>, vector<8x128xf32>,
    %c0_97 = arith.constant 0 : index
    %c0_98 = arith.constant 0 : index
    %224 = vector.load %arg5[%c0_97, %c0_98] : memref<8x128xf32, #tpu.memory_space<vmem>>, vector<8x128xf32>
    tpu.vector_store %arg5[%c0_97, %c0_98], %222 {strides = array<i32>} : memref<8x128xf32, #tpu.memory_space<vmem>>, vector<8x128xf32>,
    %225 = arith.truncf %222 : vector<8x128xf32> to vector<8x128xbf16>
    %c0_99 = arith.constant 0 : index
    %226 = arith.index_cast %188 : i32 to index
    %c0_100 = arith.constant 0 : index
    %c0_101 = arith.constant 0 : index
    %227 = vector.load %arg4[%c0_99, %226, %c0_100, %c0_101] : memref<1x8x8x128xbf16, #tpu.memory_space<vmem>>, vector<1x1x8x128xbf16>
    %228 = vector.shape_cast %227 : vector<1x1x8x128xbf16> to vector<8x128xbf16>
    %229 = vector.shape_cast %225 : vector<8x128xbf16> to vector<1x1x8x128xbf16>
    tpu.vector_store %arg4[%c0_99, %226, %c0_100, %c0_101], %229 {strides = array<i32>} : memref<1x8x8x128xbf16, #tpu.memory_space<vmem>>, vector<1x1x8x128xbf16>,
    %c5_i32 = arith.constant 5 : i32
    %c2_i32_102 = arith.constant 2 : i32
    %230 = arith.muli %c2_i32_102, %c5_i32 : i32
    %c7_i32_103 = arith.constant 7 : i32
    %231 = arith.subi %c7_i32_103, %230 : i32
    %232 = arith.muli %arg0, %231 : i32
    %233 = arith.addi %c5_i32, %232 : i32
    %c0_104 = arith.constant 0 : index
    %234 = arith.index_cast %233 : i32 to index
    %c0_105 = arith.constant 0 : index
    %c0_106 = arith.constant 0 : index
    %235 = vector.load %arg2[%c0_104, %234, %c0_105, %c0_106] : memref<1x8x8x512xbf16, #tpu.memory_space<vmem>>, vector<1x1x8x512xbf16>
    %236 = vector.shape_cast %235 : vector<1x1x8x512xbf16> to vector<8x512xbf16>
    %237 = arith.extf %236 : vector<8x512xbf16> to vector<8x512xf32>
    %c0_107 = arith.constant 0 : index
    %c0_108 = arith.constant 0 : index
    %238 = vector.load %arg5[%c0_107, %c0_108] : memref<8x128xf32, #tpu.memory_space<vmem>>, vector<8x128xf32>
    %239 = arith.truncf %238 : vector<8x128xf32> to vector<8x128xbf16>
    %cst_109 = arith.constant dense<0.000000e+00> : vector<8x512xf32>
    %240 = tpu.matmul %239, %4, %cst_109 {dimension_numbers = #tpu.dot_dimension_numbers<[1], [0], [0], [1], [0, 0, 1, 1], [], []>} : vector<8x128xbf16>, vector<128x512xbf16>, vector<8x512xf32> -> vector<8x512xf32>
    %241 = arith.addf %237, %240 : vector<8x512xf32>
    %242 = vector.extract_strided_slice %241 {offsets = [0, 0], sizes = [8, 128], strides = [1, 1]} : vector<8x512xf32> to vector<8x128xf32>
    %243 = arith.negf %242 : vector<8x128xf32>
    %244 = math.exp %243 : vector<8x128xf32>
    %cst_110 = arith.constant 1.000000e+00 : f32
    %245 = vector.broadcast %cst_110 : f32 to vector<8x128xf32>
    %246 = arith.addf %245, %244 : vector<8x128xf32>
    %247 = arith.divf %245, %246 : vector<8x128xf32>
    %248 = vector.extract_strided_slice %241 {offsets = [0, 128], sizes = [8, 128], strides = [1, 1]} : vector<8x512xf32> to vector<8x128xf32>
    %249 = arith.negf %248 : vector<8x128xf32>
    %250 = math.exp %249 : vector<8x128xf32>
    %cst_111 = arith.constant 1.000000e+00 : f32
    %251 = vector.broadcast %cst_111 : f32 to vector<8x128xf32>
    %252 = arith.addf %251, %250 : vector<8x128xf32>
    %253 = arith.divf %251, %252 : vector<8x128xf32>
    %254 = vector.extract_strided_slice %241 {offsets = [0, 256], sizes = [8, 128], strides = [1, 1]} : vector<8x512xf32> to vector<8x128xf32>
    %255 = math.tanh %254 : vector<8x128xf32>
    %256 = vector.extract_strided_slice %241 {offsets = [0, 384], sizes = [8, 128], strides = [1, 1]} : vector<8x512xf32> to vector<8x128xf32>
    %257 = arith.negf %256 : vector<8x128xf32>
    %258 = math.exp %257 : vector<8x128xf32>
    %cst_112 = arith.constant 1.000000e+00 : f32
    %259 = vector.broadcast %cst_112 : f32 to vector<8x128xf32>
    %260 = arith.addf %259, %258 : vector<8x128xf32>
    %261 = arith.divf %259, %260 : vector<8x128xf32>
    %c0_113 = arith.constant 0 : index
    %c0_114 = arith.constant 0 : index
    %262 = vector.load %arg6[%c0_113, %c0_114] : memref<8x128xf32, #tpu.memory_space<vmem>>, vector<8x128xf32>
    %263 = arith.mulf %253, %262 : vector<8x128xf32>
    %264 = arith.mulf %247, %255 : vector<8x128xf32>
    %265 = arith.addf %263, %264 : vector<8x128xf32>
    %266 = math.tanh %265 : vector<8x128xf32>
    %267 = arith.mulf %261, %266 : vector<8x128xf32>
    %c0_115 = arith.constant 0 : index
    %c0_116 = arith.constant 0 : index
    %268 = vector.load %arg6[%c0_115, %c0_116] : memref<8x128xf32, #tpu.memory_space<vmem>>, vector<8x128xf32>
    tpu.vector_store %arg6[%c0_115, %c0_116], %265 {strides = array<i32>} : memref<8x128xf32, #tpu.memory_space<vmem>>, vector<8x128xf32>,
    %c0_117 = arith.constant 0 : index
    %c0_118 = arith.constant 0 : index
    %269 = vector.load %arg5[%c0_117, %c0_118] : memref<8x128xf32, #tpu.memory_space<vmem>>, vector<8x128xf32>
    tpu.vector_store %arg5[%c0_117, %c0_118], %267 {strides = array<i32>} : memref<8x128xf32, #tpu.memory_space<vmem>>, vector<8x128xf32>,
    %270 = arith.truncf %267 : vector<8x128xf32> to vector<8x128xbf16>
    %c0_119 = arith.constant 0 : index
    %271 = arith.index_cast %233 : i32 to index
    %c0_120 = arith.constant 0 : index
    %c0_121 = arith.constant 0 : index
    %272 = vector.load %arg4[%c0_119, %271, %c0_120, %c0_121] : memref<1x8x8x128xbf16, #tpu.memory_space<vmem>>, vector<1x1x8x128xbf16>
    %273 = vector.shape_cast %272 : vector<1x1x8x128xbf16> to vector<8x128xbf16>
    %274 = vector.shape_cast %270 : vector<8x128xbf16> to vector<1x1x8x128xbf16>
    tpu.vector_store %arg4[%c0_119, %271, %c0_120, %c0_121], %274 {strides = array<i32>} : memref<1x8x8x128xbf16, #tpu.memory_space<vmem>>, vector<1x1x8x128xbf16>,
    %c6_i32 = arith.constant 6 : i32
    %c2_i32_122 = arith.constant 2 : i32
    %275 = arith.muli %c2_i32_122, %c6_i32 : i32
    %c7_i32_123 = arith.constant 7 : i32
    %276 = arith.subi %c7_i32_123, %275 : i32
    %277 = arith.muli %arg0, %276 : i32
    %278 = arith.addi %c6_i32, %277 : i32
    %c0_124 = arith.constant 0 : index
    %279 = arith.index_cast %278 : i32 to index
    %c0_125 = arith.constant 0 : index
    %c0_126 = arith.constant 0 : index
    %280 = vector.load %arg2[%c0_124, %279, %c0_125, %c0_126] : memref<1x8x8x512xbf16, #tpu.memory_space<vmem>>, vector<1x1x8x512xbf16>
    %281 = vector.shape_cast %280 : vector<1x1x8x512xbf16> to vector<8x512xbf16>
    %282 = arith.extf %281 : vector<8x512xbf16> to vector<8x512xf32>
    %c0_127 = arith.constant 0 : index
    %c0_128 = arith.constant 0 : index
    %283 = vector.load %arg5[%c0_127, %c0_128] : memref<8x128xf32, #tpu.memory_space<vmem>>, vector<8x128xf32>
    %284 = arith.truncf %283 : vector<8x128xf32> to vector<8x128xbf16>
    %cst_129 = arith.constant dense<0.000000e+00> : vector<8x512xf32>
    %285 = tpu.matmul %284, %4, %cst_129 {dimension_numbers = #tpu.dot_dimension_numbers<[1], [0], [0], [1], [0, 0, 1, 1], [], []>} : vector<8x128xbf16>, vector<128x512xbf16>, vector<8x512xf32> -> vector<8x512xf32>
    %286 = arith.addf %282, %285 : vector<8x512xf32>
    %287 = vector.extract_strided_slice %286 {offsets = [0, 0], sizes = [8, 128], strides = [1, 1]} : vector<8x512xf32> to vector<8x128xf32>
    %288 = arith.negf %287 : vector<8x128xf32>
    %289 = math.exp %288 : vector<8x128xf32>
    %cst_130 = arith.constant 1.000000e+00 : f32
    %290 = vector.broadcast %cst_130 : f32 to vector<8x128xf32>
    %291 = arith.addf %290, %289 : vector<8x128xf32>
    %292 = arith.divf %290, %291 : vector<8x128xf32>
    %293 = vector.extract_strided_slice %286 {offsets = [0, 128], sizes = [8, 128], strides = [1, 1]} : vector<8x512xf32> to vector<8x128xf32>
    %294 = arith.negf %293 : vector<8x128xf32>
    %295 = math.exp %294 : vector<8x128xf32>
    %cst_131 = arith.constant 1.000000e+00 : f32
    %296 = vector.broadcast %cst_131 : f32 to vector<8x128xf32>
    %297 = arith.addf %296, %295 : vector<8x128xf32>
    %298 = arith.divf %296, %297 : vector<8x128xf32>
    %299 = vector.extract_strided_slice %286 {offsets = [0, 256], sizes = [8, 128], strides = [1, 1]} : vector<8x512xf32> to vector<8x128xf32>
    %300 = math.tanh %299 : vector<8x128xf32>
    %301 = vector.extract_strided_slice %286 {offsets = [0, 384], sizes = [8, 128], strides = [1, 1]} : vector<8x512xf32> to vector<8x128xf32>
    %302 = arith.negf %301 : vector<8x128xf32>
    %303 = math.exp %302 : vector<8x128xf32>
    %cst_132 = arith.constant 1.000000e+00 : f32
    %304 = vector.broadcast %cst_132 : f32 to vector<8x128xf32>
    %305 = arith.addf %304, %303 : vector<8x128xf32>
    %306 = arith.divf %304, %305 : vector<8x128xf32>
    %c0_133 = arith.constant 0 : index
    %c0_134 = arith.constant 0 : index
    %307 = vector.load %arg6[%c0_133, %c0_134] : memref<8x128xf32, #tpu.memory_space<vmem>>, vector<8x128xf32>
    %308 = arith.mulf %298, %307 : vector<8x128xf32>
    %309 = arith.mulf %292, %300 : vector<8x128xf32>
    %310 = arith.addf %308, %309 : vector<8x128xf32>
    %311 = math.tanh %310 : vector<8x128xf32>
    %312 = arith.mulf %306, %311 : vector<8x128xf32>
    %c0_135 = arith.constant 0 : index
    %c0_136 = arith.constant 0 : index
    %313 = vector.load %arg6[%c0_135, %c0_136] : memref<8x128xf32, #tpu.memory_space<vmem>>, vector<8x128xf32>
    tpu.vector_store %arg6[%c0_135, %c0_136], %310 {strides = array<i32>} : memref<8x128xf32, #tpu.memory_space<vmem>>, vector<8x128xf32>,
    %c0_137 = arith.constant 0 : index
    %c0_138 = arith.constant 0 : index
    %314 = vector.load %arg5[%c0_137, %c0_138] : memref<8x128xf32, #tpu.memory_space<vmem>>, vector<8x128xf32>
    tpu.vector_store %arg5[%c0_137, %c0_138], %312 {strides = array<i32>} : memref<8x128xf32, #tpu.memory_space<vmem>>, vector<8x128xf32>,
    %315 = arith.truncf %312 : vector<8x128xf32> to vector<8x128xbf16>
    %c0_139 = arith.constant 0 : index
    %316 = arith.index_cast %278 : i32 to index
    %c0_140 = arith.constant 0 : index
    %c0_141 = arith.constant 0 : index
    %317 = vector.load %arg4[%c0_139, %316, %c0_140, %c0_141] : memref<1x8x8x128xbf16, #tpu.memory_space<vmem>>, vector<1x1x8x128xbf16>
    %318 = vector.shape_cast %317 : vector<1x1x8x128xbf16> to vector<8x128xbf16>
    %319 = vector.shape_cast %315 : vector<8x128xbf16> to vector<1x1x8x128xbf16>
    tpu.vector_store %arg4[%c0_139, %316, %c0_140, %c0_141], %319 {strides = array<i32>} : memref<1x8x8x128xbf16, #tpu.memory_space<vmem>>, vector<1x1x8x128xbf16>,
    %c7_i32_142 = arith.constant 7 : i32
    %c2_i32_143 = arith.constant 2 : i32
    %320 = arith.muli %c2_i32_143, %c7_i32_142 : i32
    %c7_i32_144 = arith.constant 7 : i32
    %321 = arith.subi %c7_i32_144, %320 : i32
    %322 = arith.muli %arg0, %321 : i32
    %323 = arith.addi %c7_i32_142, %322 : i32
    %c0_145 = arith.constant 0 : index
    %324 = arith.index_cast %323 : i32 to index
    %c0_146 = arith.constant 0 : index
    %c0_147 = arith.constant 0 : index
    %325 = vector.load %arg2[%c0_145, %324, %c0_146, %c0_147] : memref<1x8x8x512xbf16, #tpu.memory_space<vmem>>, vector<1x1x8x512xbf16>
    %326 = vector.shape_cast %325 : vector<1x1x8x512xbf16> to vector<8x512xbf16>
    %327 = arith.extf %326 : vector<8x512xbf16> to vector<8x512xf32>
    %c0_148 = arith.constant 0 : index
    %c0_149 = arith.constant 0 : index
    %328 = vector.load %arg5[%c0_148, %c0_149] : memref<8x128xf32, #tpu.memory_space<vmem>>, vector<8x128xf32>
    %329 = arith.truncf %328 : vector<8x128xf32> to vector<8x128xbf16>
    %cst_150 = arith.constant dense<0.000000e+00> : vector<8x512xf32>
    %330 = tpu.matmul %329, %4, %cst_150 {dimension_numbers = #tpu.dot_dimension_numbers<[1], [0], [0], [1], [0, 0, 1, 1], [], []>} : vector<8x128xbf16>, vector<128x512xbf16>, vector<8x512xf32> -> vector<8x512xf32>
    %331 = arith.addf %327, %330 : vector<8x512xf32>
    %332 = vector.extract_strided_slice %331 {offsets = [0, 0], sizes = [8, 128], strides = [1, 1]} : vector<8x512xf32> to vector<8x128xf32>
    %333 = arith.negf %332 : vector<8x128xf32>
    %334 = math.exp %333 : vector<8x128xf32>
    %cst_151 = arith.constant 1.000000e+00 : f32
    %335 = vector.broadcast %cst_151 : f32 to vector<8x128xf32>
    %336 = arith.addf %335, %334 : vector<8x128xf32>
    %337 = arith.divf %335, %336 : vector<8x128xf32>
    %338 = vector.extract_strided_slice %331 {offsets = [0, 128], sizes = [8, 128], strides = [1, 1]} : vector<8x512xf32> to vector<8x128xf32>
    %339 = arith.negf %338 : vector<8x128xf32>
    %340 = math.exp %339 : vector<8x128xf32>
    %cst_152 = arith.constant 1.000000e+00 : f32
    %341 = vector.broadcast %cst_152 : f32 to vector<8x128xf32>
    %342 = arith.addf %341, %340 : vector<8x128xf32>
    %343 = arith.divf %341, %342 : vector<8x128xf32>
    %344 = vector.extract_strided_slice %331 {offsets = [0, 256], sizes = [8, 128], strides = [1, 1]} : vector<8x512xf32> to vector<8x128xf32>
    %345 = math.tanh %344 : vector<8x128xf32>
    %346 = vector.extract_strided_slice %331 {offsets = [0, 384], sizes = [8, 128], strides = [1, 1]} : vector<8x512xf32> to vector<8x128xf32>
    %347 = arith.negf %346 : vector<8x128xf32>
    %348 = math.exp %347 : vector<8x128xf32>
    %cst_153 = arith.constant 1.000000e+00 : f32
    %349 = vector.broadcast %cst_153 : f32 to vector<8x128xf32>
    %350 = arith.addf %349, %348 : vector<8x128xf32>
    %351 = arith.divf %349, %350 : vector<8x128xf32>
    %c0_154 = arith.constant 0 : index
    %c0_155 = arith.constant 0 : index
    %352 = vector.load %arg6[%c0_154, %c0_155] : memref<8x128xf32, #tpu.memory_space<vmem>>, vector<8x128xf32>
    %353 = arith.mulf %343, %352 : vector<8x128xf32>
    %354 = arith.mulf %337, %345 : vector<8x128xf32>
    %355 = arith.addf %353, %354 : vector<8x128xf32>
    %356 = math.tanh %355 : vector<8x128xf32>
    %357 = arith.mulf %351, %356 : vector<8x128xf32>
    %c0_156 = arith.constant 0 : index
    %c0_157 = arith.constant 0 : index
    %358 = vector.load %arg6[%c0_156, %c0_157] : memref<8x128xf32, #tpu.memory_space<vmem>>, vector<8x128xf32>
    tpu.vector_store %arg6[%c0_156, %c0_157], %355 {strides = array<i32>} : memref<8x128xf32, #tpu.memory_space<vmem>>, vector<8x128xf32>,
    %c0_158 = arith.constant 0 : index
    %c0_159 = arith.constant 0 : index
    %359 = vector.load %arg5[%c0_158, %c0_159] : memref<8x128xf32, #tpu.memory_space<vmem>>, vector<8x128xf32>
    tpu.vector_store %arg5[%c0_158, %c0_159], %357 {strides = array<i32>} : memref<8x128xf32, #tpu.memory_space<vmem>>, vector<8x128xf32>,
    %360 = arith.truncf %357 : vector<8x128xf32> to vector<8x128xbf16>
    %c0_160 = arith.constant 0 : index
    %361 = arith.index_cast %323 : i32 to index
    %c0_161 = arith.constant 0 : index
    %c0_162 = arith.constant 0 : index
    %362 = vector.load %arg4[%c0_160, %361, %c0_161, %c0_162] : memref<1x8x8x128xbf16, #tpu.memory_space<vmem>>, vector<1x1x8x128xbf16>
    %363 = vector.shape_cast %362 : vector<1x1x8x128xbf16> to vector<8x128xbf16>
    %364 = vector.shape_cast %360 : vector<8x128xbf16> to vector<1x1x8x128xbf16>
    tpu.vector_store %arg4[%c0_160, %361, %c0_161, %c0_162], %364 {strides = array<i32>} : memref<1x8x8x128xbf16, #tpu.memory_space<vmem>>, vector<1x1x8x128xbf16>,
    %c8_i32 = arith.constant 8 : i32
    return
  }
  func.func @transform_0(%arg0: i32, %arg1: i32) -> (i32, i32, i32, i32) {
    %c2_i32 = arith.constant 2 : i32
    %0 = arith.muli %c2_i32, %arg1 : i32
    %c0_i32 = arith.constant 0 : i32
    %1 = arith.subi %c0_i32, %0 : i32
    %2 = arith.muli %arg0, %1 : i32
    %3 = arith.addi %arg1, %2 : i32
    %c0_i32_0 = arith.constant 0 : i32
    %c0_i32_1 = arith.constant 0 : i32
    %c0_i32_2 = arith.constant 0 : i32
    return %arg0, %3, %c0_i32_0, %c0_i32_1 : i32, i32, i32, i32
  }
  func.func @transform_1(%arg0: i32, %arg1: i32) -> (i32, i32, i32) {
    %c0_i32 = arith.constant 0 : i32
    %c0_i32_0 = arith.constant 0 : i32
    %c0_i32_1 = arith.constant 0 : i32
    return %arg0, %c0_i32, %c0_i32_0 : i32, i32, i32
  }
  func.func @transform_2(%arg0: i32, %arg1: i32) -> (i32, i32, i32, i32) {
    %c2_i32 = arith.constant 2 : i32
    %0 = arith.muli %c2_i32, %arg1 : i32
    %c0_i32 = arith.constant 0 : i32
    %1 = arith.subi %c0_i32, %0 : i32
    %2 = arith.muli %arg0, %1 : i32
    %3 = arith.addi %arg1, %2 : i32
    %c0_i32_0 = arith.constant 0 : i32
    %c0_i32_1 = arith.constant 0 : i32
    %c0_i32_2 = arith.constant 0 : i32
    return %arg0, %3, %c0_i32_0, %c0_i32_1 : i32, i32, i32, i32
  }
}

module attributes {stable_mosaic.version = 11 : i64} {
  func.func @_recurrent_kernel(%arg0: i32, %arg1: i32, %arg2: memref<1x8x8x512xbf16, #tpu.memory_space<vmem>>, %arg3: memref<1x128x512xbf16, #tpu.memory_space<vmem>>, %arg4: memref<1x8x8x128xbf16, #tpu.memory_space<vmem>>, %arg5: memref<8x128xf32, #tpu.memory_space<vmem>>, %arg6: memref<8x128xf32, #tpu.memory_space<vmem>>) attributes {dimension_semantics = [#tpu.dimension_semantics<parallel>, #tpu.dimension_semantics<arbitrary>], iteration_bounds = array<i64: 2, 1>, scalar_prefetch = 0 : i64, scratch_operands = 2 : i64, tpu.core_type = #tpu.core_type<tc>, window_params = [{transform_indices = @transform_0, window_bounds = array<i64: 1, 8, 8, 512>}, {transform_indices = @transform_1, window_bounds = array<i64: 1, 128, 512>}, {transform_indices = @transform_2, window_bounds = array<i64: 1, 8, 8, 128>}]} {
    %c0_i32 = arith.constant 0 : i32
    %0 = arith.cmpi eq, %arg1, %c0_i32 : i32
    %1 = arith.extui %0 : i1 to i32
    %c0_i32_0 = arith.constant 0 : i32
    %2 = arith.cmpi ne, %1, %c0_i32_0 : i32
    scf.if %2 {
      %cst_163 = arith.constant 0.000000e+00 : f32
      %365 = vector.broadcast %cst_163 : f32 to vector<8x128xf32>
      %c0_164 = arith.constant 0 : index
      %c0_165 = arith.constant 0 : index
      %366 = vector.load %arg5[%c0_164, %c0_165] : memref<8x128xf32, #tpu.memory_space<vmem>>, vector<8x128xf32>
      tpu.vector_store %arg5[%c0_164, %c0_165], %365 {strides = array<i32>} : memref<8x128xf32, #tpu.memory_space<vmem>>, vector<8x128xf32>,
      %cst_166 = arith.constant 0.000000e+00 : f32
      %367 = vector.broadcast %cst_166 : f32 to vector<8x128xf32>
      %c0_167 = arith.constant 0 : index
      %c0_168 = arith.constant 0 : index
      %368 = vector.load %arg6[%c0_167, %c0_168] : memref<8x128xf32, #tpu.memory_space<vmem>>, vector<8x128xf32>
      tpu.vector_store %arg6[%c0_167, %c0_168], %367 {strides = array<i32>} : memref<8x128xf32, #tpu.memory_space<vmem>>, vector<8x128xf32>,
    } else {
    }
    %c0 = arith.constant 0 : index
    %c0_1 = arith.constant 0 : index
    %c0_2 = arith.constant 0 : index
    %3 = vector.load %arg3[%c0, %c0_1, %c0_2] : memref<1x128x512xbf16, #tpu.memory_space<vmem>>, vector<1x128x512xbf16>
    %4 = vector.shape_cast %3 : vector<1x128x512xbf16> to vector<128x512xbf16>
    %c0_i32_3 = arith.constant 0 : i32
    %c2_i32 = arith.constant 2 : i32
    %5 = arith.muli %c2_i32, %c0_i32_3 : i32
    %c7_i32 = arith.constant 7 : i32
    %6 = arith.subi %c7_i32, %5 : i32
    %7 = arith.muli %arg0, %6 : i32
    %8 = arith.addi %c0_i32_3, %7 : i32
    %c0_4 = arith.constant 0 : index
    %9 = arith.index_cast %8 : i32 to index
    %c0_5 = arith.constant 0 : index
    %c0_6 = arith.constant 0 : index
    %10 = vector.load %arg2[%c0_4, %9, %c0_5, %c0_6] : memref<1x8x8x512xbf16, #tpu.memory_space<vmem>>, vector<1x1x8x512xbf16>
    %11 = vector.shape_cast %10 : vector<1x1x8x512xbf16> to vector<8x512xbf16>
    %12 = arith.extf %11 : vector<8x512xbf16> to vector<8x512xf32>
    %c0_7 = arith.constant 0 : index
    %c0_8 = arith.constant 0 : index
    %13 = vector.load %arg5[%c0_7, %c0_8] : memref<8x128xf32, #tpu.memory_space<vmem>>, vector<8x128xf32>
    %14 = arith.truncf %13 : vector<8x128xf32> to vector<8x128xbf16>
    %cst = arith.constant dense<0.000000e+00> : vector<8x512xf32>
    %15 = tpu.matmul %14, %4, %cst {dimension_numbers = #tpu.dot_dimension_numbers<[1], [0], [0], [1], [0, 0, 1, 1], [], []>} : vector<8x128xbf16>, vector<128x512xbf16>, vector<8x512xf32> -> vector<8x512xf32>
    %16 = arith.addf %12, %15 : vector<8x512xf32>
    %17 = vector.extract_strided_slice %16 {offsets = [0, 0], sizes = [8, 128], strides = [1, 1]} : vector<8x512xf32> to vector<8x128xf32>
    %18 = arith.negf %17 : vector<8x128xf32>
    %19 = math.exp %18 : vector<8x128xf32>
    %cst_9 = arith.constant 1.000000e+00 : f32
    %20 = vector.broadcast %cst_9 : f32 to vector<8x128xf32>
    %21 = arith.addf %20, %19 : vector<8x128xf32>
    %22 = arith.divf %20, %21 : vector<8x128xf32>
    %23 = vector.extract_strided_slice %16 {offsets = [0, 128], sizes = [8, 128], strides = [1, 1]} : vector<8x512xf32> to vector<8x128xf32>
    %24 = arith.negf %23 : vector<8x128xf32>
    %25 = math.exp %24 : vector<8x128xf32>
    %cst_10 = arith.constant 1.000000e+00 : f32
    %26 = vector.broadcast %cst_10 : f32 to vector<8x128xf32>
    %27 = arith.addf %26, %25 : vector<8x128xf32>
    %28 = arith.divf %26, %27 : vector<8x128xf32>
    %29 = vector.extract_strided_slice %16 {offsets = [0, 256], sizes = [8, 128], strides = [1, 1]} : vector<8x512xf32> to vector<8x128xf32>
    %30 = math.tanh %29 : vector<8x128xf32>
    %31 = vector.extract_strided_slice %16 {offsets = [0, 384], sizes = [8, 128], strides = [1, 1]} : vector<8x512xf32> to vector<8x128xf32>
    %32 = arith.negf %31 : vector<8x128xf32>
    %33 = math.exp %32 : vector<8x128xf32>
    %cst_11 = arith.constant 1.000000e+00 : f32
    %34 = vector.broadcast %cst_11 : f32 to vector<8x128xf32>
    %35 = arith.addf %34, %33 : vector<8x128xf32>
    %36 = arith.divf %34, %35 : vector<8x128xf32>
    %c0_12 = arith.constant 0 : index
    %c0_13 = arith.constant 0 : index
    %37 = vector.load %arg6[%c0_12, %c0_13] : memref<8x128xf32, #tpu.memory_space<vmem>>, vector<8x128xf32>
    %38 = arith.mulf %28, %37 : vector<8x128xf32>
    %39 = arith.mulf %22, %30 : vector<8x128xf32>
    %40 = arith.addf %38, %39 : vector<8x128xf32>
    %41 = math.tanh %40 : vector<8x128xf32>
    %42 = arith.mulf %36, %41 : vector<8x128xf32>
    %c0_14 = arith.constant 0 : index
    %c0_15 = arith.constant 0 : index
    %43 = vector.load %arg6[%c0_14, %c0_15] : memref<8x128xf32, #tpu.memory_space<vmem>>, vector<8x128xf32>
    tpu.vector_store %arg6[%c0_14, %c0_15], %40 {strides = array<i32>} : memref<8x128xf32, #tpu.memory_space<vmem>>, vector<8x128xf32>,
    %c0_16 = arith.constant 0 : index
    %c0_17 = arith.constant 0 : index
    %44 = vector.load %arg5[%c0_16, %c0_17] : memref<8x128xf32, #tpu.memory_space<vmem>>, vector<8x128xf32>
    tpu.vector_store %arg5[%c0_16, %c0_17], %42 {strides = array<i32>} : memref<8x128xf32, #tpu.memory_space<vmem>>, vector<8x128xf32>,
    %45 = arith.truncf %42 : vector<8x128xf32> to vector<8x128xbf16>
    %c0_18 = arith.constant 0 : index
    %46 = arith.index_cast %8 : i32 to index
    %c0_19 = arith.constant 0 : index
    %c0_20 = arith.constant 0 : index
    %47 = vector.load %arg4[%c0_18, %46, %c0_19, %c0_20] : memref<1x8x8x128xbf16, #tpu.memory_space<vmem>>, vector<1x1x8x128xbf16>
    %48 = vector.shape_cast %47 : vector<1x1x8x128xbf16> to vector<8x128xbf16>
    %49 = vector.shape_cast %45 : vector<8x128xbf16> to vector<1x1x8x128xbf16>
    tpu.vector_store %arg4[%c0_18, %46, %c0_19, %c0_20], %49 {strides = array<i32>} : memref<1x8x8x128xbf16, #tpu.memory_space<vmem>>, vector<1x1x8x128xbf16>,
    %c1_i32 = arith.constant 1 : i32
    %c2_i32_21 = arith.constant 2 : i32
    %50 = arith.muli %c2_i32_21, %c1_i32 : i32
    %c7_i32_22 = arith.constant 7 : i32
    %51 = arith.subi %c7_i32_22, %50 : i32
    %52 = arith.muli %arg0, %51 : i32
    %53 = arith.addi %c1_i32, %52 : i32
    %c0_23 = arith.constant 0 : index
    %54 = arith.index_cast %53 : i32 to index
    %c0_24 = arith.constant 0 : index
    %c0_25 = arith.constant 0 : index
    %55 = vector.load %arg2[%c0_23, %54, %c0_24, %c0_25] : memref<1x8x8x512xbf16, #tpu.memory_space<vmem>>, vector<1x1x8x512xbf16>
    %56 = vector.shape_cast %55 : vector<1x1x8x512xbf16> to vector<8x512xbf16>
    %57 = arith.extf %56 : vector<8x512xbf16> to vector<8x512xf32>
    %c0_26 = arith.constant 0 : index
    %c0_27 = arith.constant 0 : index
    %58 = vector.load %arg5[%c0_26, %c0_27] : memref<8x128xf32, #tpu.memory_space<vmem>>, vector<8x128xf32>
    %59 = arith.truncf %58 : vector<8x128xf32> to vector<8x128xbf16>
    %cst_28 = arith.constant dense<0.000000e+00> : vector<8x512xf32>
    %60 = tpu.matmul %59, %4, %cst_28 {dimension_numbers = #tpu.dot_dimension_numbers<[1], [0], [0], [1], [0, 0, 1, 1], [], []>} : vector<8x128xbf16>, vector<128x512xbf16>, vector<8x512xf32> -> vector<8x512xf32>
    %61 = arith.addf %57, %60 : vector<8x512xf32>
    %62 = vector.extract_strided_slice %61 {offsets = [0, 0], sizes = [8, 128], strides = [1, 1]} : vector<8x512xf32> to vector<8x128xf32>
    %63 = arith.negf %62 : vector<8x128xf32>
    %64 = math.exp %63 : vector<8x128xf32>
    %cst_29 = arith.constant 1.000000e+00 : f32
    %65 = vector.broadcast %cst_29 : f32 to vector<8x128xf32>
    %66 = arith.addf %65, %64 : vector<8x128xf32>
    %67 = arith.divf %65, %66 : vector<8x128xf32>
    %68 = vector.extract_strided_slice %61 {offsets = [0, 128], sizes = [8, 128], strides = [1, 1]} : vector<8x512xf32> to vector<8x128xf32>
    %69 = arith.negf %68 : vector<8x128xf32>
    %70 = math.exp %69 : vector<8x128xf32>
    %cst_30 = arith.constant 1.000000e+00 : f32
    %71 = vector.broadcast %cst_30 : f32 to vector<8x128xf32>
    %72 = arith.addf %71, %70 : vector<8x128xf32>
    %73 = arith.divf %71, %72 : vector<8x128xf32>
    %74 = vector.extract_strided_slice %61 {offsets = [0, 256], sizes = [8, 128], strides = [1, 1]} : vector<8x512xf32> to vector<8x128xf32>
    %75 = math.tanh %74 : vector<8x128xf32>
    %76 = vector.extract_strided_slice %61 {offsets = [0, 384], sizes = [8, 128], strides = [1, 1]} : vector<8x512xf32> to vector<8x128xf32>
    %77 = arith.negf %76 : vector<8x128xf32>
    %78 = math.exp %77 : vector<8x128xf32>
    %cst_31 = arith.constant 1.000000e+00 : f32
    %79 = vector.broadcast %cst_31 : f32 to vector<8x128xf32>
    %80 = arith.addf %79, %78 : vector<8x128xf32>
    %81 = arith.divf %79, %80 : vector<8x128xf32>
    %c0_32 = arith.constant 0 : index
    %c0_33 = arith.constant 0 : index
    %82 = vector.load %arg6[%c0_32, %c0_33] : memref<8x128xf32, #tpu.memory_space<vmem>>, vector<8x128xf32>
    %83 = arith.mulf %73, %82 : vector<8x128xf32>
    %84 = arith.mulf %67, %75 : vector<8x128xf32>
    %85 = arith.addf %83, %84 : vector<8x128xf32>
    %86 = math.tanh %85 : vector<8x128xf32>
    %87 = arith.mulf %81, %86 : vector<8x128xf32>
    %c0_34 = arith.constant 0 : index
    %c0_35 = arith.constant 0 : index
    %88 = vector.load %arg6[%c0_34, %c0_35] : memref<8x128xf32, #tpu.memory_space<vmem>>, vector<8x128xf32>
    tpu.vector_store %arg6[%c0_34, %c0_35], %85 {strides = array<i32>} : memref<8x128xf32, #tpu.memory_space<vmem>>, vector<8x128xf32>,
    %c0_36 = arith.constant 0 : index
    %c0_37 = arith.constant 0 : index
    %89 = vector.load %arg5[%c0_36, %c0_37] : memref<8x128xf32, #tpu.memory_space<vmem>>, vector<8x128xf32>
    tpu.vector_store %arg5[%c0_36, %c0_37], %87 {strides = array<i32>} : memref<8x128xf32, #tpu.memory_space<vmem>>, vector<8x128xf32>,
    %90 = arith.truncf %87 : vector<8x128xf32> to vector<8x128xbf16>
    %c0_38 = arith.constant 0 : index
    %91 = arith.index_cast %53 : i32 to index
    %c0_39 = arith.constant 0 : index
    %c0_40 = arith.constant 0 : index
    %92 = vector.load %arg4[%c0_38, %91, %c0_39, %c0_40] : memref<1x8x8x128xbf16, #tpu.memory_space<vmem>>, vector<1x1x8x128xbf16>
    %93 = vector.shape_cast %92 : vector<1x1x8x128xbf16> to vector<8x128xbf16>
    %94 = vector.shape_cast %90 : vector<8x128xbf16> to vector<1x1x8x128xbf16>
    tpu.vector_store %arg4[%c0_38, %91, %c0_39, %c0_40], %94 {strides = array<i32>} : memref<1x8x8x128xbf16, #tpu.memory_space<vmem>>, vector<1x1x8x128xbf16>,
    %c2_i32_41 = arith.constant 2 : i32
    %c2_i32_42 = arith.constant 2 : i32
    %95 = arith.muli %c2_i32_42, %c2_i32_41 : i32
    %c7_i32_43 = arith.constant 7 : i32
    %96 = arith.subi %c7_i32_43, %95 : i32
    %97 = arith.muli %arg0, %96 : i32
    %98 = arith.addi %c2_i32_41, %97 : i32
    %c0_44 = arith.constant 0 : index
    %99 = arith.index_cast %98 : i32 to index
    %c0_45 = arith.constant 0 : index
    %c0_46 = arith.constant 0 : index
    %100 = vector.load %arg2[%c0_44, %99, %c0_45, %c0_46] : memref<1x8x8x512xbf16, #tpu.memory_space<vmem>>, vector<1x1x8x512xbf16>
    %101 = vector.shape_cast %100 : vector<1x1x8x512xbf16> to vector<8x512xbf16>
    %102 = arith.extf %101 : vector<8x512xbf16> to vector<8x512xf32>
    %c0_47 = arith.constant 0 : index
    %c0_48 = arith.constant 0 : index
    %103 = vector.load %arg5[%c0_47, %c0_48] : memref<8x128xf32, #tpu.memory_space<vmem>>, vector<8x128xf32>
    %104 = arith.truncf %103 : vector<8x128xf32> to vector<8x128xbf16>
    %cst_49 = arith.constant dense<0.000000e+00> : vector<8x512xf32>
    %105 = tpu.matmul %104, %4, %cst_49 {dimension_numbers = #tpu.dot_dimension_numbers<[1], [0], [0], [1], [0, 0, 1, 1], [], []>} : vector<8x128xbf16>, vector<128x512xbf16>, vector<8x512xf32> -> vector<8x512xf32>
    %106 = arith.addf %102, %105 : vector<8x512xf32>
    %107 = vector.extract_strided_slice %106 {offsets = [0, 0], sizes = [8, 128], strides = [1, 1]} : vector<8x512xf32> to vector<8x128xf32>
    %108 = arith.negf %107 : vector<8x128xf32>
    %109 = math.exp %108 : vector<8x128xf32>
    %cst_50 = arith.constant 1.000000e+00 : f32
    %110 = vector.broadcast %cst_50 : f32 to vector<8x128xf32>
    %111 = arith.addf %110, %109 : vector<8x128xf32>
    %112 = arith.divf %110, %111 : vector<8x128xf32>
    %113 = vector.extract_strided_slice %106 {offsets = [0, 128], sizes = [8, 128], strides = [1, 1]} : vector<8x512xf32> to vector<8x128xf32>
    %114 = arith.negf %113 : vector<8x128xf32>
    %115 = math.exp %114 : vector<8x128xf32>
    %cst_51 = arith.constant 1.000000e+00 : f32
    %116 = vector.broadcast %cst_51 : f32 to vector<8x128xf32>
    %117 = arith.addf %116, %115 : vector<8x128xf32>
    %118 = arith.divf %116, %117 : vector<8x128xf32>
    %119 = vector.extract_strided_slice %106 {offsets = [0, 256], sizes = [8, 128], strides = [1, 1]} : vector<8x512xf32> to vector<8x128xf32>
    %120 = math.tanh %119 : vector<8x128xf32>
    %121 = vector.extract_strided_slice %106 {offsets = [0, 384], sizes = [8, 128], strides = [1, 1]} : vector<8x512xf32> to vector<8x128xf32>
    %122 = arith.negf %121 : vector<8x128xf32>
    %123 = math.exp %122 : vector<8x128xf32>
    %cst_52 = arith.constant 1.000000e+00 : f32
    %124 = vector.broadcast %cst_52 : f32 to vector<8x128xf32>
    %125 = arith.addf %124, %123 : vector<8x128xf32>
    %126 = arith.divf %124, %125 : vector<8x128xf32>
    %c0_53 = arith.constant 0 : index
    %c0_54 = arith.constant 0 : index
    %127 = vector.load %arg6[%c0_53, %c0_54] : memref<8x128xf32, #tpu.memory_space<vmem>>, vector<8x128xf32>
    %128 = arith.mulf %118, %127 : vector<8x128xf32>
    %129 = arith.mulf %112, %120 : vector<8x128xf32>
    %130 = arith.addf %128, %129 : vector<8x128xf32>
    %131 = math.tanh %130 : vector<8x128xf32>
    %132 = arith.mulf %126, %131 : vector<8x128xf32>
    %c0_55 = arith.constant 0 : index
    %c0_56 = arith.constant 0 : index
    %133 = vector.load %arg6[%c0_55, %c0_56] : memref<8x128xf32, #tpu.memory_space<vmem>>, vector<8x128xf32>
    tpu.vector_store %arg6[%c0_55, %c0_56], %130 {strides = array<i32>} : memref<8x128xf32, #tpu.memory_space<vmem>>, vector<8x128xf32>,
    %c0_57 = arith.constant 0 : index
    %c0_58 = arith.constant 0 : index
    %134 = vector.load %arg5[%c0_57, %c0_58] : memref<8x128xf32, #tpu.memory_space<vmem>>, vector<8x128xf32>
    tpu.vector_store %arg5[%c0_57, %c0_58], %132 {strides = array<i32>} : memref<8x128xf32, #tpu.memory_space<vmem>>, vector<8x128xf32>,
    %135 = arith.truncf %132 : vector<8x128xf32> to vector<8x128xbf16>
    %c0_59 = arith.constant 0 : index
    %136 = arith.index_cast %98 : i32 to index
    %c0_60 = arith.constant 0 : index
    %c0_61 = arith.constant 0 : index
    %137 = vector.load %arg4[%c0_59, %136, %c0_60, %c0_61] : memref<1x8x8x128xbf16, #tpu.memory_space<vmem>>, vector<1x1x8x128xbf16>
    %138 = vector.shape_cast %137 : vector<1x1x8x128xbf16> to vector<8x128xbf16>
    %139 = vector.shape_cast %135 : vector<8x128xbf16> to vector<1x1x8x128xbf16>
    tpu.vector_store %arg4[%c0_59, %136, %c0_60, %c0_61], %139 {strides = array<i32>} : memref<1x8x8x128xbf16, #tpu.memory_space<vmem>>, vector<1x1x8x128xbf16>,
    %c3_i32 = arith.constant 3 : i32
    %c2_i32_62 = arith.constant 2 : i32
    %140 = arith.muli %c2_i32_62, %c3_i32 : i32
    %c7_i32_63 = arith.constant 7 : i32
    %141 = arith.subi %c7_i32_63, %140 : i32
    %142 = arith.muli %arg0, %141 : i32
    %143 = arith.addi %c3_i32, %142 : i32
    %c0_64 = arith.constant 0 : index
    %144 = arith.index_cast %143 : i32 to index
    %c0_65 = arith.constant 0 : index
    %c0_66 = arith.constant 0 : index
    %145 = vector.load %arg2[%c0_64, %144, %c0_65, %c0_66] : memref<1x8x8x512xbf16, #tpu.memory_space<vmem>>, vector<1x1x8x512xbf16>
    %146 = vector.shape_cast %145 : vector<1x1x8x512xbf16> to vector<8x512xbf16>
    %147 = arith.extf %146 : vector<8x512xbf16> to vector<8x512xf32>
    %c0_67 = arith.constant 0 : index
    %c0_68 = arith.constant 0 : index
    %148 = vector.load %arg5[%c0_67, %c0_68] : memref<8x128xf32, #tpu.memory_space<vmem>>, vector<8x128xf32>
    %149 = arith.truncf %148 : vector<8x128xf32> to vector<8x128xbf16>
    %cst_69 = arith.constant dense<0.000000e+00> : vector<8x512xf32>
    %150 = tpu.matmul %149, %4, %cst_69 {dimension_numbers = #tpu.dot_dimension_numbers<[1], [0], [0], [1], [0, 0, 1, 1], [], []>} : vector<8x128xbf16>, vector<128x512xbf16>, vector<8x512xf32> -> vector<8x512xf32>
    %151 = arith.addf %147, %150 : vector<8x512xf32>
    %152 = vector.extract_strided_slice %151 {offsets = [0, 0], sizes = [8, 128], strides = [1, 1]} : vector<8x512xf32> to vector<8x128xf32>
    %153 = arith.negf %152 : vector<8x128xf32>
    %154 = math.exp %153 : vector<8x128xf32>
    %cst_70 = arith.constant 1.000000e+00 : f32
    %155 = vector.broadcast %cst_70 : f32 to vector<8x128xf32>
    %156 = arith.addf %155, %154 : vector<8x128xf32>
    %157 = arith.divf %155, %156 : vector<8x128xf32>
    %158 = vector.extract_strided_slice %151 {offsets = [0, 128], sizes = [8, 128], strides = [1, 1]} : vector<8x512xf32> to vector<8x128xf32>
    %159 = arith.negf %158 : vector<8x128xf32>
    %160 = math.exp %159 : vector<8x128xf32>
    %cst_71 = arith.constant 1.000000e+00 : f32
    %161 = vector.broadcast %cst_71 : f32 to vector<8x128xf32>
    %162 = arith.addf %161, %160 : vector<8x128xf32>
    %163 = arith.divf %161, %162 : vector<8x128xf32>
    %164 = vector.extract_strided_slice %151 {offsets = [0, 256], sizes = [8, 128], strides = [1, 1]} : vector<8x512xf32> to vector<8x128xf32>
    %165 = math.tanh %164 : vector<8x128xf32>
    %166 = vector.extract_strided_slice %151 {offsets = [0, 384], sizes = [8, 128], strides = [1, 1]} : vector<8x512xf32> to vector<8x128xf32>
    %167 = arith.negf %166 : vector<8x128xf32>
    %168 = math.exp %167 : vector<8x128xf32>
    %cst_72 = arith.constant 1.000000e+00 : f32
    %169 = vector.broadcast %cst_72 : f32 to vector<8x128xf32>
    %170 = arith.addf %169, %168 : vector<8x128xf32>
    %171 = arith.divf %169, %170 : vector<8x128xf32>
    %c0_73 = arith.constant 0 : index
    %c0_74 = arith.constant 0 : index
    %172 = vector.load %arg6[%c0_73, %c0_74] : memref<8x128xf32, #tpu.memory_space<vmem>>, vector<8x128xf32>
    %173 = arith.mulf %163, %172 : vector<8x128xf32>
    %174 = arith.mulf %157, %165 : vector<8x128xf32>
    %175 = arith.addf %173, %174 : vector<8x128xf32>
    %176 = math.tanh %175 : vector<8x128xf32>
    %177 = arith.mulf %171, %176 : vector<8x128xf32>
    %c0_75 = arith.constant 0 : index
    %c0_76 = arith.constant 0 : index
    %178 = vector.load %arg6[%c0_75, %c0_76] : memref<8x128xf32, #tpu.memory_space<vmem>>, vector<8x128xf32>
    tpu.vector_store %arg6[%c0_75, %c0_76], %175 {strides = array<i32>} : memref<8x128xf32, #tpu.memory_space<vmem>>, vector<8x128xf32>,
    %c0_77 = arith.constant 0 : index
    %c0_78 = arith.constant 0 : index
    %179 = vector.load %arg5[%c0_77, %c0_78] : memref<8x128xf32, #tpu.memory_space<vmem>>, vector<8x128xf32>
    tpu.vector_store %arg5[%c0_77, %c0_78], %177 {strides = array<i32>} : memref<8x128xf32, #tpu.memory_space<vmem>>, vector<8x128xf32>,
    %180 = arith.truncf %177 : vector<8x128xf32> to vector<8x128xbf16>
    %c0_79 = arith.constant 0 : index
    %181 = arith.index_cast %143 : i32 to index
    %c0_80 = arith.constant 0 : index
    %c0_81 = arith.constant 0 : index
    %182 = vector.load %arg4[%c0_79, %181, %c0_80, %c0_81] : memref<1x8x8x128xbf16, #tpu.memory_space<vmem>>, vector<1x1x8x128xbf16>
    %183 = vector.shape_cast %182 : vector<1x1x8x128xbf16> to vector<8x128xbf16>
    %184 = vector.shape_cast %180 : vector<8x128xbf16> to vector<1x1x8x128xbf16>
    tpu.vector_store %arg4[%c0_79, %181, %c0_80, %c0_81], %184 {strides = array<i32>} : memref<1x8x8x128xbf16, #tpu.memory_space<vmem>>, vector<1x1x8x128xbf16>,
    %c4_i32 = arith.constant 4 : i32
    %c2_i32_82 = arith.constant 2 : i32
    %185 = arith.muli %c2_i32_82, %c4_i32 : i32
    %c7_i32_83 = arith.constant 7 : i32
    %186 = arith.subi %c7_i32_83, %185 : i32
    %187 = arith.muli %arg0, %186 : i32
    %188 = arith.addi %c4_i32, %187 : i32
    %c0_84 = arith.constant 0 : index
    %189 = arith.index_cast %188 : i32 to index
    %c0_85 = arith.constant 0 : index
    %c0_86 = arith.constant 0 : index
    %190 = vector.load %arg2[%c0_84, %189, %c0_85, %c0_86] : memref<1x8x8x512xbf16, #tpu.memory_space<vmem>>, vector<1x1x8x512xbf16>
    %191 = vector.shape_cast %190 : vector<1x1x8x512xbf16> to vector<8x512xbf16>
    %192 = arith.extf %191 : vector<8x512xbf16> to vector<8x512xf32>
    %c0_87 = arith.constant 0 : index
    %c0_88 = arith.constant 0 : index
    %193 = vector.load %arg5[%c0_87, %c0_88] : memref<8x128xf32, #tpu.memory_space<vmem>>, vector<8x128xf32>
    %194 = arith.truncf %193 : vector<8x128xf32> to vector<8x128xbf16>
    %cst_89 = arith.constant dense<0.000000e+00> : vector<8x512xf32>
    %195 = tpu.matmul %194, %4, %cst_89 {dimension_numbers = #tpu.dot_dimension_numbers<[1], [0], [0], [1], [0, 0, 1, 1], [], []>} : vector<8x128xbf16>, vector<128x512xbf16>, vector<8x512xf32> -> vector<8x512xf32>
    %196 = arith.addf %192, %195 : vector<8x512xf32>
    %197 = vector.extract_strided_slice %196 {offsets = [0, 0], sizes = [8, 128], strides = [1, 1]} : vector<8x512xf32> to vector<8x128xf32>
    %198 = arith.negf %197 : vector<8x128xf32>
    %199 = math.exp %198 : vector<8x128xf32>
    %cst_90 = arith.constant 1.000000e+00 : f32
    %200 = vector.broadcast %cst_90 : f32 to vector<8x128xf32>
    %201 = arith.addf %200, %199 : vector<8x128xf32>
    %202 = arith.divf %200, %201 : vector<8x128xf32>
    %203 = vector.extract_strided_slice %196 {offsets = [0, 128], sizes = [8, 128], strides = [1, 1]} : vector<8x512xf32> to vector<8x128xf32>
    %204 = arith.negf %203 : vector<8x128xf32>
    %205 = math.exp %204 : vector<8x128xf32>
    %cst_91 = arith.constant 1.000000e+00 : f32
    %206 = vector.broadcast %cst_91 : f32 to vector<8x128xf32>
    %207 = arith.addf %206, %205 : vector<8x128xf32>
    %208 = arith.divf %206, %207 : vector<8x128xf32>
    %209 = vector.extract_strided_slice %196 {offsets = [0, 256], sizes = [8, 128], strides = [1, 1]} : vector<8x512xf32> to vector<8x128xf32>
    %210 = math.tanh %209 : vector<8x128xf32>
    %211 = vector.extract_strided_slice %196 {offsets = [0, 384], sizes = [8, 128], strides = [1, 1]} : vector<8x512xf32> to vector<8x128xf32>
    %212 = arith.negf %211 : vector<8x128xf32>
    %213 = math.exp %212 : vector<8x128xf32>
    %cst_92 = arith.constant 1.000000e+00 : f32
    %214 = vector.broadcast %cst_92 : f32 to vector<8x128xf32>
    %215 = arith.addf %214, %213 : vector<8x128xf32>
    %216 = arith.divf %214, %215 : vector<8x128xf32>
    %c0_93 = arith.constant 0 : index
    %c0_94 = arith.constant 0 : index
    %217 = vector.load %arg6[%c0_93, %c0_94] : memref<8x128xf32, #tpu.memory_space<vmem>>, vector<8x128xf32>
    %218 = arith.mulf %208, %217 : vector<8x128xf32>
    %219 = arith.mulf %202, %210 : vector<8x128xf32>
    %220 = arith.addf %218, %219 : vector<8x128xf32>
    %221 = math.tanh %220 : vector<8x128xf32>
    %222 = arith.mulf %216, %221 : vector<8x128xf32>
    %c0_95 = arith.constant 0 : index
    %c0_96 = arith.constant 0 : index
    %223 = vector.load %arg6[%c0_95, %c0_96] : memref<8x128xf32, #tpu.memory_space<vmem>>, vector<8x128xf32>
    tpu.vector_store %arg6[%c0_95, %c0_96], %220 {strides = array<i32>} : memref<8x128xf32, #tpu.memory_space<vmem>>, vector<8x128xf32>,
    %c0_97 = arith.constant 0 : index
    %c0_98 = arith.constant 0 : index
    %224 = vector.load %arg5[%c0_97, %c0_98] : memref<8x128xf32, #tpu.memory_space<vmem>>, vector<8x128xf32>
    tpu.vector_store %arg5[%c0_97, %c0_98], %222 {strides = array<i32>} : memref<8x128xf32, #tpu.memory_space<vmem>>, vector<8x128xf32>,
    %225 = arith.truncf %222 : vector<8x128xf32> to vector<8x128xbf16>
    %c0_99 = arith.constant 0 : index
    %226 = arith.index_cast %188 : i32 to index
    %c0_100 = arith.constant 0 : index
    %c0_101 = arith.constant 0 : index
    %227 = vector.load %arg4[%c0_99, %226, %c0_100, %c0_101] : memref<1x8x8x128xbf16, #tpu.memory_space<vmem>>, vector<1x1x8x128xbf16>
    %228 = vector.shape_cast %227 : vector<1x1x8x128xbf16> to vector<8x128xbf16>
    %229 = vector.shape_cast %225 : vector<8x128xbf16> to vector<1x1x8x128xbf16>
    tpu.vector_store %arg4[%c0_99, %226, %c0_100, %c0_101], %229 {strides = array<i32>} : memref<1x8x8x128xbf16, #tpu.memory_space<vmem>>, vector<1x1x8x128xbf16>,
    %c5_i32 = arith.constant 5 : i32
    %c2_i32_102 = arith.constant 2 : i32
    %230 = arith.muli %c2_i32_102, %c5_i32 : i32
    %c7_i32_103 = arith.constant 7 : i32
    %231 = arith.subi %c7_i32_103, %230 : i32
    %232 = arith.muli %arg0, %231 : i32
    %233 = arith.addi %c5_i32, %232 : i32
    %c0_104 = arith.constant 0 : index
    %234 = arith.index_cast %233 : i32 to index
    %c0_105 = arith.constant 0 : index
    %c0_106 = arith.constant 0 : index
    %235 = vector.load %arg2[%c0_104, %234, %c0_105, %c0_106] : memref<1x8x8x512xbf16, #tpu.memory_space<vmem>>, vector<1x1x8x512xbf16>
    %236 = vector.shape_cast %235 : vector<1x1x8x512xbf16> to vector<8x512xbf16>
    %237 = arith.extf %236 : vector<8x512xbf16> to vector<8x512xf32>
    %c0_107 = arith.constant 0 : index
    %c0_108 = arith.constant 0 : index
    %238 = vector.load %arg5[%c0_107, %c0_108] : memref<8x128xf32, #tpu.memory_space<vmem>>, vector<8x128xf32>
    %239 = arith.truncf %238 : vector<8x128xf32> to vector<8x128xbf16>
    %cst_109 = arith.constant dense<0.000000e+00> : vector<8x512xf32>
    %240 = tpu.matmul %239, %4, %cst_109 {dimension_numbers = #tpu.dot_dimension_numbers<[1], [0], [0], [1], [0, 0, 1, 1], [], []>} : vector<8x128xbf16>, vector<128x512xbf16>, vector<8x512xf32> -> vector<8x512xf32>
    %241 = arith.addf %237, %240 : vector<8x512xf32>
    %242 = vector.extract_strided_slice %241 {offsets = [0, 0], sizes = [8, 128], strides = [1, 1]} : vector<8x512xf32> to vector<8x128xf32>
    %243 = arith.negf %242 : vector<8x128xf32>
    %244 = math.exp %243 : vector<8x128xf32>
    %cst_110 = arith.constant 1.000000e+00 : f32
    %245 = vector.broadcast %cst_110 : f32 to vector<8x128xf32>
    %246 = arith.addf %245, %244 : vector<8x128xf32>
    %247 = arith.divf %245, %246 : vector<8x128xf32>
    %248 = vector.extract_strided_slice %241 {offsets = [0, 128], sizes = [8, 128], strides = [1, 1]} : vector<8x512xf32> to vector<8x128xf32>
    %249 = arith.negf %248 : vector<8x128xf32>
    %250 = math.exp %249 : vector<8x128xf32>
    %cst_111 = arith.constant 1.000000e+00 : f32
    %251 = vector.broadcast %cst_111 : f32 to vector<8x128xf32>
    %252 = arith.addf %251, %250 : vector<8x128xf32>
    %253 = arith.divf %251, %252 : vector<8x128xf32>
    %254 = vector.extract_strided_slice %241 {offsets = [0, 256], sizes = [8, 128], strides = [1, 1]} : vector<8x512xf32> to vector<8x128xf32>
    %255 = math.tanh %254 : vector<8x128xf32>
    %256 = vector.extract_strided_slice %241 {offsets = [0, 384], sizes = [8, 128], strides = [1, 1]} : vector<8x512xf32> to vector<8x128xf32>
    %257 = arith.negf %256 : vector<8x128xf32>
    %258 = math.exp %257 : vector<8x128xf32>
    %cst_112 = arith.constant 1.000000e+00 : f32
    %259 = vector.broadcast %cst_112 : f32 to vector<8x128xf32>
    %260 = arith.addf %259, %258 : vector<8x128xf32>
    %261 = arith.divf %259, %260 : vector<8x128xf32>
    %c0_113 = arith.constant 0 : index
    %c0_114 = arith.constant 0 : index
    %262 = vector.load %arg6[%c0_113, %c0_114] : memref<8x128xf32, #tpu.memory_space<vmem>>, vector<8x128xf32>
    %263 = arith.mulf %253, %262 : vector<8x128xf32>
    %264 = arith.mulf %247, %255 : vector<8x128xf32>
    %265 = arith.addf %263, %264 : vector<8x128xf32>
    %266 = math.tanh %265 : vector<8x128xf32>
    %267 = arith.mulf %261, %266 : vector<8x128xf32>
    %c0_115 = arith.constant 0 : index
    %c0_116 = arith.constant 0 : index
    %268 = vector.load %arg6[%c0_115, %c0_116] : memref<8x128xf32, #tpu.memory_space<vmem>>, vector<8x128xf32>
    tpu.vector_store %arg6[%c0_115, %c0_116], %265 {strides = array<i32>} : memref<8x128xf32, #tpu.memory_space<vmem>>, vector<8x128xf32>,
    %c0_117 = arith.constant 0 : index
    %c0_118 = arith.constant 0 : index
    %269 = vector.load %arg5[%c0_117, %c0_118] : memref<8x128xf32, #tpu.memory_space<vmem>>, vector<8x128xf32>
    tpu.vector_store %arg5[%c0_117, %c0_118], %267 {strides = array<i32>} : memref<8x128xf32, #tpu.memory_space<vmem>>, vector<8x128xf32>,
    %270 = arith.truncf %267 : vector<8x128xf32> to vector<8x128xbf16>
    %c0_119 = arith.constant 0 : index
    %271 = arith.index_cast %233 : i32 to index
    %c0_120 = arith.constant 0 : index
    %c0_121 = arith.constant 0 : index
    %272 = vector.load %arg4[%c0_119, %271, %c0_120, %c0_121] : memref<1x8x8x128xbf16, #tpu.memory_space<vmem>>, vector<1x1x8x128xbf16>
    %273 = vector.shape_cast %272 : vector<1x1x8x128xbf16> to vector<8x128xbf16>
    %274 = vector.shape_cast %270 : vector<8x128xbf16> to vector<1x1x8x128xbf16>
    tpu.vector_store %arg4[%c0_119, %271, %c0_120, %c0_121], %274 {strides = array<i32>} : memref<1x8x8x128xbf16, #tpu.memory_space<vmem>>, vector<1x1x8x128xbf16>,
    %c6_i32 = arith.constant 6 : i32
    %c2_i32_122 = arith.constant 2 : i32
    %275 = arith.muli %c2_i32_122, %c6_i32 : i32
    %c7_i32_123 = arith.constant 7 : i32
    %276 = arith.subi %c7_i32_123, %275 : i32
    %277 = arith.muli %arg0, %276 : i32
    %278 = arith.addi %c6_i32, %277 : i32
    %c0_124 = arith.constant 0 : index
    %279 = arith.index_cast %278 : i32 to index
    %c0_125 = arith.constant 0 : index
    %c0_126 = arith.constant 0 : index
    %280 = vector.load %arg2[%c0_124, %279, %c0_125, %c0_126] : memref<1x8x8x512xbf16, #tpu.memory_space<vmem>>, vector<1x1x8x512xbf16>
    %281 = vector.shape_cast %280 : vector<1x1x8x512xbf16> to vector<8x512xbf16>
    %282 = arith.extf %281 : vector<8x512xbf16> to vector<8x512xf32>
    %c0_127 = arith.constant 0 : index
    %c0_128 = arith.constant 0 : index
    %283 = vector.load %arg5[%c0_127, %c0_128] : memref<8x128xf32, #tpu.memory_space<vmem>>, vector<8x128xf32>
    %284 = arith.truncf %283 : vector<8x128xf32> to vector<8x128xbf16>
    %cst_129 = arith.constant dense<0.000000e+00> : vector<8x512xf32>
    %285 = tpu.matmul %284, %4, %cst_129 {dimension_numbers = #tpu.dot_dimension_numbers<[1], [0], [0], [1], [0, 0, 1, 1], [], []>} : vector<8x128xbf16>, vector<128x512xbf16>, vector<8x512xf32> -> vector<8x512xf32>
    %286 = arith.addf %282, %285 : vector<8x512xf32>
    %287 = vector.extract_strided_slice %286 {offsets = [0, 0], sizes = [8, 128], strides = [1, 1]} : vector<8x512xf32> to vector<8x128xf32>
    %288 = arith.negf %287 : vector<8x128xf32>
    %289 = math.exp %288 : vector<8x128xf32>
    %cst_130 = arith.constant 1.000000e+00 : f32
    %290 = vector.broadcast %cst_130 : f32 to vector<8x128xf32>
    %291 = arith.addf %290, %289 : vector<8x128xf32>
    %292 = arith.divf %290, %291 : vector<8x128xf32>
    %293 = vector.extract_strided_slice %286 {offsets = [0, 128], sizes = [8, 128], strides = [1, 1]} : vector<8x512xf32> to vector<8x128xf32>
    %294 = arith.negf %293 : vector<8x128xf32>
    %295 = math.exp %294 : vector<8x128xf32>
    %cst_131 = arith.constant 1.000000e+00 : f32
    %296 = vector.broadcast %cst_131 : f32 to vector<8x128xf32>
    %297 = arith.addf %296, %295 : vector<8x128xf32>
    %298 = arith.divf %296, %297 : vector<8x128xf32>
    %299 = vector.extract_strided_slice %286 {offsets = [0, 256], sizes = [8, 128], strides = [1, 1]} : vector<8x512xf32> to vector<8x128xf32>
    %300 = math.tanh %299 : vector<8x128xf32>
    %301 = vector.extract_strided_slice %286 {offsets = [0, 384], sizes = [8, 128], strides = [1, 1]} : vector<8x512xf32> to vector<8x128xf32>
    %302 = arith.negf %301 : vector<8x128xf32>
    %303 = math.exp %302 : vector<8x128xf32>
    %cst_132 = arith.constant 1.000000e+00 : f32
    %304 = vector.broadcast %cst_132 : f32 to vector<8x128xf32>
    %305 = arith.addf %304, %303 : vector<8x128xf32>
    %306 = arith.divf %304, %305 : vector<8x128xf32>
    %c0_133 = arith.constant 0 : index
    %c0_134 = arith.constant 0 : index
    %307 = vector.load %arg6[%c0_133, %c0_134] : memref<8x128xf32, #tpu.memory_space<vmem>>, vector<8x128xf32>
    %308 = arith.mulf %298, %307 : vector<8x128xf32>
    %309 = arith.mulf %292, %300 : vector<8x128xf32>
    %310 = arith.addf %308, %309 : vector<8x128xf32>
    %311 = math.tanh %310 : vector<8x128xf32>
    %312 = arith.mulf %306, %311 : vector<8x128xf32>
    %c0_135 = arith.constant 0 : index
    %c0_136 = arith.constant 0 : index
    %313 = vector.load %arg6[%c0_135, %c0_136] : memref<8x128xf32, #tpu.memory_space<vmem>>, vector<8x128xf32>
    tpu.vector_store %arg6[%c0_135, %c0_136], %310 {strides = array<i32>} : memref<8x128xf32, #tpu.memory_space<vmem>>, vector<8x128xf32>,
    %c0_137 = arith.constant 0 : index
    %c0_138 = arith.constant 0 : index
    %314 = vector.load %arg5[%c0_137, %c0_138] : memref<8x128xf32, #tpu.memory_space<vmem>>, vector<8x128xf32>
    tpu.vector_store %arg5[%c0_137, %c0_138], %312 {strides = array<i32>} : memref<8x128xf32, #tpu.memory_space<vmem>>, vector<8x128xf32>,
    %315 = arith.truncf %312 : vector<8x128xf32> to vector<8x128xbf16>
    %c0_139 = arith.constant 0 : index
    %316 = arith.index_cast %278 : i32 to index
    %c0_140 = arith.constant 0 : index
    %c0_141 = arith.constant 0 : index
    %317 = vector.load %arg4[%c0_139, %316, %c0_140, %c0_141] : memref<1x8x8x128xbf16, #tpu.memory_space<vmem>>, vector<1x1x8x128xbf16>
    %318 = vector.shape_cast %317 : vector<1x1x8x128xbf16> to vector<8x128xbf16>
    %319 = vector.shape_cast %315 : vector<8x128xbf16> to vector<1x1x8x128xbf16>
    tpu.vector_store %arg4[%c0_139, %316, %c0_140, %c0_141], %319 {strides = array<i32>} : memref<1x8x8x128xbf16, #tpu.memory_space<vmem>>, vector<1x1x8x128xbf16>,
    %c7_i32_142 = arith.constant 7 : i32
    %c2_i32_143 = arith.constant 2 : i32
    %320 = arith.muli %c2_i32_143, %c7_i32_142 : i32
    %c7_i32_144 = arith.constant 7 : i32
    %321 = arith.subi %c7_i32_144, %320 : i32
    %322 = arith.muli %arg0, %321 : i32
    %323 = arith.addi %c7_i32_142, %322 : i32
    %c0_145 = arith.constant 0 : index
    %324 = arith.index_cast %323 : i32 to index
    %c0_146 = arith.constant 0 : index
    %c0_147 = arith.constant 0 : index
    %325 = vector.load %arg2[%c0_145, %324, %c0_146, %c0_147] : memref<1x8x8x512xbf16, #tpu.memory_space<vmem>>, vector<1x1x8x512xbf16>
    %326 = vector.shape_cast %325 : vector<1x1x8x512xbf16> to vector<8x512xbf16>
    %327 = arith.extf %326 : vector<8x512xbf16> to vector<8x512xf32>
    %c0_148 = arith.constant 0 : index
    %c0_149 = arith.constant 0 : index
    %328 = vector.load %arg5[%c0_148, %c0_149] : memref<8x128xf32, #tpu.memory_space<vmem>>, vector<8x128xf32>
    %329 = arith.truncf %328 : vector<8x128xf32> to vector<8x128xbf16>
    %cst_150 = arith.constant dense<0.000000e+00> : vector<8x512xf32>
    %330 = tpu.matmul %329, %4, %cst_150 {dimension_numbers = #tpu.dot_dimension_numbers<[1], [0], [0], [1], [0, 0, 1, 1], [], []>} : vector<8x128xbf16>, vector<128x512xbf16>, vector<8x512xf32> -> vector<8x512xf32>
    %331 = arith.addf %327, %330 : vector<8x512xf32>
    %332 = vector.extract_strided_slice %331 {offsets = [0, 0], sizes = [8, 128], strides = [1, 1]} : vector<8x512xf32> to vector<8x128xf32>
    %333 = arith.negf %332 : vector<8x128xf32>
    %334 = math.exp %333 : vector<8x128xf32>
    %cst_151 = arith.constant 1.000000e+00 : f32
    %335 = vector.broadcast %cst_151 : f32 to vector<8x128xf32>
    %336 = arith.addf %335, %334 : vector<8x128xf32>
    %337 = arith.divf %335, %336 : vector<8x128xf32>
    %338 = vector.extract_strided_slice %331 {offsets = [0, 128], sizes = [8, 128], strides = [1, 1]} : vector<8x512xf32> to vector<8x128xf32>
    %339 = arith.negf %338 : vector<8x128xf32>
    %340 = math.exp %339 : vector<8x128xf32>
    %cst_152 = arith.constant 1.000000e+00 : f32
    %341 = vector.broadcast %cst_152 : f32 to vector<8x128xf32>
    %342 = arith.addf %341, %340 : vector<8x128xf32>
    %343 = arith.divf %341, %342 : vector<8x128xf32>
    %344 = vector.extract_strided_slice %331 {offsets = [0, 256], sizes = [8, 128], strides = [1, 1]} : vector<8x512xf32> to vector<8x128xf32>
    %345 = math.tanh %344 : vector<8x128xf32>
    %346 = vector.extract_strided_slice %331 {offsets = [0, 384], sizes = [8, 128], strides = [1, 1]} : vector<8x512xf32> to vector<8x128xf32>
    %347 = arith.negf %346 : vector<8x128xf32>
    %348 = math.exp %347 : vector<8x128xf32>
    %cst_153 = arith.constant 1.000000e+00 : f32
    %349 = vector.broadcast %cst_153 : f32 to vector<8x128xf32>
    %350 = arith.addf %349, %348 : vector<8x128xf32>
    %351 = arith.divf %349, %350 : vector<8x128xf32>
    %c0_154 = arith.constant 0 : index
    %c0_155 = arith.constant 0 : index
    %352 = vector.load %arg6[%c0_154, %c0_155] : memref<8x128xf32, #tpu.memory_space<vmem>>, vector<8x128xf32>
    %353 = arith.mulf %343, %352 : vector<8x128xf32>
    %354 = arith.mulf %337, %345 : vector<8x128xf32>
    %355 = arith.addf %353, %354 : vector<8x128xf32>
    %356 = math.tanh %355 : vector<8x128xf32>
    %357 = arith.mulf %351, %356 : vector<8x128xf32>
    %c0_156 = arith.constant 0 : index
    %c0_157 = arith.constant 0 : index
    %358 = vector.load %arg6[%c0_156, %c0_157] : memref<8x128xf32, #tpu.memory_space<vmem>>, vector<8x128xf32>
    tpu.vector_store %arg6[%c0_156, %c0_157], %355 {strides = array<i32>} : memref<8x128xf32, #tpu.memory_space<vmem>>, vector<8x128xf32>,
    %c0_158 = arith.constant 0 : index
    %c0_159 = arith.constant 0 : index
    %359 = vector.load %arg5[%c0_158, %c0_159] : memref<8x128xf32, #tpu.memory_space<vmem>>, vector<8x128xf32>
    tpu.vector_store %arg5[%c0_158, %c0_159], %357 {strides = array<i32>} : memref<8x128xf32, #tpu.memory_space<vmem>>, vector<8x128xf32>,
    %360 = arith.truncf %357 : vector<8x128xf32> to vector<8x128xbf16>
    %c0_160 = arith.constant 0 : index
    %361 = arith.index_cast %323 : i32 to index
    %c0_161 = arith.constant 0 : index
    %c0_162 = arith.constant 0 : index
    %362 = vector.load %arg4[%c0_160, %361, %c0_161, %c0_162] : memref<1x8x8x128xbf16, #tpu.memory_space<vmem>>, vector<1x1x8x128xbf16>
    %363 = vector.shape_cast %362 : vector<1x1x8x128xbf16> to vector<8x128xbf16>
    %364 = vector.shape_cast %360 : vector<8x128xbf16> to vector<1x1x8x128xbf16>
    tpu.vector_store %arg4[%c0_160, %361, %c0_161, %c0_162], %364 {strides = array<i32>} : memref<1x8x8x128xbf16, #tpu.memory_space<vmem>>, vector<1x1x8x128xbf16>,
    %c8_i32 = arith.constant 8 : i32
    return
  }
  func.func @transform_0(%arg0: i32, %arg1: i32) -> (i32, i32, i32, i32) {
    %c2_i32 = arith.constant 2 : i32
    %0 = arith.muli %c2_i32, %arg1 : i32
    %c0_i32 = arith.constant 0 : i32
    %1 = arith.subi %c0_i32, %0 : i32
    %2 = arith.muli %arg0, %1 : i32
    %3 = arith.addi %arg1, %2 : i32
    %c0_i32_0 = arith.constant 0 : i32
    %c0_i32_1 = arith.constant 0 : i32
    %c0_i32_2 = arith.constant 0 : i32
    return %arg0, %3, %c0_i32_0, %c0_i32_1 : i32, i32, i32, i32
  }
  func.func @transform_1(%arg0: i32, %arg1: i32) -> (i32, i32, i32) {
    %c0_i32 = arith.constant 0 : i32
    %c0_i32_0 = arith.constant 0 : i32
    %c0_i32_1 = arith.constant 0 : i32
    return %arg0, %c0_i32, %c0_i32_0 : i32, i32, i32
  }
  func.func @transform_2(%arg0: i32, %arg1: i32) -> (i32, i32, i32, i32) {
    %c2_i32 = arith.constant 2 : i32
    %0 = arith.muli %c2_i32, %arg1 : i32
    %c0_i32 = arith.constant 0 : i32
    %1 = arith.subi %c0_i32, %0 : i32
    %2 = arith.muli %arg0, %1 : i32
    %3 = arith.addi %arg1, %2 : i32
    %c0_i32_0 = arith.constant 0 : i32
    %c0_i32_1 = arith.constant 0 : i32
    %c0_i32_2 = arith.constant 0 : i32
    return %arg0, %3, %c0_i32_0, %c0_i32_1 : i32, i32, i32, i32
  }
}

</mosaic_0001>

<bundles_post_ra>
// kernel: bilstm_forward.2
= control target key start
LH: loop header
LB: loop body
LE: loop exit
PB: predicated region body
PF: predicated region fallthrough
CT: control target
= control target key end

     0   :  { %7 = vsyncpa [#allocation5], 0  ;;  %s2765_s0 = inlined_call_operand.vmem [shape: bf16[2,8,8,512], index: 0, kind: input, shape index: {}]   ;;  %s2766_s1 = inlined_call_operand.hbm [shape: bf16[2,128,512], index: 1, kind: input, shape index: {}]   ;;  %s2767_s2 = inlined_call_operand.vmem [shape: bf16[2,8,8,128], index: 2, kind: output, shape index: {}]  }
   0x1   :  { %9 = vsyncpa [#allocation5 + $0x1], 0  ;;  %s2171_s9 = smov 0   ;;  %s2173_s10 = smov 0  }
   0x2   :  { %s2175_s11 = smov 0   ;;  %s2177_s12 = smov 0  }
   0x3   :  { %s2179_s13 = smov 0   ;;  %s2181_s14 = smov 0  }
   0x4 LB: > { %s1689_s15 = sadd.s32 4294967295, %s2149_s14   ;;  %s27_s16 = sadd.s32 1, %s2145_s13  ;;  %s2149_s14 = sphi %s2181_s14, %s15_s14   ;;  %s2145_s13 = sphi %s2179_s13, %s2775_s13   ;;  %s2141_s12 = sphi %s2177_s12, %s2774_s12   ;;  %s2137_s11 = sphi %s2175_s11, %s2773_s11   ;;  %s2133_s10 = sphi %s2173_s10, %s2772_s10   ;;  %s2129_s9 = sphi %s2171_s9, %s2771_s9  }
   0x5   : > { %p29_p0 = scmp.ge.s32.totalorder %s27_s16, 2  ;;  %s70_s17 = sadd.s32 1, %s2137_s11 }
   0x6   : > { %p77_p1 = scmp.ne.s32.totalorder %s2137_s11, %s2133_s10  ;;  %p78_p2 = scmp.eq.s32.totalorder %s2149_s14, 0 }
   0x7   : > { %s2777_s16 = smov (%p29_p0, %s27_s16), 0  ;;  %p83_p4 = scmp.ne.s32.totalorder %s2133_s10, %s2129_s9 }
   0x8   : > { %p2207_p3 = por %p78_p2, %p77_p1  ;;  %s67_s19 = ssub.s32 %s2145_s13, %s2777_s16 }
   0x9   : > { %p84_p5 = scmp.eq.s32.totalorder %s1689_s15, 0  ;;  %p68_p6 = scmp.eq.s32.totalorder %s67_s19, 0 }
   0xa   : > { %p1808_p8 = scmp.lt.s32.totalorder %s2149_s14, 2  ;;  %s165_s22 = sand.u32 1, %s2137_s11  }
   0xb   : > { %p2214_p7 = por %p84_p5, %p83_p4  ;;  %s1796_s23 = sshll.u32 %s2145_s13, 12 }
   0xc   : > { %s2220_s21 = scalar_select %p68_p6, %s2137_s11, %s70_s17  }
   0xd   : > { %s1693_s24 = sshll.u32 %s165_s22, 8  ;;  %s2227_s27 = scalar_lea.hbm %s2766_s1, %s1796_s23 }
   0xe   : > { %s169_s28 = scalar_lea.vmem [#allocation4], %s1693_s24  ;;  %p2231_p9 = pnand %p1808_p8, %p2207_p3 }
   0xf   : > { %s176_s29 = sshll.u32 %s169_s28, 4  ;;  %s2237_s3 = scalar_lea.sflag [#allocation5], %s165_s22  ;;  %s2235_s29 = int_to_ptr.vmem [resolvable:$true] %s176_s29 }
  0x10   : > { %s2069_s4 = scalar_lea.hbm %s2227_s27, 4096  ;;  %p2071_p11 = pneg %p2231_p9 }
  0x11   : > { %p2070_p10 = scmp.ne.s32.totalorder %s2227_s27, %s2069_s4  ;;  %s2074_s7 = scalar_lea.hbm %s2766_s1, 8192 }
  0x12   : > { %p2075_p0 = scmp.lt.u32.totalorder %s2227_s27, %s2766_s1  ;;  %p2076_p1 = scmp.lt.u32.totalorder %s2074_s7, %s2069_s4 }
  0x13   : > { %p2072_p12 = pnand %p2071_p11, %p2070_p10  ;;  %p2078_p3 = scmp.lt.u32.totalorder %s2069_s4, %s2227_s27 }
  0x14   : > { %p2077_p2 = por %p2076_p1, %p2075_p0 }
  0x15   : > { %p2073_p13 = pneg %p2072_p12 }
  0x16   : > { %p2079_p4 = por %p2078_p3, %p2077_p2 }
  0x18   : > { %p2080_p5 = pnand %p2079_p4, %p2073_p13 }
  0x1a   : > { %2083 = shalt.err (!%p2080_p5)
}
  0x1b   : > { %s2084_s15 = scalar_lea.vmem %s2235_s29, 4096  ;;  %s2151_s17 = smov [#allocation4]  }
  0x1c   : > { %p2085_p6 = scmp.ne.s32.totalorder %s2235_s29, %s2084_s15  ;;  %s2089_s18 = sshll.u32 %s2151_s17, 4  ;;  %s2090_s18 = int_to_ptr.vmem [resolvable:$false] %s2089_s18 }
  0x1d   : > { %s2091_s19 = scalar_lea.vmem %s2090_s18, 8192  ;;  %p2092_p12 = scmp.lt.s32.totalorder %s2235_s29, %s2090_s18 }
  0x1e   : > { %p2087_p8 = pnand %p2085_p6, %p2071_p11  ;;  %p2093_p0 = scmp.lt.s32.totalorder %s2091_s19, %s2084_s15 }
  0x20   : > { %p2088_p10 = pneg %p2087_p8  ;;  %p2094_p1 = por %p2093_p0, %p2092_p12 }
  0x22   : > { %p2095_p2 = pnand %p2094_p1, %p2088_p10 }
  0x24   : > { %2098 = shalt.err (!%p2095_p2)
}
  0x25   : > { %s2152_s22 = smov 256   ;;  %s2153_s23 = smov 16  }
  0x26   : > { %1807 = dma.hbm_to_vmem [thread:$0]  (!%p2231_p9), %s2227_s27, 4096, %s2235_s29, %s2237_s3, %s2152_s22, %s2152_s22, %s2153_s23  }
  0x27   : > { %p1696_p11 = scmp.ge.s32.totalorder %s2149_s14, 1  ;;  %p184_p13 = scmp.lt.s32.totalorder %s2149_s14, 3 }
  0x29   : > { %p185_p3 = pnand %p1696_p11, %p184_p13 }
  0x2a   : > { %s190_s24 = sand.u32 (!%p185_p3), 1, %s2133_s10  }
  0x2b   : > { %188 = sbr.rel (%p185_p3) target bundleno = 2166 (0x876), region = 28  ;;  %s1697_s25 = sshll.u32 (!%p185_p3), %s190_s24, 8 }
  0x2c   : > { %s191_s26 = scalar_lea.sflag (!%p185_p3), [#allocation5], %s190_s24  ;;  %s2268_s28 = scalar_lea.vmem (!%p185_p3), [#allocation4], %s1697_s25 }
  0x32   : > { %2124 = dma.done.wait (%p2214_p7), %s191_s26, 4096  }
  0x33   : > { %2126 = vsyncadd (%p2214_p7), %s191_s26, 4294963200  ;;  %v2154_v0 = vmov 0   ;;  %v2277_v1 = vld [vmem:[%s2268_s28 + $0x4] ss:$16 sps:$4 sm:$0xff]   ;;  %v2280_v2 = vld [vmem:[%s2268_s28] ss:$16 sps:$4 sm:$0xff]  }
  0x34   : > { %517 = vmatprep.mubr.bf16.mxu0 %v2154_v0  ;;  %558 = vmatprep.mubr.bf16.mxu1 %v2154_v0  ;;  %v2284_v3 = vld [vmem:[%s2268_s28 + $0x24] ss:$16 sps:$4 sm:$0xff]   ;;  %v2288_v4 = vld [vmem:[%s2268_s28 + $0x20] ss:$16 sps:$4 sm:$0xff]   ;;  %v2295_v6 = vld [vmem:[%s2268_s28 + $0xc] ss:$16 sps:$4 sm:$0xff]  }
  0x35   : > { %485 = vmatprep.subr.bf16.mxu0 %v2277_v1  ;;  %v2292_v5 = vld [vmem:[%s2268_s28 + $0x44] ss:$16 sps:$4 sm:$0xff]   ;;  %v2298_v7 = vld [vmem:[%s2268_s28 + $0x8] ss:$16 sps:$4 sm:$0xff]   ;;  %v2302_v8 = vld [vmem:[%s2268_s28 + $0x40] ss:$16 sps:$4 sm:$0xff]   ;;  %526 = vmatprep.subr.bf16.mxu1 %v2295_v6 }
  0x36   : > { %486 = vmatpush1.bf16.msra.mxu0 %v2280_v2  ;;  %v2307_v9 = vld [vmem:[%s2268_s28 + $0x64] ss:$16 sps:$4 sm:$0xff]   ;;  %527 = vmatpush1.bf16.msra.mxu1 %v2298_v7  ;;  %v2311_v10 = vld [vmem:[%s2268_s28 + $0x2c] ss:$16 sps:$4 sm:$0xff]   ;;  %v2314_v11 = vld [vmem:[%s2268_s28 + $0x28] ss:$16 sps:$4 sm:$0xff]  }
  0x37   : > { %487 = vmatprep.subr.bf16.mxu0 %v2284_v3  ;;  %528 = vmatprep.subr.bf16.mxu1 %v2311_v10  ;;  %v2319_v12 = vld [vmem:[%s2268_s28 + $0x60] ss:$16 sps:$4 sm:$0xff]   ;;  %v2322_v13 = vld [vmem:[%s2268_s28 + $0x84] ss:$16 sps:$4 sm:$0xff]   ;;  %v2325_v14 = vld [vmem:[%s2268_s28 + $0x4c] ss:$16 sps:$4 sm:$0xff]  }
  0x38   : > { %v2330_v15 = vld [vmem:[%s2268_s28 + $0x48] ss:$16 sps:$4 sm:$0xff]   ;;  %v2334_v16 = vld [vmem:[%s2268_s28 + $0x6c] ss:$16 sps:$4 sm:$0xff]   ;;  %v2338_v17 = vld [vmem:[%s2268_s28 + $0x80] ss:$16 sps:$4 sm:$0xff]  }
  0x39   : > { %v2342_v18 = vld [vmem:[%s2268_s28 + $0xa4] ss:$16 sps:$4 sm:$0xff]   ;;  %v2346_v19 = vld [vmem:[%s2268_s28 + $0x68] ss:$16 sps:$4 sm:$0xff]   ;;  %v2350_v20 = vld [vmem:[%s2268_s28 + $0x8c] ss:$16 sps:$4 sm:$0xff]  }
  0x3a   : > { %488 = vmatpush1.bf16.msra.mxu0 %v2288_v4  ;;  %529 = vmatpush1.bf16.msra.mxu1 %v2314_v11  ;;  %v2354_v21 = vld [vmem:[%s2268_s28 + $0xa0] ss:$16 sps:$4 sm:$0xff]   ;;  %v2357_v22 = vld [vmem:[%s2268_s28 + $0xc4] ss:$16 sps:$4 sm:$0xff]   ;;  %v2362_v23 = vld [vmem:[%s2268_s28 + $0x88] ss:$16 sps:$4 sm:$0xff]  }
  0x3b   : > { %489 = vmatprep.subr.bf16.mxu0 %v2292_v5  ;;  %530 = vmatprep.subr.bf16.mxu1 %v2325_v14  ;;  %v2366_v24 = vld [vmem:[%s2268_s28 + $0xac] ss:$16 sps:$4 sm:$0xff]   ;;  %v2370_v25 = vld [vmem:[%s2268_s28 + $0xc0] ss:$16 sps:$4 sm:$0xff]   ;;  %v2374_v26 = vld [vmem:[%s2268_s28 + $0xe4] ss:$16 sps:$4 sm:$0xff]  }
  0x3c   : > { %v2378_v27 = vld [vmem:[%s2268_s28 + $0xa8] ss:$16 sps:$4 sm:$0xff]   ;;  %v2382_v28 = vld [vmem:[%s2268_s28 + $0xcc] ss:$16 sps:$4 sm:$0xff]   ;;  %v2386_v29 = vld [vmem:[%s2268_s28 + $0xe0] ss:$16 sps:$4 sm:$0xff]  }
  0x3d   : > { %v2391_v30 = vld [vmem:[%s2268_s28 + $0xc8] ss:$16 sps:$4 sm:$0xff]   ;;  %v2395_v31 = vld [vmem:[%s2268_s28 + $0xec] ss:$16 sps:$4 sm:$0xff]   ;;  %v2155_v33 = vmov 0.0|0.0   ;;  %p242_p7 = scmp.lt.s32.totalorder %s2141_s12, 1 }
  0x3e   : > { %490 = vmatpush1.bf16.msra.mxu0 %v2302_v8  ;;  %531 = vmatpush1.bf16.msra.mxu1 %v2330_v15  ;;  %v2400_v32 = vld [vmem:[%s2268_s28 + $0xe8] ss:$16 sps:$4 sm:$0xff]   ;;  %s1799_s29 = smul.u32 112, %s2141_s12  ;;  %s1762_s30 = sshll.u32 %s2141_s12, 2 }
  0x3f   : > { %491 = vmatprep.subr.bf16.mxu0 %v2307_v9  ;;  %532 = vmatprep.subr.bf16.mxu1 %v2334_v16  ;;  %s2442_s20 = scalar_select %p242_p7, %s2141_s12, 1 }
  0x40   : > { %s1800_s7 = smul.u32 28, %s2141_s12 }
  0x41   : > { %s1797_s27 = sshll.u32 %s2442_s20, 7  ;;  %s1798_s6 = sshll.u32 %s2442_s20, 5 }
  0x42   : > { %492 = vmatpush1.bf16.msra.mxu0 %v2319_v12  ;;  %533 = vmatpush1.bf16.msra.mxu1 %v2346_v19  ;;  %s2449_s4 = scalar_lea.vmem %s2765_s0, %s1797_s27  ;;  %s2460_s15 = scalar_lea.vmem %s2767_s2, %s1798_s6 }
  0x43   : > { %493 = vmatprep.subr.bf16.mxu0 %v2322_v13  ;;  %534 = vmatprep.subr.bf16.mxu1 %v2350_v20  ;;  %s316_s5 = scalar_lea.vmem %s2449_s4, %s1799_s29  ;;  %s600_s17 = scalar_lea.vmem %s2460_s15, %s1800_s7 }
  0x44   : > { %v317_v34 = vld [vmem:[%s316_s5] sm:$0xff]  ;;  %v318_v38 = vld [vmem:[%s316_s5 + $0x8] sm:$0xff]  ;;  %s1740_s18 = smul.u32 80, %s2141_s12  ;;  %s1756_s27 = sshll.u32 %s2141_s12, 4 }
  0x45   : > { %v319_v35 = vunpack.c.l.bf16 %v317_v34  ;;  %v320_v36 = vunpack.c.h.bf16 %v317_v34  ;;  %v322_v45 = vunpack.c.h.bf16 %v318_v38  ;;  %v321_v51 = vunpack.c.l.bf16 %v318_v38  ;;  %s1746_s22 = smul.u32 20, %s2141_s12  ;;  %s1610_s29 = scalar_lea.vmem %s2449_s4, %s1756_s27 }
  0x46   : > { %494 = vmatpush1.bf16.msra.mxu0 %v2338_v17  ;;  %535 = vmatpush1.bf16.msra.mxu1 %v2362_v23  ;;  %s1595_s19 = scalar_lea.vmem %s2449_s4, %s1740_s18  ;;  %s1748_s24 = smul.u32 48, %s2141_s12 }
  0x47   : > { %495 = vmatprep.subr.bf16.mxu0 %v2342_v18  ;;  %536 = vmatprep.subr.bf16.mxu1 %v2366_v24  ;;  %s1599_s23 = scalar_lea.vmem %s2460_s15, %s1746_s22  ;;  %s1754_s26 = smul.u32 12, %s2141_s12 }
  0x48   : > { %s1603_s25 = scalar_lea.vmem %s2449_s4, %s1748_s24  ;;  %s1613_s3 = scalar_lea.vmem %s2460_s15, %s1762_s30 }
  0x49   : > { %s1607_s20 = scalar_lea.vmem %s2460_s15, %s1754_s26  ;;  %s991_s5 = ssub.s32 4, %s2141_s12 }
  0x4a   : > { %496 = vmatpush1.bf16.msra.mxu0 %v2354_v21  ;;  %537 = vmatpush1.bf16.msra.mxu1 %v2378_v27  ;;  %s1801_s6 = sshll.u32 %s991_s5, 4  ;;  %s1769_s8 = sshll.u32 %s991_s5, 2 }
  0x4b   : > { %497 = vmatprep.subr.bf16.mxu0 %v2357_v22  ;;  %538 = vmatprep.subr.bf16.mxu1 %v2382_v28  ;;  %s994_s7 = scalar_lea.vmem %s2449_s4, %s1801_s6  ;;  %s1118_s9 = scalar_lea.vmem %s2460_s15, %s1769_s8 }
  0x4c   : > { %s1786_s26 = smul.u32 4294967184, %s2141_s12 }
  0x4e   : > { %498 = vmatpush1.bf16.msra.mxu0 %v2370_v25  ;;  %539 = vmatpush1.bf16.msra.mxu1 %v2391_v30 }
  0x4f   : > { %499 = vmatprep.subr.bf16.mxu0 %v2374_v26  ;;  %540 = vmatprep.subr.bf16.mxu1 %v2395_v31 }
  0x52   : > { %500 = vmatpush1.bf16.msra.mxu0 %v2386_v29  ;;  %541 = vmatpush1.bf16.msra.mxu1 %v2400_v32 }
  0x53   : > { %615 = vmatprep.subr.bf16.mxu0 %v2277_v1  ;;  %656 = vmatprep.subr.bf16.mxu1 %v2295_v6 }
  0x55   : > { %518 = vmatmul.mubr.bf16.vlgmr.msra.gmra.mrb[0].mxu0 %v2155_v33  ;;  %559 = vmatmul.mubr.bf16.vlgmr.msra.gmra.mrb[0].mxu1 %v2155_v33 }
  0x56   : > { %616 = vmatpush1.bf16.msra.mxu0 %v2280_v2  ;;  %647 = vmatprep.mubr.bf16.mxu0 %v2154_v0 }
  0x57   : > { %617 = vmatprep.subr.bf16.mxu0 %v2284_v3  ;;  %657 = vmatpush1.bf16.msra.mxu1 %v2298_v7 }
  0x58   : > { %658 = vmatprep.subr.bf16.mxu1 %v2311_v10  ;;  %688 = vmatprep.mubr.bf16.mxu1 %v2154_v0 }
  0x5a   : > { %618 = vmatpush1.bf16.msra.mxu0 %v2288_v4 }
  0x5b   : > { %619 = vmatprep.subr.bf16.mxu0 %v2292_v5  ;;  %659 = vmatpush1.bf16.msra.mxu1 %v2314_v11 }
  0x5c   : > { %660 = vmatprep.subr.bf16.mxu1 %v2325_v14 }
  0x5e   : > { %620 = vmatpush1.bf16.msra.mxu0 %v2302_v8 }
  0x5f   : > { %621 = vmatprep.subr.bf16.mxu0 %v2307_v9  ;;  %661 = vmatpush1.bf16.msra.mxu1 %v2330_v15 }
  0x60   : > { %662 = vmatprep.subr.bf16.mxu1 %v2334_v16 }
  0x62   : > { %622 = vmatpush1.bf16.msra.mxu0 %v2319_v12 }
  0x63   : > { %623 = vmatprep.subr.bf16.mxu0 %v2322_v13  ;;  %663 = vmatpush1.bf16.msra.mxu1 %v2346_v19 }
  0x64   : > { %664 = vmatprep.subr.bf16.mxu1 %v2350_v20 }
  0x66   : > { %624 = vmatpush1.bf16.msra.mxu0 %v2338_v17 }
  0x67   : > { %625 = vmatprep.subr.bf16.mxu0 %v2342_v18  ;;  %665 = vmatpush1.bf16.msra.mxu1 %v2362_v23 }
  0x68   : > { %666 = vmatprep.subr.bf16.mxu1 %v2366_v24 }
  0x6a   : > { %626 = vmatpush1.bf16.msra.mxu0 %v2354_v21 }
  0x6b   : > { %627 = vmatprep.subr.bf16.mxu0 %v2357_v22  ;;  %667 = vmatpush1.bf16.msra.mxu1 %v2378_v27 }
  0x6c   : > { %668 = vmatprep.subr.bf16.mxu1 %v2382_v28 }
  0x6e   : > { %628 = vmatpush1.bf16.msra.mxu0 %v2370_v25 }
  0x6f   : > { %629 = vmatprep.subr.bf16.mxu0 %v2374_v26  ;;  %669 = vmatpush1.bf16.msra.mxu1 %v2391_v30 }
  0x70   : > { %670 = vmatprep.subr.bf16.mxu1 %v2395_v31 }
  0x72   : > { %630 = vmatpush1.bf16.msra.mxu0 %v2386_v29 }
  0x73   : > { %745 = vmatprep.subr.bf16.mxu0 %v2277_v1  ;;  %671 = vmatpush1.bf16.msra.mxu1 %v2400_v32 }
  0x74   : > { %786 = vmatprep.subr.bf16.mxu1 %v2295_v6 }
 0x128   : > { %v519_v37 = vpop.f32.mrb[0].mxu0  ;;  %v560_v47 = vpop.f32.mrb[0].mxu1 }
 0x129   : > { %v567_v39 = vadd.f32 %v519_v37, %v319_v35  ;;  %v521_v40 = vpop.f32.mrb[1].mxu0  ;;  %v562_v48 = vpop.f32.mrb[1].mxu1  ;;  %v569_v54 = vadd.f32 %v560_v47, %v321_v51 }
 0x12a   : > { %v568_v41 = vadd.f32 %v521_v40, %v320_v36  ;;  %v523_v42 = vpop.f32.mrb[2].mxu0  ;;  %v570_v49 = vadd.f32 %v562_v48, %v322_v45  ;;  %v564_v50 = vpop.f32.mrb[2].mxu1  ;;  %v1741_v40 = vld [vmem:[%s1595_s19 + $0x10] sm:$0xff] }
 0x12b   : > { %v1736_v43 = vmul.f32 -1.442695, %v567_v39  ;;  %v524_v44 = vpop.f32.mrb[3].mxu0  ;;  %v565_v52 = vpop.f32.mrb[3].mxu1  ;;  %v610_v42 = vunpack.c.h.bf16 %v1741_v40 }
 0x12c   : > { %v1737_v46 = vmul.f32 -1.442695, %v568_v41  ;;  %v1738_v53 = vmul.f32 -1.442695, %v570_v49  ;;  %v609_v41 = vunpack.c.l.bf16 %v1741_v40 }
 0x12d   : > { %1909 = vpow2.f32 %v1736_v43 }
 0x12e   : > { %1911 = vpow2.f32 %v1737_v46  ;;  %v1742_v46 = vld [vmem:[%s1595_s19 + $0x18] sm:$0xff]  ;;  %s1776_s19 = smul.u32 4294967284, %s2141_s12 }
 0x12f   : > { %1913 = vpow2.f32 %v1738_v53 }
 0x130   : > { %1915 = vtanh.f32 %v569_v54  ;;  %s1625_s22 = scalar_lea.vmem %s2460_s15, %s1776_s19 }
 0x137   : > { %v1910_v55 = vpop.eup %1909 }
 0x138   : > { %v1912_v56 = vpop.eup %1911  ;;  %v574_v57 = vadd.f32 1.0, %v1910_v55 }
 0x139   : > { %v580_v58 = vadd.f32 1.0, %v1912_v56  ;;  %v1914_v59 = vpop.eup %1913  ;;  %v612_v56 = vunpack.c.h.bf16 %v1742_v46 }
 0x13a   : > { %1917 = vrcp.f32 %v574_v57  ;;  %v1916_v60 = vpop.eup %1915  ;;  %v587_v62 = vadd.f32 1.0, %v1914_v59 }
 0x13b   : > { %1919 = vrcp.f32 %v580_v58  ;;  %v611_v58 = vunpack.c.l.bf16 %v1742_v46 }
 0x13c   : > { %1921 = vrcp.f32 %v587_v62 }
 0x144   : > { %v1918_v61 = vpop.eup %1917 }
 0x145   : > { %v1920_v63 = vpop.eup %1919  ;;  %v592_v33 = vmul.f32 %v1918_v61, %v1916_v60 }
 0x146   : > { %v591_v34 = vmul.f32 0.0, %v1920_v63  ;;  %v1922_v36 = vpop.eup %1921 }
 0x148   : > { %v2452_v35 = vadd.f32 %v592_v33, %v591_v34 }
 0x14a   : > { %1923 = vtanh.f32 %v2452_v35 }
 0x154   : > { %v1924_v37 = vpop.eup %1923 }
 0x155   : > { %v595_v38 = vmul.f32 %v1924_v37, %v1922_v36 }
 0x157   : > { %v598_v39 = vpack.c.bf16 %v595_v38, %v595_v38 }
 0x159   : > { %601 = vst [vmem:[%s600_s17] sm:$0xf] %v598_v39  ;;  %648 = vmatmul.mubr.bf16.vlgmr.msra.gmra.mrb[4].mxu0 %v598_v39  ;;  %689 = vmatmul.mubr.bf16.vlgmr.msra.gmra.mrb[4].mxu1 %v598_v39  ;;  %s1770_s17 = smul.u32 4294967248, %s2141_s12 }
 0x15a   : > { %746 = vmatpush1.bf16.msra.mxu0 %v2280_v2  ;;  %787 = vmatpush1.bf16.msra.mxu1 %v2298_v7 }
 0x15b   : > { %747 = vmatprep.subr.bf16.mxu0 %v2284_v3  ;;  %788 = vmatprep.subr.bf16.mxu1 %v2311_v10  ;;  %s1621_s18 = scalar_lea.vmem %s2449_s4, %s1770_s17 }
 0x15c   : > { %777 = vmatprep.mubr.bf16.mxu0 %v2154_v0  ;;  %818 = vmatprep.mubr.bf16.mxu1 %v2154_v0 }
 0x15e   : > { %748 = vmatpush1.bf16.msra.mxu0 %v2288_v4  ;;  %789 = vmatpush1.bf16.msra.mxu1 %v2314_v11 }
 0x15f   : > { %749 = vmatprep.subr.bf16.mxu0 %v2292_v5  ;;  %790 = vmatprep.subr.bf16.mxu1 %v2325_v14 }
 0x162   : > { %750 = vmatpush1.bf16.msra.mxu0 %v2302_v8  ;;  %791 = vmatpush1.bf16.msra.mxu1 %v2330_v15 }
 0x163   : > { %751 = vmatprep.subr.bf16.mxu0 %v2307_v9  ;;  %792 = vmatprep.subr.bf16.mxu1 %v2334_v16 }
 0x166   : > { %752 = vmatpush1.bf16.msra.mxu0 %v2319_v12  ;;  %793 = vmatpush1.bf16.msra.mxu1 %v2346_v19 }
 0x167   : > { %753 = vmatprep.subr.bf16.mxu0 %v2322_v13  ;;  %794 = vmatprep.subr.bf16.mxu1 %v2350_v20 }
 0x16a   : > { %754 = vmatpush1.bf16.msra.mxu0 %v2338_v17  ;;  %795 = vmatpush1.bf16.msra.mxu1 %v2362_v23 }
 0x16b   : > { %755 = vmatprep.subr.bf16.mxu0 %v2342_v18  ;;  %796 = vmatprep.subr.bf16.mxu1 %v2366_v24 }
 0x16e   : > { %756 = vmatpush1.bf16.msra.mxu0 %v2354_v21  ;;  %797 = vmatpush1.bf16.msra.mxu1 %v2378_v27 }
 0x16f   : > { %757 = vmatprep.subr.bf16.mxu0 %v2357_v22  ;;  %798 = vmatprep.subr.bf16.mxu1 %v2382_v28 }
 0x172   : > { %758 = vmatpush1.bf16.msra.mxu0 %v2370_v25  ;;  %799 = vmatpush1.bf16.msra.mxu1 %v2391_v30 }
 0x173   : > { %759 = vmatprep.subr.bf16.mxu0 %v2374_v26  ;;  %800 = vmatprep.subr.bf16.mxu1 %v2395_v31 }
 0x176   : > { %760 = vmatpush1.bf16.msra.mxu0 %v2386_v29  ;;  %801 = vmatpush1.bf16.msra.mxu1 %v2400_v32 }
 0x177   : > { %874 = vmatprep.subr.bf16.mxu0 %v2277_v1  ;;  %915 = vmatprep.subr.bf16.mxu1 %v2295_v6 }
 0x22c   : > { %v649_v43 = vpop.f32.mrb[4].mxu0  ;;  %v690_v44 = vpop.f32.mrb[4].mxu1 }
 0x22d   : > { %v697_v45 = vadd.f32 %v649_v43, %v609_v41  ;;  %v651_v47 = vpop.f32.mrb[5].mxu0  ;;  %v692_v48 = vpop.f32.mrb[5].mxu1  ;;  %v699_v60 = vadd.f32 %v690_v44, %v611_v58 }
 0x22e   : > { %v698_v49 = vadd.f32 %v651_v47, %v610_v42  ;;  %v653_v50 = vpop.f32.mrb[6].mxu0  ;;  %v694_v51 = vpop.f32.mrb[6].mxu1  ;;  %v700_v57 = vadd.f32 %v692_v48, %v612_v56 }
 0x22f   : > { %v1743_v52 = vmul.f32 -1.442695, %v697_v45  ;;  %v654_v53 = vpop.f32.mrb[7].mxu0  ;;  %v695_v54 = vpop.f32.mrb[7].mxu1 }
 0x230   : > { %v1744_v55 = vmul.f32 -1.442695, %v698_v49  ;;  %v1745_v59 = vmul.f32 -1.442695, %v700_v57 }
 0x231   : > { %1925 = vpow2.f32 %v1743_v52  ;;  %v1750_v52 = vld [vmem:[%s1603_s25 + $0x28] sm:$0xff] }
 0x232   : > { %1927 = vpow2.f32 %v1744_v55 }
 0x233   : > { %1929 = vpow2.f32 %v1745_v59 }
 0x234   : > { %1931 = vtanh.f32 %v699_v60 }
 0x23b   : > { %v1926_v61 = vpop.eup %1925 }
 0x23c   : > { %v1928_v62 = vpop.eup %1927  ;;  %v704_v63 = vadd.f32 1.0, %v1926_v61 }
 0x23d   : > { %v710_v33 = vadd.f32 1.0, %v1928_v62  ;;  %v1930_v34 = vpop.eup %1929  ;;  %v742_v62 = vunpack.c.h.bf16 %v1750_v52 }
 0x23e   : > { %1933 = vrcp.f32 %v704_v63  ;;  %v1932_v36 = vpop.eup %1931  ;;  %v717_v40 = vadd.f32 1.0, %v1930_v34 }
 0x23f   : > { %1935 = vrcp.f32 %v710_v33  ;;  %v741_v33 = vunpack.c.l.bf16 %v1750_v52 }
 0x240   : > { %1937 = vrcp.f32 %v717_v40 }
 0x248   : > { %v1934_v37 = vpop.eup %1933 }
 0x249   : > { %v1936_v38 = vpop.eup %1935  ;;  %v722_v39 = vmul.f32 %v1934_v37, %v1932_v36 }
 0x24a   : > { %v721_v41 = vmul.f32 %v1936_v38, %v2452_v35  ;;  %v1938_v43 = vpop.eup %1937  ;;  %v1749_v35 = vld [vmem:[%s1603_s25 + $0x20] sm:$0xff] }
 0x24b   : > { %v739_v47 = vunpack.c.l.bf16 %v1749_v35  ;;  %v740_v48 = vunpack.c.h.bf16 %v1749_v35 }
 0x24c   : > { %v2500_v42 = vadd.f32 %v722_v39, %v721_v41 }
 0x24e   : > { %1939 = vtanh.f32 %v2500_v42 }
 0x258   : > { %v1940_v44 = vpop.eup %1939 }
 0x259   : > { %v725_v45 = vmul.f32 %v1940_v44, %v1938_v43 }
 0x25b   : > { %v728_v46 = vpack.c.bf16 %v725_v45, %v725_v45 }
 0x25d   : > { %1747 = vst [vmem:[%s1599_s23 + $0x4] sm:$0xf] %v728_v46  ;;  %778 = vmatmul.mubr.bf16.vlgmr.msra.gmra.mrb[8].mxu0 %v728_v46  ;;  %819 = vmatmul.mubr.bf16.vlgmr.msra.gmra.mrb[8].mxu1 %v728_v46  ;;  %s1778_s23 = smul.u32 4294967216, %s2141_s12 }
 0x25e   : > { %875 = vmatpush1.bf16.msra.mxu0 %v2280_v2  ;;  %916 = vmatpush1.bf16.msra.mxu1 %v2298_v7 }
 0x25f   : > { %876 = vmatprep.subr.bf16.mxu0 %v2284_v3  ;;  %917 = vmatprep.subr.bf16.mxu1 %v2311_v10  ;;  %s1629_s24 = scalar_lea.vmem %s2449_s4, %s1778_s23 }
 0x260   : > { %906 = vmatprep.mubr.bf16.mxu0 %v2154_v0  ;;  %947 = vmatprep.mubr.bf16.mxu1 %v2154_v0 }
 0x262   : > { %877 = vmatpush1.bf16.msra.mxu0 %v2288_v4  ;;  %918 = vmatpush1.bf16.msra.mxu1 %v2314_v11 }
 0x263   : > { %878 = vmatprep.subr.bf16.mxu0 %v2292_v5  ;;  %919 = vmatprep.subr.bf16.mxu1 %v2325_v14 }
 0x266   : > { %879 = vmatpush1.bf16.msra.mxu0 %v2302_v8  ;;  %920 = vmatpush1.bf16.msra.mxu1 %v2330_v15 }
 0x267   : > { %880 = vmatprep.subr.bf16.mxu0 %v2307_v9  ;;  %921 = vmatprep.subr.bf16.mxu1 %v2334_v16 }
 0x26a   : > { %881 = vmatpush1.bf16.msra.mxu0 %v2319_v12  ;;  %922 = vmatpush1.bf16.msra.mxu1 %v2346_v19 }
 0x26b   : > { %882 = vmatprep.subr.bf16.mxu0 %v2322_v13  ;;  %923 = vmatprep.subr.bf16.mxu1 %v2350_v20 }
 0x26e   : > { %883 = vmatpush1.bf16.msra.mxu0 %v2338_v17  ;;  %924 = vmatpush1.bf16.msra.mxu1 %v2362_v23 }
 0x26f   : > { %884 = vmatprep.subr.bf16.mxu0 %v2342_v18  ;;  %925 = vmatprep.subr.bf16.mxu1 %v2366_v24 }
 0x272   : > { %885 = vmatpush1.bf16.msra.mxu0 %v2354_v21  ;;  %926 = vmatpush1.bf16.msra.mxu1 %v2378_v27 }
 0x273   : > { %886 = vmatprep.subr.bf16.mxu0 %v2357_v22  ;;  %927 = vmatprep.subr.bf16.mxu1 %v2382_v28 }
 0x276   : > { %887 = vmatpush1.bf16.msra.mxu0 %v2370_v25  ;;  %928 = vmatpush1.bf16.msra.mxu1 %v2391_v30 }
 0x277   : > { %888 = vmatprep.subr.bf16.mxu0 %v2374_v26  ;;  %929 = vmatprep.subr.bf16.mxu1 %v2395_v31 }
 0x27a   : > { %889 = vmatpush1.bf16.msra.mxu0 %v2386_v29  ;;  %930 = vmatpush1.bf16.msra.mxu1 %v2400_v32 }
 0x27b   : > { %1003 = vmatprep.subr.bf16.mxu0 %v2277_v1  ;;  %1044 = vmatprep.subr.bf16.mxu1 %v2295_v6 }
 0x330   : > { %v779_v49 = vpop.f32.mrb[8].mxu0  ;;  %v820_v50 = vpop.f32.mrb[8].mxu1 }
 0x331   : > { %v827_v51 = vadd.f32 %v779_v49, %v739_v47  ;;  %v781_v53 = vpop.f32.mrb[9].mxu0  ;;  %v822_v54 = vpop.f32.mrb[9].mxu1  ;;  %v829_v36 = vadd.f32 %v820_v50, %v741_v33 }
 0x332   : > { %v828_v55 = vadd.f32 %v781_v53, %v740_v48  ;;  %v783_v56 = vpop.f32.mrb[10].mxu0  ;;  %v824_v57 = vpop.f32.mrb[10].mxu1  ;;  %v830_v63 = vadd.f32 %v822_v54, %v742_v62 }
 0x333   : > { %v1751_v58 = vmul.f32 -1.442695, %v827_v51  ;;  %v784_v59 = vpop.f32.mrb[11].mxu0  ;;  %v825_v60 = vpop.f32.mrb[11].mxu1 }
 0x334   : > { %v1752_v61 = vmul.f32 -1.442695, %v828_v55  ;;  %v1753_v34 = vmul.f32 -1.442695, %v830_v63 }
 0x335   : > { %1941 = vpow2.f32 %v1751_v58  ;;  %v1758_v58 = vld [vmem:[%s1610_s29 + $0x38] sm:$0xff] }
 0x336   : > { %1943 = vpow2.f32 %v1752_v61 }
 0x337   : > { %1945 = vpow2.f32 %v1753_v34 }
 0x338   : > { %1947 = vtanh.f32 %v829_v36 }
 0x33f   : > { %v1942_v37 = vpop.eup %1941 }
 0x340   : > { %v1944_v38 = vpop.eup %1943  ;;  %v834_v39 = vadd.f32 1.0, %v1942_v37 }
 0x341   : > { %v840_v40 = vadd.f32 1.0, %v1944_v38  ;;  %v1946_v41 = vpop.eup %1945  ;;  %v871_v38 = vunpack.c.h.bf16 %v1758_v58 }
 0x342   : > { %1949 = vrcp.f32 %v834_v39  ;;  %v1948_v43 = vpop.eup %1947  ;;  %v847_v35 = vadd.f32 1.0, %v1946_v41 }
 0x343   : > { %1951 = vrcp.f32 %v840_v40  ;;  %v870_v40 = vunpack.c.l.bf16 %v1758_v58 }
 0x344   : > { %1953 = vrcp.f32 %v847_v35 }
 0x34c   : > { %v1950_v44 = vpop.eup %1949 }
 0x34d   : > { %v1952_v45 = vpop.eup %1951  ;;  %v852_v46 = vmul.f32 %v1950_v44, %v1948_v43 }
 0x34e   : > { %v851_v47 = vmul.f32 %v1952_v45, %v2500_v42  ;;  %v1954_v49 = vpop.eup %1953  ;;  %v1757_v42 = vld [vmem:[%s1610_s29 + $0x30] sm:$0xff] }
 0x34f   : > { %v868_v53 = vunpack.c.l.bf16 %v1757_v42  ;;  %v869_v54 = vunpack.c.h.bf16 %v1757_v42 }
 0x350   : > { %v2542_v48 = vadd.f32 %v852_v46, %v851_v47 }
 0x352   : > { %1955 = vtanh.f32 %v2542_v48 }
 0x35c   : > { %v1956_v50 = vpop.eup %1955 }
 0x35d   : > { %v855_v51 = vmul.f32 %v1956_v50, %v1954_v49 }
 0x35f   : > { %v858_v52 = vpack.c.bf16 %v855_v51, %v855_v51 }
 0x361   : > { %1755 = vst [vmem:[%s1607_s20 + $0x8] sm:$0xf] %v858_v52  ;;  %907 = vmatmul.mubr.bf16.vlgmr.msra.gmra.mrb[12].mxu0 %v858_v52  ;;  %948 = vmatmul.mubr.bf16.vlgmr.msra.gmra.mrb[12].mxu1 %v858_v52  ;;  %s1637_s20 = scalar_lea.vmem %s2449_s4, %s1786_s26  ;;  %s1792_s4 = smul.u32 4294967268, %s2141_s12 }
 0x362   : > { %1004 = vmatpush1.bf16.msra.mxu0 %v2280_v2  ;;  %1045 = vmatpush1.bf16.msra.mxu1 %v2298_v7 }
 0x363   : > { %1005 = vmatprep.subr.bf16.mxu0 %v2284_v3  ;;  %1046 = vmatprep.subr.bf16.mxu1 %v2311_v10  ;;  %s1641_s27 = scalar_lea.vmem %s2460_s15, %s1792_s4 }
 0x364   : > { %1035 = vmatprep.mubr.bf16.mxu0 %v2154_v0  ;;  %1076 = vmatprep.mubr.bf16.mxu1 %v2154_v0 }
 0x366   : > { %1006 = vmatpush1.bf16.msra.mxu0 %v2288_v4  ;;  %1047 = vmatpush1.bf16.msra.mxu1 %v2314_v11 }
 0x367   : > { %1007 = vmatprep.subr.bf16.mxu0 %v2292_v5  ;;  %1048 = vmatprep.subr.bf16.mxu1 %v2325_v14 }
 0x36a   : > { %1008 = vmatpush1.bf16.msra.mxu0 %v2302_v8  ;;  %1049 = vmatpush1.bf16.msra.mxu1 %v2330_v15 }
 0x36b   : > { %1009 = vmatprep.subr.bf16.mxu0 %v2307_v9  ;;  %1050 = vmatprep.subr.bf16.mxu1 %v2334_v16 }
 0x36e   : > { %1010 = vmatpush1.bf16.msra.mxu0 %v2319_v12  ;;  %1051 = vmatpush1.bf16.msra.mxu1 %v2346_v19 }
 0x36f   : > { %1011 = vmatprep.subr.bf16.mxu0 %v2322_v13  ;;  %1052 = vmatprep.subr.bf16.mxu1 %v2350_v20 }
 0x372   : > { %1012 = vmatpush1.bf16.msra.mxu0 %v2338_v17  ;;  %1053 = vmatpush1.bf16.msra.mxu1 %v2362_v23 }
 0x373   : > { %1013 = vmatprep.subr.bf16.mxu0 %v2342_v18  ;;  %1054 = vmatprep.subr.bf16.mxu1 %v2366_v24 }
 0x376   : > { %1014 = vmatpush1.bf16.msra.mxu0 %v2354_v21  ;;  %1055 = vmatpush1.bf16.msra.mxu1 %v2378_v27 }
 0x377   : > { %1015 = vmatprep.subr.bf16.mxu0 %v2357_v22  ;;  %1056 = vmatprep.subr.bf16.mxu1 %v2382_v28 }
 0x37a   : > { %1016 = vmatpush1.bf16.msra.mxu0 %v2370_v25  ;;  %1057 = vmatpush1.bf16.msra.mxu1 %v2391_v30 }
 0x37b   : > { %1017 = vmatprep.subr.bf16.mxu0 %v2374_v26  ;;  %1058 = vmatprep.subr.bf16.mxu1 %v2395_v31 }
 0x37e   : > { %1018 = vmatpush1.bf16.msra.mxu0 %v2386_v29  ;;  %1059 = vmatpush1.bf16.msra.mxu1 %v2400_v32 }
 0x37f   : > { %1133 = vmatprep.subr.bf16.mxu0 %v2277_v1  ;;  %1174 = vmatprep.subr.bf16.mxu1 %v2295_v6 }
 0x434   : > { %v908_v55 = vpop.f32.mrb[12].mxu0  ;;  %v949_v56 = vpop.f32.mrb[12].mxu1 }
 0x435   : > { %v956_v57 = vadd.f32 %v908_v55, %v868_v53  ;;  %v910_v59 = vpop.f32.mrb[13].mxu0  ;;  %v951_v60 = vpop.f32.mrb[13].mxu1  ;;  %v958_v43 = vadd.f32 %v949_v56, %v870_v40 }
 0x436   : > { %v957_v61 = vadd.f32 %v910_v59, %v869_v54  ;;  %v912_v62 = vpop.f32.mrb[14].mxu0  ;;  %v953_v63 = vpop.f32.mrb[14].mxu1  ;;  %v959_v39 = vadd.f32 %v951_v60, %v871_v38 }
 0x437   : > { %v1759_v33 = vmul.f32 -1.442695, %v956_v57  ;;  %v913_v34 = vpop.f32.mrb[15].mxu0  ;;  %v954_v36 = vpop.f32.mrb[15].mxu1 }
 0x438   : > { %v1760_v37 = vmul.f32 -1.442695, %v957_v61  ;;  %v1761_v41 = vmul.f32 -1.442695, %v959_v39 }
 0x439   : > { %1957 = vpow2.f32 %v1759_v33 }
 0x43a   : > { %1959 = vpow2.f32 %v1760_v37 }
 0x43b   : > { %1961 = vpow2.f32 %v1761_v41 }
 0x43c   : > { %1963 = vtanh.f32 %v958_v43 }
 0x443   : > { %v1958_v44 = vpop.eup %1957 }
 0x444   : > { %v1960_v45 = vpop.eup %1959  ;;  %v963_v46 = vadd.f32 1.0, %v1958_v44 }
 0x445   : > { %v969_v35 = vadd.f32 1.0, %v1960_v45  ;;  %v1962_v47 = vpop.eup %1961 }
 0x446   : > { %1965 = vrcp.f32 %v963_v46  ;;  %v1964_v49 = vpop.eup %1963  ;;  %v976_v42 = vadd.f32 1.0, %v1962_v47 }
 0x447   : > { %1967 = vrcp.f32 %v969_v35 }
 0x448   : > { %1969 = vrcp.f32 %v976_v42 }
 0x450   : > { %v1966_v50 = vpop.eup %1965 }
 0x451   : > { %v1968_v51 = vpop.eup %1967  ;;  %v981_v52 = vmul.f32 %v1966_v50, %v1964_v49 }
 0x452   : > { %v980_v53 = vmul.f32 %v1968_v51, %v2542_v48  ;;  %v1970_v55 = vpop.eup %1969 }
 0x454   : > { %v2584_v54 = vadd.f32 %v981_v52, %v980_v53  ;;  %v2635_v53 = vld [vmem:[%s2268_s28] ss:$16 sps:$4 sm:$0xff]  }
 0x456   : > { %1971 = vtanh.f32 %v2584_v54 }
 0x460   : > { %v1972_v56 = vpop.eup %1971 }
 0x461   : > { %v984_v57 = vmul.f32 %v1972_v56, %v1970_v55  ;;  %v2643_v55 = vld [vmem:[%s2268_s28 + $0x24] ss:$16 sps:$4 sm:$0xff]   ;;  %v2650_v56 = vld [vmem:[%s2268_s28 + $0x20] ss:$16 sps:$4 sm:$0xff]  }
 0x463   : > { %v987_v58 = vpack.c.bf16 %v984_v57, %v984_v57  ;;  %v2654_v57 = vld [vmem:[%s2268_s28 + $0x28] ss:$16 sps:$4 sm:$0xff]  }
 0x465   : > { %1763 = vst [vmem:[%s1613_s3 + $0xc] sm:$0xf] %v987_v58  ;;  %1036 = vmatmul.mubr.bf16.vlgmr.msra.gmra.mrb[16].mxu0 %v987_v58  ;;  %1077 = vmatmul.mubr.bf16.vlgmr.msra.gmra.mrb[16].mxu1 %v987_v58  ;;  %v2658_v58 = vld [vmem:[%s2268_s28 + $0x44] ss:$16 sps:$4 sm:$0xff]  }
 0x466   : > { %1134 = vmatpush1.bf16.msra.mxu0 %v2280_v2  ;;  %1175 = vmatpush1.bf16.msra.mxu1 %v2298_v7  ;;  %v995_v2 = vld [vmem:[%s994_s7] sm:$0xff] }
 0x467   : > { %1135 = vmatprep.subr.bf16.mxu0 %v2284_v3  ;;  %1176 = vmatprep.subr.bf16.mxu1 %v2311_v10  ;;  %v997_v3 = vunpack.c.l.bf16 %v995_v2 }
 0x468   : > { %1165 = vmatprep.mubr.bf16.mxu0 %v2154_v0  ;;  %1206 = vmatprep.mubr.bf16.mxu1 %v2154_v0 }
 0x46a   : > { %1136 = vmatpush1.bf16.msra.mxu0 %v2288_v4  ;;  %1177 = vmatpush1.bf16.msra.mxu1 %v2314_v11  ;;  %v998_v4 = vunpack.c.h.bf16 %v995_v2  ;;  %v2668_v2 = vld [vmem:[%s2268_s28 + $0x64] ss:$16 sps:$4 sm:$0xff]  }
 0x46b   : > { %1137 = vmatprep.subr.bf16.mxu0 %v2292_v5  ;;  %1178 = vmatprep.subr.bf16.mxu1 %v2325_v14 }
 0x46e   : > { %1138 = vmatpush1.bf16.msra.mxu0 %v2302_v8  ;;  %1179 = vmatpush1.bf16.msra.mxu1 %v2330_v15 }
 0x46f   : > { %1139 = vmatprep.subr.bf16.mxu0 %v2307_v9  ;;  %1180 = vmatprep.subr.bf16.mxu1 %v2334_v16  ;;  %v996_v9 = vld [vmem:[%s994_s7 + $0x8] sm:$0xff] }
 0x470   : > { %v1000_v62 = vunpack.c.h.bf16 %v996_v9  ;;  %v999_v33 = vunpack.c.l.bf16 %v996_v9 }
 0x472   : > { %1140 = vmatpush1.bf16.msra.mxu0 %v2319_v12  ;;  %1181 = vmatpush1.bf16.msra.mxu1 %v2346_v19 }
 0x473   : > { %1141 = vmatprep.subr.bf16.mxu0 %v2322_v13  ;;  %1182 = vmatprep.subr.bf16.mxu1 %v2350_v20 }
 0x476   : > { %1142 = vmatpush1.bf16.msra.mxu0 %v2338_v17  ;;  %1183 = vmatpush1.bf16.msra.mxu1 %v2362_v23 }
 0x477   : > { %1143 = vmatprep.subr.bf16.mxu0 %v2342_v18  ;;  %1184 = vmatprep.subr.bf16.mxu1 %v2366_v24 }
 0x47a   : > { %1144 = vmatpush1.bf16.msra.mxu0 %v2354_v21  ;;  %1185 = vmatpush1.bf16.msra.mxu1 %v2378_v27 }
 0x47b   : > { %1145 = vmatprep.subr.bf16.mxu0 %v2357_v22  ;;  %1186 = vmatprep.subr.bf16.mxu1 %v2382_v28 }
 0x47e   : > { %1146 = vmatpush1.bf16.msra.mxu0 %v2370_v25  ;;  %1187 = vmatpush1.bf16.msra.mxu1 %v2391_v30 }
 0x47f   : > { %1147 = vmatprep.subr.bf16.mxu0 %v2374_v26  ;;  %1188 = vmatprep.subr.bf16.mxu1 %v2395_v31 }
 0x482   : > { %1148 = vmatpush1.bf16.msra.mxu0 %v2386_v29  ;;  %1189 = vmatpush1.bf16.msra.mxu1 %v2400_v32 }
 0x483   : > { %1263 = vmatprep.subr.bf16.mxu0 %v2277_v1  ;;  %1304 = vmatprep.subr.bf16.mxu1 %v2295_v6 }
 0x538   : > { %v1037_v5 = vpop.f32.mrb[16].mxu0  ;;  %v1078_v7 = vpop.f32.mrb[16].mxu1 }
 0x539   : > { %v1085_v8 = vadd.f32 %v1037_v5, %v997_v3  ;;  %v1039_v11 = vpop.f32.mrb[17].mxu0  ;;  %v1080_v12 = vpop.f32.mrb[17].mxu1  ;;  %v1087_v36 = vadd.f32 %v1078_v7, %v999_v33  ;;  %v2673_v3 = vld [vmem:[%s2268_s28 + $0x60] ss:$16 sps:$4 sm:$0xff]  }
 0x53a   : > { %v1086_v13 = vadd.f32 %v1039_v11, %v998_v4  ;;  %v1041_v48 = vpop.f32.mrb[18].mxu0  ;;  %v1082_v59 = vpop.f32.mrb[18].mxu1  ;;  %v1088_v63 = vadd.f32 %v1080_v12, %v1000_v62  ;;  %v2678_v4 = vld [vmem:[%s2268_s28 + $0x84] ss:$16 sps:$4 sm:$0xff]  }
 0x53b   : > { %v1766_v60 = vmul.f32 -1.442695, %v1085_v8  ;;  %v1042_v1 = vpop.f32.mrb[19].mxu0  ;;  %v1083_v61 = vpop.f32.mrb[19].mxu1 }
 0x53c   : > { %v1767_v6 = vmul.f32 -1.442695, %v1086_v13  ;;  %v1768_v34 = vmul.f32 -1.442695, %v1088_v63 }
 0x53d   : > { %1973 = vpow2.f32 %v1766_v60 }
 0x53e   : > { %1975 = vpow2.f32 %v1767_v6 }
 0x53f   : > { %1977 = vpow2.f32 %v1768_v34 }
 0x540   : > { %1979 = vtanh.f32 %v1087_v36 }
 0x547   : > { %v1974_v37 = vpop.eup %1973 }
 0x548   : > { %v1976_v38 = vpop.eup %1975  ;;  %v1092_v39 = vadd.f32 1.0, %v1974_v37 }
 0x549   : > { %v1098_v40 = vadd.f32 1.0, %v1976_v38  ;;  %v1978_v41 = vpop.eup %1977 }
 0x54a   : > { %1981 = vrcp.f32 %v1092_v39  ;;  %v1980_v43 = vpop.eup %1979  ;;  %v1105_v35 = vadd.f32 1.0, %v1978_v41  ;;  %v2049_v39 = vld [vmem:[%s2268_s28 + $0x2c] ss:$16 sps:$4 sm:$0xff]   ;;  %v2051_v41 = vld [vmem:[%s2268_s28 + $0x48] ss:$16 sps:$4 sm:$0xff]  }
 0x54b   : > { %1983 = vrcp.f32 %v1098_v40  ;;  %v2050_v40 = vld [vmem:[%s2268_s28 + $0x4c] ss:$16 sps:$4 sm:$0xff]  }
 0x54c   : > { %1985 = vrcp.f32 %v1105_v35  ;;  %v2057_v35 = vld [vmem:[%s2268_s28 + $0xa4] ss:$16 sps:$4 sm:$0xff]  }
 0x554   : > { %v1982_v44 = vpop.eup %1981 }
 0x555   : > { %v1984_v45 = vpop.eup %1983  ;;  %v1110_v46 = vmul.f32 %v1982_v44, %v1980_v43  ;;  %v2053_v43 = vld [vmem:[%s2268_s28 + $0x68] ss:$16 sps:$4 sm:$0xff]   ;;  %v2054_v44 = vld [vmem:[%s2268_s28 + $0x8c] ss:$16 sps:$4 sm:$0xff]  }
 0x556   : > { %v1109_v47 = vmul.f32 %v1984_v45, %v2584_v54  ;;  %v1986_v50 = vpop.eup %1985  ;;  %v2639_v54 = vld [vmem:[%s2268_s28 + $0x8] ss:$16 sps:$4 sm:$0xff]   ;;  %v2055_v45 = vld [vmem:[%s2268_s28 + $0x80] ss:$16 sps:$4 sm:$0xff]  }
 0x558   : > { %v2628_v49 = vadd.f32 %v1110_v46, %v1109_v47  ;;  %v2056_v46 = vld [vmem:[%s2268_s28 + $0x88] ss:$16 sps:$4 sm:$0xff]   ;;  %v2058_v47 = vld [vmem:[%s2268_s28 + $0xac] ss:$16 sps:$4 sm:$0xff]  }
 0x55a   : > { %1987 = vtanh.f32 %v2628_v49 }
 0x564   : > { %v1988_v51 = vpop.eup %1987 }
 0x565   : > { %v1113_v52 = vmul.f32 %v1988_v51, %v1986_v50  ;;  %v2060_v50 = vld [vmem:[%s2268_s28 + $0xa8] ss:$16 sps:$4 sm:$0xff]   ;;  %v2061_v51 = vld [vmem:[%s2268_s28 + $0xc4] ss:$16 sps:$4 sm:$0xff]  }
 0x567   : > { %v1116_v42 = vpack.c.bf16 %v1113_v52, %v1113_v52  ;;  %v2062_v52 = vld [vmem:[%s2268_s28 + $0xcc] ss:$16 sps:$4 sm:$0xff]  }
 0x569   : > { %1119 = vst [vmem:[%s1118_s9] sm:$0xf] %v1116_v42  ;;  %1166 = vmatmul.mubr.bf16.vlgmr.msra.gmra.mrb[20].mxu0 %v1116_v42  ;;  %1207 = vmatmul.mubr.bf16.vlgmr.msra.gmra.mrb[20].mxu1 %v1116_v42  ;;  %v2063_v42 = vld [vmem:[%s2268_s28 + $0xc0] ss:$16 sps:$4 sm:$0xff]  }
 0x56a   : > { %1264 = vmatpush1.bf16.msra.mxu0 %v2635_v53  ;;  %1305 = vmatpush1.bf16.msra.mxu1 %v2639_v54 }
 0x56b   : > { %1265 = vmatprep.subr.bf16.mxu0 %v2643_v55  ;;  %1306 = vmatprep.subr.bf16.mxu1 %v2311_v10  ;;  %v2663_v10 = vld [vmem:[%s2268_s28 + $0x40] ss:$16 sps:$4 sm:$0xff]  }
 0x56c   : > { %1295 = vmatprep.mubr.bf16.mxu0 %v2154_v0  ;;  %1336 = vmatprep.mubr.bf16.mxu1 %v2154_v0 }
 0x56e   : > { %1266 = vmatpush1.bf16.msra.mxu0 %v2650_v56  ;;  %1307 = vmatpush1.bf16.msra.mxu1 %v2654_v57 }
 0x56f   : > { %1267 = vmatprep.subr.bf16.mxu0 %v2658_v58  ;;  %1308 = vmatprep.subr.bf16.mxu1 %v2325_v14  ;;  %v2047_v14 = vld [vmem:[%s2268_s28 + $0x4] ss:$16 sps:$4 sm:$0xff]  }
 0x572   : > { %1268 = vmatpush1.bf16.msra.mxu0 %v2663_v10  ;;  %1309 = vmatpush1.bf16.msra.mxu1 %v2330_v15  ;;  %v2048_v15 = vld [vmem:[%s2268_s28 + $0xc] ss:$16 sps:$4 sm:$0xff]  }
 0x573   : > { %1269 = vmatprep.subr.bf16.mxu0 %v2668_v2  ;;  %1310 = vmatprep.subr.bf16.mxu1 %v2334_v16  ;;  %v1771_v16 = vld [vmem:[%s1621_s18 + $0x50] sm:$0xff] }
 0x576   : > { %1270 = vmatpush1.bf16.msra.mxu0 %v2673_v3  ;;  %1311 = vmatpush1.bf16.msra.mxu1 %v2346_v19 }
 0x577   : > { %1271 = vmatprep.subr.bf16.mxu0 %v2678_v4  ;;  %1312 = vmatprep.subr.bf16.mxu1 %v2350_v20 }
 0x57a   : > { %1272 = vmatpush1.bf16.msra.mxu0 %v2338_v17  ;;  %1313 = vmatpush1.bf16.msra.mxu1 %v2362_v23  ;;  %v1127_v17 = vunpack.c.l.bf16 %v1771_v16 }
 0x57b   : > { %1273 = vmatprep.subr.bf16.mxu0 %v2342_v18  ;;  %1314 = vmatprep.subr.bf16.mxu1 %v2366_v24  ;;  %v1128_v18 = vunpack.c.h.bf16 %v1771_v16 }
 0x57e   : > { %1274 = vmatpush1.bf16.msra.mxu0 %v2354_v21  ;;  %1315 = vmatpush1.bf16.msra.mxu1 %v2378_v27 }
 0x57f   : > { %1275 = vmatprep.subr.bf16.mxu0 %v2357_v22  ;;  %1316 = vmatprep.subr.bf16.mxu1 %v2382_v28  ;;  %v1772_v22 = vld [vmem:[%s1621_s18 + $0x58] sm:$0xff] }
 0x580   : > { %v1129_v7 = vunpack.c.l.bf16 %v1772_v22 }
 0x582   : > { %1276 = vmatpush1.bf16.msra.mxu0 %v2370_v25  ;;  %1317 = vmatpush1.bf16.msra.mxu1 %v2391_v30 }
 0x583   : > { %1277 = vmatprep.subr.bf16.mxu0 %v2374_v26  ;;  %1318 = vmatprep.subr.bf16.mxu1 %v2395_v31 }
 0x586   : > { %1278 = vmatpush1.bf16.msra.mxu0 %v2386_v29  ;;  %1319 = vmatpush1.bf16.msra.mxu1 %v2400_v32  ;;  %v1130_v32 = vunpack.c.h.bf16 %v1772_v22 }
 0x587   : > { %1393 = vmatprep.subr.bf16.mxu0 %v2047_v14  ;;  %1434 = vmatprep.subr.bf16.mxu1 %v2048_v15  ;;  %v1780_v15 = vld [vmem:[%s1629_s24 + $0x68] sm:$0xff] }
 0x63c   : > { %v1167_v19 = vpop.f32.mrb[20].mxu0  ;;  %v1208_v20 = vpop.f32.mrb[20].mxu1 }
 0x63d   : > { %v1215_v21 = vadd.f32 %v1167_v19, %v1127_v17  ;;  %v1169_v23 = vpop.f32.mrb[21].mxu0  ;;  %v1210_v24 = vpop.f32.mrb[21].mxu1  ;;  %v1217_v9 = vadd.f32 %v1208_v20, %v1129_v7 }
 0x63e   : > { %v1216_v25 = vadd.f32 %v1169_v23, %v1128_v18  ;;  %v1171_v26 = vpop.f32.mrb[22].mxu0  ;;  %v1212_v27 = vpop.f32.mrb[22].mxu1  ;;  %v1218_v5 = vadd.f32 %v1210_v24, %v1130_v32 }
 0x63f   : > { %v1773_v28 = vmul.f32 -1.442695, %v1215_v21  ;;  %v1172_v29 = vpop.f32.mrb[23].mxu0  ;;  %v1213_v30 = vpop.f32.mrb[23].mxu1  ;;  %v1259_v27 = vunpack.c.l.bf16 %v1780_v15 }
 0x640   : > { %v1774_v31 = vmul.f32 -1.442695, %v1216_v25  ;;  %v1775_v8 = vmul.f32 -1.442695, %v1218_v5  ;;  %v1260_v25 = vunpack.c.h.bf16 %v1780_v15 }
 0x641   : > { %1989 = vpow2.f32 %v1773_v28 }
 0x642   : > { %1991 = vpow2.f32 %v1774_v31 }
 0x643   : > { %1993 = vpow2.f32 %v1775_v8 }
 0x644   : > { %1995 = vtanh.f32 %v1217_v9 }
 0x64b   : > { %v1990_v11 = vpop.eup %1989 }
 0x64c   : > { %v1992_v12 = vpop.eup %1991  ;;  %v1222_v13 = vadd.f32 1.0, %v1990_v11 }
 0x64d   : > { %v1228_v48 = vadd.f32 1.0, %v1992_v12  ;;  %v1994_v59 = vpop.eup %1993 }
 0x64e   : > { %1997 = vrcp.f32 %v1222_v13  ;;  %v1996_v60 = vpop.eup %1995  ;;  %v1235_v62 = vadd.f32 1.0, %v1994_v59 }
 0x64f   : > { %1999 = vrcp.f32 %v1228_v48 }
 0x650   : > { %2001 = vrcp.f32 %v1235_v62  ;;  %v1787_v62 = vld [vmem:[%s1637_s20 + $0x70] sm:$0xff] }
 0x658   : > { %v1998_v1 = vpop.eup %1997 }
 0x659   : > { %v2000_v61 = vpop.eup %1999  ;;  %v1240_v6 = vmul.f32 %v1998_v1, %v1996_v60 }
 0x65a   : > { %v1239_v63 = vmul.f32 %v2000_v61, %v2628_v49  ;;  %v2002_v34 = vpop.eup %2001  ;;  %v2059_v49 = vld [vmem:[%s2268_s28 + $0xa0] ss:$16 sps:$4 sm:$0xff]  }
 0x65c   : > { %v2701_v33 = vadd.f32 %v1240_v6, %v1239_v63  ;;  %v1387_v63 = vunpack.c.l.bf16 %v1787_v62 }
 0x65e   : > { %2003 = vtanh.f32 %v2701_v33 }
 0x668   : > { %v2004_v36 = vpop.eup %2003 }
 0x669   : > { %v1243_v37 = vmul.f32 %v2004_v36, %v2002_v34  ;;  %v1388_v34 = vunpack.c.h.bf16 %v1787_v62 }
 0x66b   : > { %v1246_v38 = vpack.c.bf16 %v1243_v37, %v1243_v37 }
 0x66d   : > { %1777 = vst [vmem:[%s1625_s22 + $0x14] sm:$0xf] %v1246_v38  ;;  %1296 = vmatmul.mubr.bf16.vlgmr.msra.gmra.mrb[24].mxu0 %v1246_v38  ;;  %1337 = vmatmul.mubr.bf16.vlgmr.msra.gmra.mrb[24].mxu1 %v1246_v38  ;;  %v1788_v38 = vld [vmem:[%s1637_s20 + $0x78] sm:$0xff] }
 0x66e   : > { %1394 = vmatpush1.bf16.msra.mxu0 %v2635_v53  ;;  %1435 = vmatpush1.bf16.msra.mxu1 %v2639_v54  ;;  %v2064_v53 = vld [vmem:[%s2268_s28 + $0xc8] ss:$16 sps:$4 sm:$0xff]   ;;  %v2065_v54 = vld [vmem:[%s2268_s28 + $0xe4] ss:$16 sps:$4 sm:$0xff]  }
 0x66f   : > { %1395 = vmatprep.subr.bf16.mxu0 %v2643_v55  ;;  %1436 = vmatprep.subr.bf16.mxu1 %v2049_v39  ;;  %v2066_v55 = vld [vmem:[%s2268_s28 + $0xec] ss:$16 sps:$4 sm:$0xff]  }
 0x670   : > { %1425 = vmatprep.mubr.bf16.mxu0 %v2154_v0  ;;  %1466 = vmatprep.mubr.bf16.mxu1 %v2154_v0  ;;  %v2052_v0 = vld [vmem:[%s2268_s28 + $0x6c] ss:$16 sps:$4 sm:$0xff]  }
 0x672   : > { %1396 = vmatpush1.bf16.msra.mxu0 %v2650_v56  ;;  %1437 = vmatpush1.bf16.msra.mxu1 %v2654_v57  ;;  %v2067_v56 = vld [vmem:[%s2268_s28 + $0xe0] ss:$16 sps:$4 sm:$0xff]   ;;  %v2068_v57 = vld [vmem:[%s2268_s28 + $0xe8] ss:$16 sps:$4 sm:$0xff]   ;;  %s1784_s28 = smul.u32 4294967276, %s2141_s12 }
 0x673   : > { %1397 = vmatprep.subr.bf16.mxu0 %v2658_v58  ;;  %1438 = vmatprep.subr.bf16.mxu1 %v2050_v40  ;;  %v1779_v58 = vld [vmem:[%s1629_s24 + $0x60] sm:$0xff] }
 0x674   : > { %s1633_s25 = scalar_lea.vmem %s2460_s15, %s1784_s28 }
 0x676   : > { %1398 = vmatpush1.bf16.msra.mxu0 %v2663_v10  ;;  %1439 = vmatpush1.bf16.msra.mxu1 %v2051_v41  ;;  %v1257_v10 = vunpack.c.l.bf16 %v1779_v58 }
 0x677   : > { %1399 = vmatprep.subr.bf16.mxu0 %v2668_v2  ;;  %1440 = vmatprep.subr.bf16.mxu1 %v2052_v0  ;;  %v1258_v2 = vunpack.c.h.bf16 %v1779_v58 }
 0x67a   : > { %1400 = vmatpush1.bf16.msra.mxu0 %v2673_v3  ;;  %1441 = vmatpush1.bf16.msra.mxu1 %v2053_v43 }
 0x67b   : > { %1401 = vmatprep.subr.bf16.mxu0 %v2678_v4  ;;  %1442 = vmatprep.subr.bf16.mxu1 %v2054_v44 }
 0x67e   : > { %1402 = vmatpush1.bf16.msra.mxu0 %v2055_v45  ;;  %1443 = vmatpush1.bf16.msra.mxu1 %v2056_v46 }
 0x67f   : > { %1403 = vmatprep.subr.bf16.mxu0 %v2057_v35  ;;  %1444 = vmatprep.subr.bf16.mxu1 %v2058_v47  ;;  %v1390_v47 = vunpack.c.h.bf16 %v1788_v38 }
 0x682   : > { %1404 = vmatpush1.bf16.msra.mxu0 %v2059_v49  ;;  %1445 = vmatpush1.bf16.msra.mxu1 %v2060_v50  ;;  %v1389_v50 = vunpack.c.l.bf16 %v1788_v38 }
 0x683   : > { %1405 = vmatprep.subr.bf16.mxu0 %v2061_v51  ;;  %1446 = vmatprep.subr.bf16.mxu1 %v2062_v52 }
 0x686   : > { %1406 = vmatpush1.bf16.msra.mxu0 %v2063_v42  ;;  %1447 = vmatpush1.bf16.msra.mxu1 %v2064_v53 }
 0x687   : > { %1407 = vmatprep.subr.bf16.mxu0 %v2065_v54  ;;  %1448 = vmatprep.subr.bf16.mxu1 %v2066_v55 }
 0x68a   : > { %1408 = vmatpush1.bf16.msra.mxu0 %v2067_v56  ;;  %1449 = vmatpush1.bf16.msra.mxu1 %v2068_v57 }
 0x740   : > { %v1297_v3 = vpop.f32.mrb[24].mxu0  ;;  %v1338_v4 = vpop.f32.mrb[24].mxu1 }
 0x741   : > { %v1345_v14 = vadd.f32 %v1297_v3, %v1257_v10  ;;  %v1299_v16 = vpop.f32.mrb[25].mxu0  ;;  %v1340_v17 = vpop.f32.mrb[25].mxu1  ;;  %v1347_v29 = vadd.f32 %v1338_v4, %v1259_v27 }
 0x742   : > { %v1346_v18 = vadd.f32 %v1299_v16, %v1258_v2  ;;  %v1301_v19 = vpop.f32.mrb[26].mxu0  ;;  %v1342_v20 = vpop.f32.mrb[26].mxu1  ;;  %v1348_v26 = vadd.f32 %v1340_v17, %v1260_v25 }
 0x743   : > { %v1781_v21 = vmul.f32 -1.442695, %v1345_v14  ;;  %v1302_v22 = vpop.f32.mrb[27].mxu0  ;;  %v1343_v23 = vpop.f32.mrb[27].mxu1 }
 0x744   : > { %v1782_v24 = vmul.f32 -1.442695, %v1346_v18  ;;  %v1783_v28 = vmul.f32 -1.442695, %v1348_v26 }
 0x745   : > { %2005 = vpow2.f32 %v1781_v21 }
 0x746   : > { %2007 = vpow2.f32 %v1782_v24 }
 0x747   : > { %2009 = vpow2.f32 %v1783_v28 }
 0x748   : > { %2011 = vtanh.f32 %v1347_v29 }
 0x74f   : > { %v2006_v30 = vpop.eup %2005 }
 0x750   : > { %v2008_v31 = vpop.eup %2007  ;;  %v1352_v32 = vadd.f32 1.0, %v2006_v30 }
 0x751   : > { %v1358_v5 = vadd.f32 1.0, %v2008_v31  ;;  %v2010_v7 = vpop.eup %2009 }
 0x752   : > { %2013 = vrcp.f32 %v1352_v32  ;;  %v2012_v8 = vpop.eup %2011  ;;  %v1365_v13 = vadd.f32 1.0, %v2010_v7 }
 0x753   : > { %2015 = vrcp.f32 %v1358_v5 }
 0x754   : > { %2017 = vrcp.f32 %v1365_v13 }
 0x75c   : > { %v2014_v9 = vpop.eup %2013 }
 0x75d   : > { %v2016_v11 = vpop.eup %2015  ;;  %v1370_v12 = vmul.f32 %v2014_v9, %v2012_v8 }
 0x75e   : > { %v1369_v48 = vmul.f32 %v2016_v11, %v2701_v33  ;;  %v2018_v60 = vpop.eup %2017 }
 0x760   : > { %v1371_v59 = vadd.f32 %v1370_v12, %v1369_v48 }
 0x762   : > { %2019 = vtanh.f32 %v1371_v59 }
 0x76c   : > { %v2020_v1 = vpop.eup %2019 }
 0x76d   : > { %v1373_v61 = vmul.f32 %v2020_v1, %v2018_v60 }
 0x76f   : > { %v1376_v6 = vpack.c.bf16 %v1373_v61, %v1373_v61 }
 0x771   : > { %1785 = vst [vmem:[%s1633_s25 + $0x18] sm:$0xf] %v1376_v6  ;;  %1426 = vmatmul.mubr.bf16.vlgmr.msra.gmra.mrb[28].mxu0 %v1376_v6  ;;  %1467 = vmatmul.mubr.bf16.vlgmr.msra.gmra.mrb[28].mxu1 %v1376_v6 }
 0x844   : > { %v1427_v36 = vpop.f32.mrb[28].mxu0  ;;  %v1468_v37 = vpop.f32.mrb[28].mxu1 }
 0x845   : > { %v1475_v33 = vadd.f32 %v1427_v36, %v1387_v63  ;;  %v1429_v39 = vpop.f32.mrb[29].mxu0  ;;  %v1470_v40 = vpop.f32.mrb[29].mxu1  ;;  %v1477_v52 = vadd.f32 %v1468_v37, %v1389_v50 }
 0x846   : > { %v1476_v41 = vadd.f32 %v1429_v39, %v1388_v34  ;;  %v1431_v0 = vpop.f32.mrb[30].mxu0  ;;  %v1472_v43 = vpop.f32.mrb[30].mxu1  ;;  %v1478_v49 = vadd.f32 %v1470_v40, %v1390_v47 }
 0x847   : > { %v1789_v44 = vmul.f32 -1.442695, %v1475_v33  ;;  %v1432_v45 = vpop.f32.mrb[31].mxu0  ;;  %v1473_v46 = vpop.f32.mrb[31].mxu1 }
 0x848   : > { %v1790_v35 = vmul.f32 -1.442695, %v1476_v41  ;;  %v1791_v51 = vmul.f32 -1.442695, %v1478_v49 }
 0x849   : > { %2021 = vpow2.f32 %v1789_v44 }
 0x84a   : > { %2023 = vpow2.f32 %v1790_v35 }
 0x84b   : > { %2025 = vpow2.f32 %v1791_v51 }
 0x84c   : > { %2027 = vtanh.f32 %v1477_v52 }
 0x853   : > { %v2022_v42 = vpop.eup %2021 }
 0x854   : > { %v2024_v53 = vpop.eup %2023  ;;  %v1482_v54 = vadd.f32 1.0, %v2022_v42 }
 0x855   : > { %v1488_v55 = vadd.f32 1.0, %v2024_v53  ;;  %v2026_v56 = vpop.eup %2025 }
 0x856   : > { %2029 = vrcp.f32 %v1482_v54  ;;  %v2028_v57 = vpop.eup %2027  ;;  %v1495_v3 = vadd.f32 1.0, %v2026_v56 }
 0x857   : > { %2031 = vrcp.f32 %v1488_v55 }
 0x858   : > { %2033 = vrcp.f32 %v1495_v3 }
 0x860   : > { %v2030_v58 = vpop.eup %2029 }
 0x861   : > { %v2032_v10 = vpop.eup %2031  ;;  %v1500_v2 = vmul.f32 %v2030_v58, %v2028_v57 }
 0x862   : > { %v1499_v4 = vmul.f32 %v2032_v10, %v1371_v59  ;;  %v2034_v15 = vpop.eup %2033 }
 0x864   : > { %v1501_v14 = vadd.f32 %v1500_v2, %v1499_v4 }
 0x866   : > { %2035 = vtanh.f32 %v1501_v14 }
 0x870   : > { %v2036_v16 = vpop.eup %2035 }
 0x871   : > { %v1503_v17 = vmul.f32 %v2036_v16, %v2034_v15 }
 0x873   : > { %v1506_v18 = vpack.c.bf16 %v1503_v17, %v1503_v17 }
 0x875   : > { %1793 = vst [vmem:[%s1641_s27 + $0x1c] sm:$0xf] %v1506_v18 }
 0x876 PF: > { %s15_s14 = sadd.s32 1, %s2149_s14   ;;  %s2771_s9 = smov %s2133_s10 }
 0x877   : > { %p12_p9 = scmp.ge.s32.totalorder %s15_s14, 4   ;;  %s2772_s10 = smov %s2137_s11 }
 0x878   : > { %s2773_s11 = smov %s2220_s21  ;;  %s2774_s12 = smov %s2145_s13 }
 0x879   : > { %s2775_s13 = smov %s2777_s16  ;;  %14 = sbr.rel (!%p12_p9) target bundleno = 4 (0x4), region = 91 }
 0x880   :  { %1552 = vsyncpa [#allocation5], 1 }
 0x881   :  { %1554 = vsyncpa [#allocation5 + $0x1], 1 }

// kernel: bilstm_forward.3
= control target key start
LH: loop header
LB: loop body
LE: loop exit
PB: predicated region body
PF: predicated region fallthrough
CT: control target
= control target key end

     0   :  { %s2044_s9 = smov 0   ;;  %s2046_s10 = smov 0   ;;  %s2552_s0 = inlined_call_operand.vmem [shape: bf16[2,8,8,512], index: 0, kind: input, shape index: {}]   ;;  %s2553_s1 = inlined_call_operand.vmem [shape: bf16[2,128,512], index: 1, kind: input, shape index: {}]   ;;  %s2554_s2 = inlined_call_operand.vmem [shape: bf16[2,8,8,128], index: 2, kind: output, shape index: {}]  }
   0x1   :  { %s2048_s11 = smov 0  }
   0x2 LB: > { %s24_s12 = sadd.s32 1, %s2021_s10  ;;  %p1662_p0 = scmp.ge.s32.totalorder %s2025_s11, 1  ;;  %s2025_s11 = sphi %s2048_s11, %s12_s11   ;;  %s2021_s10 = sphi %s2046_s10, %s2556_s10   ;;  %s2017_s9 = sphi %s2044_s9, %s2555_s9  }
   0x3   : > { %p26_p1 = scmp.ge.s32.totalorder %s24_s12, 2  ;;  %p168_p2 = scmp.lt.s32.totalorder %s2025_s11, 3 }
   0x5   : > { %s2558_s12 = smov (%p26_p1, %s24_s12), 0  ;;  %p169_p3 = pnand %p1662_p0, %p168_p2 }
   0x6   : > { %p217_p4 = scmp.lt.s32.totalorder (!%p169_p3), %s2017_s9, 1  ;;  %v2027_v0 = vmov (!%p169_p3), 0   ;;  %v2028_v33 = vmov (!%p169_p3), 0.0|0.0   ;;  %s1766_s19 = smul.u32 (!%p169_p3), 112, %s2017_s9 }
   0x7   : > { %172 = sbr.rel (%p169_p3) target bundleno = 2132 (0x854), region = 28  ;;  %497 = vmatprep.mubr.bf16.mxu0 (!%p169_p3), %v2027_v0  ;;  %538 = vmatprep.mubr.bf16.mxu1 (!%p169_p3), %v2027_v0  ;;  %s1729_s16 = sshll.u32 (!%p169_p3), %s2017_s9, 2 }
   0x8   : > { %s1767_s25 = smul.u32 (!%p169_p3), 28, %s2017_s9 }
   0x9   : > { %s1707_s30 = smul.u32 (!%p169_p3), 80, %s2017_s9 }
   0xa   : > { %s1713_s4 = smul.u32 (!%p169_p3), 20, %s2017_s9 }
   0xb   : > { %s1715_s6 = smul.u32 (!%p169_p3), 48, %s2017_s9 }
   0xc   : > { %s1721_s8 = smul.u32 (!%p169_p3), 12, %s2017_s9 }
   0xd   : > { %s1743_s27 = smul.u32 (!%p169_p3), 4294967284, %s2017_s9 }
   0xe   : > { %s2068_s13 = scalar_select %p217_p4, %s2017_s9, 1 }
  0x10   : > { %s1764_s14 = sshll.u32 %s2068_s13, 8  ;;  %s1763_s18 = sshll.u32 %s2068_s13, 7 }
  0x11   : > { %s2074_s17 = scalar_lea.vmem %s2553_s1, %s1764_s14  ;;  %s2245_s22 = scalar_lea.vmem %s2552_s0, %s1763_s18 }
  0x12   : > { %v2077_v1 = vld [vmem:[%s2074_s17 + $0x4] ss:$16 sps:$4 sm:$0xff]   ;;  %v2080_v2 = vld [vmem:[%s2074_s17] ss:$16 sps:$4 sm:$0xff]   ;;  %v2095_v6 = vld [vmem:[%s2074_s17 + $0xc] ss:$16 sps:$4 sm:$0xff]   ;;  %s296_s23 = scalar_lea.vmem %s2245_s22, %s1766_s19  ;;  %s1567_s3 = scalar_lea.vmem %s2245_s22, %s1707_s30 }
  0x13   : > { %465 = vmatprep.subr.bf16.mxu0 %v2077_v1  ;;  %v2084_v3 = vld [vmem:[%s2074_s17 + $0x24] ss:$16 sps:$4 sm:$0xff]   ;;  %v2088_v4 = vld [vmem:[%s2074_s17 + $0x20] ss:$16 sps:$4 sm:$0xff]   ;;  %v2098_v7 = vld [vmem:[%s2074_s17 + $0x8] ss:$16 sps:$4 sm:$0xff]   ;;  %506 = vmatprep.subr.bf16.mxu1 %v2095_v6  ;;  %s1575_s7 = scalar_lea.vmem %s2245_s22, %s1715_s6 }
  0x14   : > { %466 = vmatpush1.bf16.msra.mxu0 %v2080_v2  ;;  %v2092_v5 = vld [vmem:[%s2074_s17 + $0x44] ss:$16 sps:$4 sm:$0xff]   ;;  %v2102_v8 = vld [vmem:[%s2074_s17 + $0x40] ss:$16 sps:$4 sm:$0xff]   ;;  %507 = vmatpush1.bf16.msra.mxu1 %v2098_v7  ;;  %v2111_v10 = vld [vmem:[%s2074_s17 + $0x2c] ss:$16 sps:$4 sm:$0xff]  }
  0x15   : > { %467 = vmatprep.subr.bf16.mxu0 %v2084_v3  ;;  %v2107_v9 = vld [vmem:[%s2074_s17 + $0x64] ss:$16 sps:$4 sm:$0xff]   ;;  %v2114_v11 = vld [vmem:[%s2074_s17 + $0x28] ss:$16 sps:$4 sm:$0xff]   ;;  %508 = vmatprep.subr.bf16.mxu1 %v2111_v10  ;;  %v2119_v12 = vld [vmem:[%s2074_s17 + $0x60] ss:$16 sps:$4 sm:$0xff]  }
  0x16   : > { %v2122_v13 = vld [vmem:[%s2074_s17 + $0x84] ss:$16 sps:$4 sm:$0xff]   ;;  %v2125_v14 = vld [vmem:[%s2074_s17 + $0x4c] ss:$16 sps:$4 sm:$0xff]   ;;  %v2130_v15 = vld [vmem:[%s2074_s17 + $0x48] ss:$16 sps:$4 sm:$0xff]  }
  0x17   : > { %v2134_v16 = vld [vmem:[%s2074_s17 + $0x6c] ss:$16 sps:$4 sm:$0xff]   ;;  %v2138_v17 = vld [vmem:[%s2074_s17 + $0x80] ss:$16 sps:$4 sm:$0xff]   ;;  %v2142_v18 = vld [vmem:[%s2074_s17 + $0xa4] ss:$16 sps:$4 sm:$0xff]  }
  0x18   : > { %468 = vmatpush1.bf16.msra.mxu0 %v2088_v4  ;;  %509 = vmatpush1.bf16.msra.mxu1 %v2114_v11  ;;  %v2146_v19 = vld [vmem:[%s2074_s17 + $0x68] ss:$16 sps:$4 sm:$0xff]   ;;  %v2150_v20 = vld [vmem:[%s2074_s17 + $0x8c] ss:$16 sps:$4 sm:$0xff]   ;;  %v2154_v21 = vld [vmem:[%s2074_s17 + $0xa0] ss:$16 sps:$4 sm:$0xff]  }
  0x19   : > { %469 = vmatprep.subr.bf16.mxu0 %v2092_v5  ;;  %510 = vmatprep.subr.bf16.mxu1 %v2125_v14  ;;  %v2157_v22 = vld [vmem:[%s2074_s17 + $0xc4] ss:$16 sps:$4 sm:$0xff]   ;;  %v2162_v23 = vld [vmem:[%s2074_s17 + $0x88] ss:$16 sps:$4 sm:$0xff]   ;;  %v2166_v24 = vld [vmem:[%s2074_s17 + $0xac] ss:$16 sps:$4 sm:$0xff]  }
  0x1a   : > { %v2170_v25 = vld [vmem:[%s2074_s17 + $0xc0] ss:$16 sps:$4 sm:$0xff]   ;;  %v2174_v26 = vld [vmem:[%s2074_s17 + $0xe4] ss:$16 sps:$4 sm:$0xff]   ;;  %v2178_v27 = vld [vmem:[%s2074_s17 + $0xa8] ss:$16 sps:$4 sm:$0xff]  }
  0x1b   : > { %v2182_v28 = vld [vmem:[%s2074_s17 + $0xcc] ss:$16 sps:$4 sm:$0xff]   ;;  %v2186_v29 = vld [vmem:[%s2074_s17 + $0xe0] ss:$16 sps:$4 sm:$0xff]   ;;  %v2191_v30 = vld [vmem:[%s2074_s17 + $0xc8] ss:$16 sps:$4 sm:$0xff]  }
  0x1c   : > { %470 = vmatpush1.bf16.msra.mxu0 %v2102_v8  ;;  %511 = vmatpush1.bf16.msra.mxu1 %v2130_v15  ;;  %v2195_v31 = vld [vmem:[%s2074_s17 + $0xec] ss:$16 sps:$4 sm:$0xff]   ;;  %v2200_v32 = vld [vmem:[%s2074_s17 + $0xe8] ss:$16 sps:$4 sm:$0xff]   ;;  %v297_v34 = vld [vmem:[%s296_s23] sm:$0xff]  ;;  %s1765_s24 = sshll.u32 %s2068_s13, 5 }
  0x1d   : > { %471 = vmatprep.subr.bf16.mxu0 %v2107_v9  ;;  %512 = vmatprep.subr.bf16.mxu1 %v2134_v16  ;;  %v299_v35 = vunpack.c.l.bf16 %v297_v34  ;;  %v300_v36 = vunpack.c.h.bf16 %v297_v34  ;;  %v298_v38 = vld [vmem:[%s296_s23 + $0x8] sm:$0xff]  ;;  %s2256_s28 = scalar_lea.vmem %s2554_s2, %s1765_s24  ;;  %s1723_s14 = sshll.u32 %s2017_s9, 4 }
  0x1e   : > { %v302_v45 = vunpack.c.h.bf16 %v298_v38  ;;  %v301_v51 = vunpack.c.l.bf16 %v298_v38  ;;  %s580_s29 = scalar_lea.vmem %s2256_s28, %s1767_s25  ;;  %s1571_s5 = scalar_lea.vmem %s2256_s28, %s1713_s4 }
  0x1f   : > { %s1579_s13 = scalar_lea.vmem %s2256_s28, %s1721_s8  ;;  %s1582_s15 = scalar_lea.vmem %s2245_s22, %s1723_s14 }
  0x20   : > { %472 = vmatpush1.bf16.msra.mxu0 %v2119_v12  ;;  %513 = vmatpush1.bf16.msra.mxu1 %v2146_v19  ;;  %s1585_s18 = scalar_lea.vmem %s2256_s28, %s1729_s16  ;;  %s971_s19 = ssub.s32 4, %s2017_s9 }
  0x21   : > { %473 = vmatprep.subr.bf16.mxu0 %v2122_v13  ;;  %514 = vmatprep.subr.bf16.mxu1 %v2150_v20  ;;  %s1768_s20 = sshll.u32 %s971_s19, 4  ;;  %s1736_s23 = sshll.u32 %s971_s19, 2 }
  0x22   : > { %s974_s21 = scalar_lea.vmem %s2245_s22, %s1768_s20  ;;  %s1098_s24 = scalar_lea.vmem %s2256_s28, %s1736_s23 }
  0x23   : > { %s1737_s25 = smul.u32 4294967248, %s2017_s9 }
  0x24   : > { %474 = vmatpush1.bf16.msra.mxu0 %v2138_v17  ;;  %515 = vmatpush1.bf16.msra.mxu1 %v2162_v23  ;;  %s1745_s30 = smul.u32 4294967216, %s2017_s9 }
  0x25   : > { %475 = vmatprep.subr.bf16.mxu0 %v2142_v18  ;;  %516 = vmatprep.subr.bf16.mxu1 %v2166_v24  ;;  %s1593_s26 = scalar_lea.vmem %s2245_s22, %s1737_s25 }
  0x28   : > { %476 = vmatpush1.bf16.msra.mxu0 %v2154_v21  ;;  %517 = vmatpush1.bf16.msra.mxu1 %v2178_v27 }
  0x29   : > { %477 = vmatprep.subr.bf16.mxu0 %v2157_v22  ;;  %518 = vmatprep.subr.bf16.mxu1 %v2182_v28 }
  0x2c   : > { %478 = vmatpush1.bf16.msra.mxu0 %v2170_v25  ;;  %519 = vmatpush1.bf16.msra.mxu1 %v2191_v30 }
  0x2d   : > { %479 = vmatprep.subr.bf16.mxu0 %v2174_v26  ;;  %520 = vmatprep.subr.bf16.mxu1 %v2195_v31 }
  0x30   : > { %480 = vmatpush1.bf16.msra.mxu0 %v2186_v29  ;;  %521 = vmatpush1.bf16.msra.mxu1 %v2200_v32 }
  0x31   : > { %595 = vmatprep.subr.bf16.mxu0 %v2077_v1  ;;  %636 = vmatprep.subr.bf16.mxu1 %v2095_v6 }
  0x33   : > { %498 = vmatmul.mubr.bf16.vlgmr.msra.gmra.mrb[0].mxu0 %v2028_v33  ;;  %539 = vmatmul.mubr.bf16.vlgmr.msra.gmra.mrb[0].mxu1 %v2028_v33 }
  0x34   : > { %596 = vmatpush1.bf16.msra.mxu0 %v2080_v2  ;;  %627 = vmatprep.mubr.bf16.mxu0 %v2027_v0 }
  0x35   : > { %597 = vmatprep.subr.bf16.mxu0 %v2084_v3  ;;  %637 = vmatpush1.bf16.msra.mxu1 %v2098_v7 }
  0x36   : > { %638 = vmatprep.subr.bf16.mxu1 %v2111_v10  ;;  %668 = vmatprep.mubr.bf16.mxu1 %v2027_v0 }
  0x38   : > { %598 = vmatpush1.bf16.msra.mxu0 %v2088_v4 }
  0x39   : > { %599 = vmatprep.subr.bf16.mxu0 %v2092_v5  ;;  %639 = vmatpush1.bf16.msra.mxu1 %v2114_v11 }
  0x3a   : > { %640 = vmatprep.subr.bf16.mxu1 %v2125_v14 }
  0x3c   : > { %600 = vmatpush1.bf16.msra.mxu0 %v2102_v8 }
  0x3d   : > { %601 = vmatprep.subr.bf16.mxu0 %v2107_v9  ;;  %641 = vmatpush1.bf16.msra.mxu1 %v2130_v15 }
  0x3e   : > { %642 = vmatprep.subr.bf16.mxu1 %v2134_v16 }
  0x40   : > { %602 = vmatpush1.bf16.msra.mxu0 %v2119_v12 }
  0x41   : > { %603 = vmatprep.subr.bf16.mxu0 %v2122_v13  ;;  %643 = vmatpush1.bf16.msra.mxu1 %v2146_v19 }
  0x42   : > { %644 = vmatprep.subr.bf16.mxu1 %v2150_v20 }
  0x44   : > { %604 = vmatpush1.bf16.msra.mxu0 %v2138_v17 }
  0x45   : > { %605 = vmatprep.subr.bf16.mxu0 %v2142_v18  ;;  %645 = vmatpush1.bf16.msra.mxu1 %v2162_v23 }
  0x46   : > { %646 = vmatprep.subr.bf16.mxu1 %v2166_v24 }
  0x48   : > { %606 = vmatpush1.bf16.msra.mxu0 %v2154_v21 }
  0x49   : > { %607 = vmatprep.subr.bf16.mxu0 %v2157_v22  ;;  %647 = vmatpush1.bf16.msra.mxu1 %v2178_v27 }
  0x4a   : > { %648 = vmatprep.subr.bf16.mxu1 %v2182_v28 }
  0x4c   : > { %608 = vmatpush1.bf16.msra.mxu0 %v2170_v25 }
  0x4d   : > { %609 = vmatprep.subr.bf16.mxu0 %v2174_v26  ;;  %649 = vmatpush1.bf16.msra.mxu1 %v2191_v30 }
  0x4e   : > { %650 = vmatprep.subr.bf16.mxu1 %v2195_v31 }
  0x50   : > { %610 = vmatpush1.bf16.msra.mxu0 %v2186_v29 }
  0x51   : > { %725 = vmatprep.subr.bf16.mxu0 %v2077_v1  ;;  %651 = vmatpush1.bf16.msra.mxu1 %v2200_v32 }
  0x52   : > { %766 = vmatprep.subr.bf16.mxu1 %v2095_v6 }
 0x106   : > { %v499_v37 = vpop.f32.mrb[0].mxu0  ;;  %v540_v47 = vpop.f32.mrb[0].mxu1 }
 0x107   : > { %v547_v39 = vadd.f32 %v499_v37, %v299_v35  ;;  %v501_v40 = vpop.f32.mrb[1].mxu0  ;;  %v542_v48 = vpop.f32.mrb[1].mxu1  ;;  %v549_v54 = vadd.f32 %v540_v47, %v301_v51 }
 0x108   : > { %v548_v41 = vadd.f32 %v501_v40, %v300_v36  ;;  %v503_v42 = vpop.f32.mrb[2].mxu0  ;;  %v550_v49 = vadd.f32 %v542_v48, %v302_v45  ;;  %v544_v50 = vpop.f32.mrb[2].mxu1  ;;  %v1708_v40 = vld [vmem:[%s1567_s3 + $0x10] sm:$0xff] }
 0x109   : > { %v1703_v43 = vmul.f32 -1.442695, %v547_v39  ;;  %v504_v44 = vpop.f32.mrb[3].mxu0  ;;  %v545_v52 = vpop.f32.mrb[3].mxu1  ;;  %v590_v42 = vunpack.c.h.bf16 %v1708_v40 }
 0x10a   : > { %v1704_v46 = vmul.f32 -1.442695, %v548_v41  ;;  %v1705_v53 = vmul.f32 -1.442695, %v550_v49  ;;  %v589_v41 = vunpack.c.l.bf16 %v1708_v40 }
 0x10b   : > { %1843 = vpow2.f32 %v1703_v43 }
 0x10c   : > { %1845 = vpow2.f32 %v1704_v46  ;;  %v1709_v46 = vld [vmem:[%s1567_s3 + $0x18] sm:$0xff]  ;;  %s1601_s3 = scalar_lea.vmem %s2245_s22, %s1745_s30 }
 0x10d   : > { %1847 = vpow2.f32 %v1705_v53 }
 0x10e   : > { %1849 = vtanh.f32 %v549_v54 }
 0x115   : > { %v1844_v55 = vpop.eup %1843 }
 0x116   : > { %v1846_v56 = vpop.eup %1845  ;;  %v554_v57 = vadd.f32 1.0, %v1844_v55 }
 0x117   : > { %v560_v58 = vadd.f32 1.0, %v1846_v56  ;;  %v1848_v59 = vpop.eup %1847  ;;  %v592_v56 = vunpack.c.h.bf16 %v1709_v46 }
 0x118   : > { %1851 = vrcp.f32 %v554_v57  ;;  %v1850_v60 = vpop.eup %1849  ;;  %v567_v62 = vadd.f32 1.0, %v1848_v59 }
 0x119   : > { %1853 = vrcp.f32 %v560_v58  ;;  %v591_v58 = vunpack.c.l.bf16 %v1709_v46 }
 0x11a   : > { %1855 = vrcp.f32 %v567_v62 }
 0x122   : > { %v1852_v61 = vpop.eup %1851 }
 0x123   : > { %v1854_v63 = vpop.eup %1853  ;;  %v572_v33 = vmul.f32 %v1852_v61, %v1850_v60 }
 0x124   : > { %v571_v34 = vmul.f32 0.0, %v1854_v63  ;;  %v1856_v36 = vpop.eup %1855 }
 0x126   : > { %v2248_v35 = vadd.f32 %v572_v33, %v571_v34 }
 0x128   : > { %1857 = vtanh.f32 %v2248_v35 }
 0x132   : > { %v1858_v37 = vpop.eup %1857 }
 0x133   : > { %v575_v38 = vmul.f32 %v1858_v37, %v1856_v36 }
 0x135   : > { %v578_v39 = vpack.c.bf16 %v575_v38, %v575_v38 }
 0x137   : > { %581 = vst [vmem:[%s580_s29] sm:$0xf] %v578_v39  ;;  %628 = vmatmul.mubr.bf16.vlgmr.msra.gmra.mrb[4].mxu0 %v578_v39  ;;  %669 = vmatmul.mubr.bf16.vlgmr.msra.gmra.mrb[4].mxu1 %v578_v39  ;;  %s1597_s29 = scalar_lea.vmem %s2256_s28, %s1743_s27 }
 0x138   : > { %726 = vmatpush1.bf16.msra.mxu0 %v2080_v2  ;;  %767 = vmatpush1.bf16.msra.mxu1 %v2098_v7 }
 0x139   : > { %727 = vmatprep.subr.bf16.mxu0 %v2084_v3  ;;  %768 = vmatprep.subr.bf16.mxu1 %v2111_v10 }
 0x13a   : > { %757 = vmatprep.mubr.bf16.mxu0 %v2027_v0  ;;  %798 = vmatprep.mubr.bf16.mxu1 %v2027_v0 }
 0x13c   : > { %728 = vmatpush1.bf16.msra.mxu0 %v2088_v4  ;;  %769 = vmatpush1.bf16.msra.mxu1 %v2114_v11 }
 0x13d   : > { %729 = vmatprep.subr.bf16.mxu0 %v2092_v5  ;;  %770 = vmatprep.subr.bf16.mxu1 %v2125_v14 }
 0x140   : > { %730 = vmatpush1.bf16.msra.mxu0 %v2102_v8  ;;  %771 = vmatpush1.bf16.msra.mxu1 %v2130_v15 }
 0x141   : > { %731 = vmatprep.subr.bf16.mxu0 %v2107_v9  ;;  %772 = vmatprep.subr.bf16.mxu1 %v2134_v16 }
 0x144   : > { %732 = vmatpush1.bf16.msra.mxu0 %v2119_v12  ;;  %773 = vmatpush1.bf16.msra.mxu1 %v2146_v19 }
 0x145   : > { %733 = vmatprep.subr.bf16.mxu0 %v2122_v13  ;;  %774 = vmatprep.subr.bf16.mxu1 %v2150_v20 }
 0x148   : > { %734 = vmatpush1.bf16.msra.mxu0 %v2138_v17  ;;  %775 = vmatpush1.bf16.msra.mxu1 %v2162_v23 }
 0x149   : > { %735 = vmatprep.subr.bf16.mxu0 %v2142_v18  ;;  %776 = vmatprep.subr.bf16.mxu1 %v2166_v24 }
 0x14c   : > { %736 = vmatpush1.bf16.msra.mxu0 %v2154_v21  ;;  %777 = vmatpush1.bf16.msra.mxu1 %v2178_v27 }
 0x14d   : > { %737 = vmatprep.subr.bf16.mxu0 %v2157_v22  ;;  %778 = vmatprep.subr.bf16.mxu1 %v2182_v28 }
 0x150   : > { %738 = vmatpush1.bf16.msra.mxu0 %v2170_v25  ;;  %779 = vmatpush1.bf16.msra.mxu1 %v2191_v30 }
 0x151   : > { %739 = vmatprep.subr.bf16.mxu0 %v2174_v26  ;;  %780 = vmatprep.subr.bf16.mxu1 %v2195_v31 }
 0x154   : > { %740 = vmatpush1.bf16.msra.mxu0 %v2186_v29  ;;  %781 = vmatpush1.bf16.msra.mxu1 %v2200_v32 }
 0x155   : > { %854 = vmatprep.subr.bf16.mxu0 %v2077_v1  ;;  %895 = vmatprep.subr.bf16.mxu1 %v2095_v6 }
 0x20a   : > { %v629_v43 = vpop.f32.mrb[4].mxu0  ;;  %v670_v44 = vpop.f32.mrb[4].mxu1 }
 0x20b   : > { %v677_v45 = vadd.f32 %v629_v43, %v589_v41  ;;  %v631_v47 = vpop.f32.mrb[5].mxu0  ;;  %v672_v48 = vpop.f32.mrb[5].mxu1  ;;  %v679_v60 = vadd.f32 %v670_v44, %v591_v58 }
 0x20c   : > { %v678_v49 = vadd.f32 %v631_v47, %v590_v42  ;;  %v633_v50 = vpop.f32.mrb[6].mxu0  ;;  %v674_v51 = vpop.f32.mrb[6].mxu1  ;;  %v680_v57 = vadd.f32 %v672_v48, %v592_v56 }
 0x20d   : > { %v1710_v52 = vmul.f32 -1.442695, %v677_v45  ;;  %v634_v53 = vpop.f32.mrb[7].mxu0  ;;  %v675_v54 = vpop.f32.mrb[7].mxu1 }
 0x20e   : > { %v1711_v55 = vmul.f32 -1.442695, %v678_v49  ;;  %v1712_v59 = vmul.f32 -1.442695, %v680_v57 }
 0x20f   : > { %1859 = vpow2.f32 %v1710_v52  ;;  %v1717_v52 = vld [vmem:[%s1575_s7 + $0x28] sm:$0xff] }
 0x210   : > { %1861 = vpow2.f32 %v1711_v55 }
 0x211   : > { %1863 = vpow2.f32 %v1712_v59 }
 0x212   : > { %1865 = vtanh.f32 %v679_v60 }
 0x219   : > { %v1860_v61 = vpop.eup %1859 }
 0x21a   : > { %v1862_v62 = vpop.eup %1861  ;;  %v684_v63 = vadd.f32 1.0, %v1860_v61 }
 0x21b   : > { %v690_v33 = vadd.f32 1.0, %v1862_v62  ;;  %v1864_v34 = vpop.eup %1863  ;;  %v722_v62 = vunpack.c.h.bf16 %v1717_v52 }
 0x21c   : > { %1867 = vrcp.f32 %v684_v63  ;;  %v1866_v36 = vpop.eup %1865  ;;  %v697_v40 = vadd.f32 1.0, %v1864_v34 }
 0x21d   : > { %1869 = vrcp.f32 %v690_v33  ;;  %v721_v33 = vunpack.c.l.bf16 %v1717_v52 }
 0x21e   : > { %1871 = vrcp.f32 %v697_v40 }
 0x226   : > { %v1868_v37 = vpop.eup %1867 }
 0x227   : > { %v1870_v38 = vpop.eup %1869  ;;  %v702_v39 = vmul.f32 %v1868_v37, %v1866_v36 }
 0x228   : > { %v701_v41 = vmul.f32 %v1870_v38, %v2248_v35  ;;  %v1872_v43 = vpop.eup %1871  ;;  %v1716_v35 = vld [vmem:[%s1575_s7 + $0x20] sm:$0xff] }
 0x229   : > { %v719_v47 = vunpack.c.l.bf16 %v1716_v35  ;;  %v720_v48 = vunpack.c.h.bf16 %v1716_v35 }
 0x22a   : > { %v2296_v42 = vadd.f32 %v702_v39, %v701_v41 }
 0x22c   : > { %1873 = vtanh.f32 %v2296_v42 }
 0x236   : > { %v1874_v44 = vpop.eup %1873 }
 0x237   : > { %v705_v45 = vmul.f32 %v1874_v44, %v1872_v43 }
 0x239   : > { %v708_v46 = vpack.c.bf16 %v705_v45, %v705_v45 }
 0x23b   : > { %1714 = vst [vmem:[%s1571_s5 + $0x4] sm:$0xf] %v708_v46  ;;  %758 = vmatmul.mubr.bf16.vlgmr.msra.gmra.mrb[8].mxu0 %v708_v46  ;;  %799 = vmatmul.mubr.bf16.vlgmr.msra.gmra.mrb[8].mxu1 %v708_v46  ;;  %s1753_s5 = smul.u32 4294967184, %s2017_s9 }
 0x23c   : > { %855 = vmatpush1.bf16.msra.mxu0 %v2080_v2  ;;  %896 = vmatpush1.bf16.msra.mxu1 %v2098_v7 }
 0x23d   : > { %856 = vmatprep.subr.bf16.mxu0 %v2084_v3  ;;  %897 = vmatprep.subr.bf16.mxu1 %v2111_v10  ;;  %s1609_s6 = scalar_lea.vmem %s2245_s22, %s1753_s5  ;;  %s1759_s22 = smul.u32 4294967268, %s2017_s9 }
 0x23e   : > { %886 = vmatprep.mubr.bf16.mxu0 %v2027_v0  ;;  %927 = vmatprep.mubr.bf16.mxu1 %v2027_v0 }
 0x23f   : > { %s1613_s7 = scalar_lea.vmem %s2256_s28, %s1759_s22 }
 0x240   : > { %857 = vmatpush1.bf16.msra.mxu0 %v2088_v4  ;;  %898 = vmatpush1.bf16.msra.mxu1 %v2114_v11 }
 0x241   : > { %858 = vmatprep.subr.bf16.mxu0 %v2092_v5  ;;  %899 = vmatprep.subr.bf16.mxu1 %v2125_v14 }
 0x244   : > { %859 = vmatpush1.bf16.msra.mxu0 %v2102_v8  ;;  %900 = vmatpush1.bf16.msra.mxu1 %v2130_v15 }
 0x245   : > { %860 = vmatprep.subr.bf16.mxu0 %v2107_v9  ;;  %901 = vmatprep.subr.bf16.mxu1 %v2134_v16 }
 0x248   : > { %861 = vmatpush1.bf16.msra.mxu0 %v2119_v12  ;;  %902 = vmatpush1.bf16.msra.mxu1 %v2146_v19 }
 0x249   : > { %862 = vmatprep.subr.bf16.mxu0 %v2122_v13  ;;  %903 = vmatprep.subr.bf16.mxu1 %v2150_v20 }
 0x24c   : > { %863 = vmatpush1.bf16.msra.mxu0 %v2138_v17  ;;  %904 = vmatpush1.bf16.msra.mxu1 %v2162_v23 }
 0x24d   : > { %864 = vmatprep.subr.bf16.mxu0 %v2142_v18  ;;  %905 = vmatprep.subr.bf16.mxu1 %v2166_v24 }
 0x250   : > { %865 = vmatpush1.bf16.msra.mxu0 %v2154_v21  ;;  %906 = vmatpush1.bf16.msra.mxu1 %v2178_v27 }
 0x251   : > { %866 = vmatprep.subr.bf16.mxu0 %v2157_v22  ;;  %907 = vmatprep.subr.bf16.mxu1 %v2182_v28 }
 0x254   : > { %867 = vmatpush1.bf16.msra.mxu0 %v2170_v25  ;;  %908 = vmatpush1.bf16.msra.mxu1 %v2191_v30 }
 0x255   : > { %868 = vmatprep.subr.bf16.mxu0 %v2174_v26  ;;  %909 = vmatprep.subr.bf16.mxu1 %v2195_v31 }
 0x258   : > { %869 = vmatpush1.bf16.msra.mxu0 %v2186_v29  ;;  %910 = vmatpush1.bf16.msra.mxu1 %v2200_v32 }
 0x259   : > { %983 = vmatprep.subr.bf16.mxu0 %v2077_v1  ;;  %1024 = vmatprep.subr.bf16.mxu1 %v2095_v6 }
 0x30e   : > { %v759_v49 = vpop.f32.mrb[8].mxu0  ;;  %v800_v50 = vpop.f32.mrb[8].mxu1 }
 0x30f   : > { %v807_v51 = vadd.f32 %v759_v49, %v719_v47  ;;  %v761_v53 = vpop.f32.mrb[9].mxu0  ;;  %v802_v54 = vpop.f32.mrb[9].mxu1  ;;  %v809_v36 = vadd.f32 %v800_v50, %v721_v33 }
 0x310   : > { %v808_v55 = vadd.f32 %v761_v53, %v720_v48  ;;  %v763_v56 = vpop.f32.mrb[10].mxu0  ;;  %v804_v57 = vpop.f32.mrb[10].mxu1  ;;  %v810_v63 = vadd.f32 %v802_v54, %v722_v62 }
 0x311   : > { %v1718_v58 = vmul.f32 -1.442695, %v807_v51  ;;  %v764_v59 = vpop.f32.mrb[11].mxu0  ;;  %v805_v60 = vpop.f32.mrb[11].mxu1 }
 0x312   : > { %v1719_v61 = vmul.f32 -1.442695, %v808_v55  ;;  %v1720_v34 = vmul.f32 -1.442695, %v810_v63 }
 0x313   : > { %1875 = vpow2.f32 %v1718_v58  ;;  %v1725_v58 = vld [vmem:[%s1582_s15 + $0x38] sm:$0xff] }
 0x314   : > { %1877 = vpow2.f32 %v1719_v61 }
 0x315   : > { %1879 = vpow2.f32 %v1720_v34 }
 0x316   : > { %1881 = vtanh.f32 %v809_v36 }
 0x31d   : > { %v1876_v37 = vpop.eup %1875 }
 0x31e   : > { %v1878_v38 = vpop.eup %1877  ;;  %v814_v39 = vadd.f32 1.0, %v1876_v37 }
 0x31f   : > { %v820_v40 = vadd.f32 1.0, %v1878_v38  ;;  %v1880_v41 = vpop.eup %1879  ;;  %v851_v38 = vunpack.c.h.bf16 %v1725_v58 }
 0x320   : > { %1883 = vrcp.f32 %v814_v39  ;;  %v1882_v43 = vpop.eup %1881  ;;  %v827_v35 = vadd.f32 1.0, %v1880_v41 }
 0x321   : > { %1885 = vrcp.f32 %v820_v40  ;;  %v850_v40 = vunpack.c.l.bf16 %v1725_v58 }
 0x322   : > { %1887 = vrcp.f32 %v827_v35 }
 0x32a   : > { %v1884_v44 = vpop.eup %1883 }
 0x32b   : > { %v1886_v45 = vpop.eup %1885  ;;  %v832_v46 = vmul.f32 %v1884_v44, %v1882_v43 }
 0x32c   : > { %v831_v47 = vmul.f32 %v1886_v45, %v2296_v42  ;;  %v1888_v49 = vpop.eup %1887  ;;  %v1724_v42 = vld [vmem:[%s1582_s15 + $0x30] sm:$0xff] }
 0x32d   : > { %v848_v53 = vunpack.c.l.bf16 %v1724_v42  ;;  %v849_v54 = vunpack.c.h.bf16 %v1724_v42 }
 0x32e   : > { %v2338_v48 = vadd.f32 %v832_v46, %v831_v47 }
 0x330   : > { %1889 = vtanh.f32 %v2338_v48 }
 0x33a   : > { %v1890_v50 = vpop.eup %1889 }
 0x33b   : > { %v835_v51 = vmul.f32 %v1890_v50, %v1888_v49 }
 0x33d   : > { %v838_v52 = vpack.c.bf16 %v835_v51, %v835_v51 }
 0x33f   : > { %1722 = vst [vmem:[%s1579_s13 + $0x8] sm:$0xf] %v838_v52  ;;  %887 = vmatmul.mubr.bf16.vlgmr.msra.gmra.mrb[12].mxu0 %v838_v52  ;;  %928 = vmatmul.mubr.bf16.vlgmr.msra.gmra.mrb[12].mxu1 %v838_v52 }
 0x340   : > { %984 = vmatpush1.bf16.msra.mxu0 %v2080_v2  ;;  %1025 = vmatpush1.bf16.msra.mxu1 %v2098_v7 }
 0x341   : > { %985 = vmatprep.subr.bf16.mxu0 %v2084_v3  ;;  %1026 = vmatprep.subr.bf16.mxu1 %v2111_v10 }
 0x342   : > { %1015 = vmatprep.mubr.bf16.mxu0 %v2027_v0  ;;  %1056 = vmatprep.mubr.bf16.mxu1 %v2027_v0 }
 0x344   : > { %986 = vmatpush1.bf16.msra.mxu0 %v2088_v4  ;;  %1027 = vmatpush1.bf16.msra.mxu1 %v2114_v11 }
 0x345   : > { %987 = vmatprep.subr.bf16.mxu0 %v2092_v5  ;;  %1028 = vmatprep.subr.bf16.mxu1 %v2125_v14 }
 0x348   : > { %988 = vmatpush1.bf16.msra.mxu0 %v2102_v8  ;;  %1029 = vmatpush1.bf16.msra.mxu1 %v2130_v15 }
 0x349   : > { %989 = vmatprep.subr.bf16.mxu0 %v2107_v9  ;;  %1030 = vmatprep.subr.bf16.mxu1 %v2134_v16 }
 0x34c   : > { %990 = vmatpush1.bf16.msra.mxu0 %v2119_v12  ;;  %1031 = vmatpush1.bf16.msra.mxu1 %v2146_v19 }
 0x34d   : > { %991 = vmatprep.subr.bf16.mxu0 %v2122_v13  ;;  %1032 = vmatprep.subr.bf16.mxu1 %v2150_v20 }
 0x350   : > { %992 = vmatpush1.bf16.msra.mxu0 %v2138_v17  ;;  %1033 = vmatpush1.bf16.msra.mxu1 %v2162_v23 }
 0x351   : > { %993 = vmatprep.subr.bf16.mxu0 %v2142_v18  ;;  %1034 = vmatprep.subr.bf16.mxu1 %v2166_v24 }
 0x354   : > { %994 = vmatpush1.bf16.msra.mxu0 %v2154_v21  ;;  %1035 = vmatpush1.bf16.msra.mxu1 %v2178_v27 }
 0x355   : > { %995 = vmatprep.subr.bf16.mxu0 %v2157_v22  ;;  %1036 = vmatprep.subr.bf16.mxu1 %v2182_v28 }
 0x358   : > { %996 = vmatpush1.bf16.msra.mxu0 %v2170_v25  ;;  %1037 = vmatpush1.bf16.msra.mxu1 %v2191_v30 }
 0x359   : > { %997 = vmatprep.subr.bf16.mxu0 %v2174_v26  ;;  %1038 = vmatprep.subr.bf16.mxu1 %v2195_v31 }
 0x35c   : > { %998 = vmatpush1.bf16.msra.mxu0 %v2186_v29  ;;  %1039 = vmatpush1.bf16.msra.mxu1 %v2200_v32 }
 0x35d   : > { %1113 = vmatprep.subr.bf16.mxu0 %v2077_v1  ;;  %1154 = vmatprep.subr.bf16.mxu1 %v2095_v6 }
 0x412   : > { %v888_v55 = vpop.f32.mrb[12].mxu0  ;;  %v929_v56 = vpop.f32.mrb[12].mxu1 }
 0x413   : > { %v936_v57 = vadd.f32 %v888_v55, %v848_v53  ;;  %v890_v59 = vpop.f32.mrb[13].mxu0  ;;  %v931_v60 = vpop.f32.mrb[13].mxu1  ;;  %v938_v43 = vadd.f32 %v929_v56, %v850_v40 }
 0x414   : > { %v937_v61 = vadd.f32 %v890_v59, %v849_v54  ;;  %v892_v62 = vpop.f32.mrb[14].mxu0  ;;  %v933_v63 = vpop.f32.mrb[14].mxu1  ;;  %v939_v39 = vadd.f32 %v931_v60, %v851_v38 }
 0x415   : > { %v1726_v33 = vmul.f32 -1.442695, %v936_v57  ;;  %v893_v34 = vpop.f32.mrb[15].mxu0  ;;  %v934_v36 = vpop.f32.mrb[15].mxu1 }
 0x416   : > { %v1727_v37 = vmul.f32 -1.442695, %v937_v61  ;;  %v1728_v41 = vmul.f32 -1.442695, %v939_v39 }
 0x417   : > { %1891 = vpow2.f32 %v1726_v33 }
 0x418   : > { %1893 = vpow2.f32 %v1727_v37 }
 0x419   : > { %1895 = vpow2.f32 %v1728_v41 }
 0x41a   : > { %1897 = vtanh.f32 %v938_v43 }
 0x421   : > { %v1892_v44 = vpop.eup %1891 }
 0x422   : > { %v1894_v45 = vpop.eup %1893  ;;  %v943_v46 = vadd.f32 1.0, %v1892_v44 }
 0x423   : > { %v949_v35 = vadd.f32 1.0, %v1894_v45  ;;  %v1896_v47 = vpop.eup %1895 }
 0x424   : > { %1899 = vrcp.f32 %v943_v46  ;;  %v1898_v49 = vpop.eup %1897  ;;  %v956_v42 = vadd.f32 1.0, %v1896_v47 }
 0x425   : > { %1901 = vrcp.f32 %v949_v35 }
 0x426   : > { %1903 = vrcp.f32 %v956_v42 }
 0x42e   : > { %v1900_v50 = vpop.eup %1899 }
 0x42f   : > { %v1902_v51 = vpop.eup %1901  ;;  %v961_v52 = vmul.f32 %v1900_v50, %v1898_v49 }
 0x430   : > { %v960_v53 = vmul.f32 %v1902_v51, %v2338_v48  ;;  %v1904_v55 = vpop.eup %1903 }
 0x432   : > { %v2380_v54 = vadd.f32 %v961_v52, %v960_v53  ;;  %v2431_v53 = vld [vmem:[%s2074_s17] ss:$16 sps:$4 sm:$0xff]  }
 0x434   : > { %1905 = vtanh.f32 %v2380_v54 }
 0x43e   : > { %v1906_v56 = vpop.eup %1905 }
 0x43f   : > { %v964_v57 = vmul.f32 %v1906_v56, %v1904_v55  ;;  %v2439_v55 = vld [vmem:[%s2074_s17 + $0x24] ss:$16 sps:$4 sm:$0xff]   ;;  %v2446_v56 = vld [vmem:[%s2074_s17 + $0x20] ss:$16 sps:$4 sm:$0xff]  }
 0x441   : > { %v967_v58 = vpack.c.bf16 %v964_v57, %v964_v57  ;;  %v2450_v57 = vld [vmem:[%s2074_s17 + $0x28] ss:$16 sps:$4 sm:$0xff]  }
 0x443   : > { %1730 = vst [vmem:[%s1585_s18 + $0xc] sm:$0xf] %v967_v58  ;;  %1016 = vmatmul.mubr.bf16.vlgmr.msra.gmra.mrb[16].mxu0 %v967_v58  ;;  %1057 = vmatmul.mubr.bf16.vlgmr.msra.gmra.mrb[16].mxu1 %v967_v58  ;;  %v2454_v58 = vld [vmem:[%s2074_s17 + $0x44] ss:$16 sps:$4 sm:$0xff]  }
 0x444   : > { %1114 = vmatpush1.bf16.msra.mxu0 %v2080_v2  ;;  %1155 = vmatpush1.bf16.msra.mxu1 %v2098_v7  ;;  %v975_v2 = vld [vmem:[%s974_s21] sm:$0xff] }
 0x445   : > { %1115 = vmatprep.subr.bf16.mxu0 %v2084_v3  ;;  %1156 = vmatprep.subr.bf16.mxu1 %v2111_v10  ;;  %v977_v3 = vunpack.c.l.bf16 %v975_v2 }
 0x446   : > { %1145 = vmatprep.mubr.bf16.mxu0 %v2027_v0  ;;  %1186 = vmatprep.mubr.bf16.mxu1 %v2027_v0 }
 0x448   : > { %1116 = vmatpush1.bf16.msra.mxu0 %v2088_v4  ;;  %1157 = vmatpush1.bf16.msra.mxu1 %v2114_v11  ;;  %v978_v4 = vunpack.c.h.bf16 %v975_v2  ;;  %v2464_v2 = vld [vmem:[%s2074_s17 + $0x64] ss:$16 sps:$4 sm:$0xff]  }
 0x449   : > { %1117 = vmatprep.subr.bf16.mxu0 %v2092_v5  ;;  %1158 = vmatprep.subr.bf16.mxu1 %v2125_v14 }
 0x44c   : > { %1118 = vmatpush1.bf16.msra.mxu0 %v2102_v8  ;;  %1159 = vmatpush1.bf16.msra.mxu1 %v2130_v15 }
 0x44d   : > { %1119 = vmatprep.subr.bf16.mxu0 %v2107_v9  ;;  %1160 = vmatprep.subr.bf16.mxu1 %v2134_v16  ;;  %v976_v9 = vld [vmem:[%s974_s21 + $0x8] sm:$0xff] }
 0x44e   : > { %v980_v62 = vunpack.c.h.bf16 %v976_v9  ;;  %v979_v33 = vunpack.c.l.bf16 %v976_v9 }
 0x450   : > { %1120 = vmatpush1.bf16.msra.mxu0 %v2119_v12  ;;  %1161 = vmatpush1.bf16.msra.mxu1 %v2146_v19 }
 0x451   : > { %1121 = vmatprep.subr.bf16.mxu0 %v2122_v13  ;;  %1162 = vmatprep.subr.bf16.mxu1 %v2150_v20 }
 0x454   : > { %1122 = vmatpush1.bf16.msra.mxu0 %v2138_v17  ;;  %1163 = vmatpush1.bf16.msra.mxu1 %v2162_v23 }
 0x455   : > { %1123 = vmatprep.subr.bf16.mxu0 %v2142_v18  ;;  %1164 = vmatprep.subr.bf16.mxu1 %v2166_v24 }
 0x458   : > { %1124 = vmatpush1.bf16.msra.mxu0 %v2154_v21  ;;  %1165 = vmatpush1.bf16.msra.mxu1 %v2178_v27 }
 0x459   : > { %1125 = vmatprep.subr.bf16.mxu0 %v2157_v22  ;;  %1166 = vmatprep.subr.bf16.mxu1 %v2182_v28 }
 0x45c   : > { %1126 = vmatpush1.bf16.msra.mxu0 %v2170_v25  ;;  %1167 = vmatpush1.bf16.msra.mxu1 %v2191_v30 }
 0x45d   : > { %1127 = vmatprep.subr.bf16.mxu0 %v2174_v26  ;;  %1168 = vmatprep.subr.bf16.mxu1 %v2195_v31 }
 0x460   : > { %1128 = vmatpush1.bf16.msra.mxu0 %v2186_v29  ;;  %1169 = vmatpush1.bf16.msra.mxu1 %v2200_v32 }
 0x461   : > { %1243 = vmatprep.subr.bf16.mxu0 %v2077_v1  ;;  %1284 = vmatprep.subr.bf16.mxu1 %v2095_v6 }
 0x516   : > { %v1017_v5 = vpop.f32.mrb[16].mxu0  ;;  %v1058_v7 = vpop.f32.mrb[16].mxu1 }
 0x517   : > { %v1065_v8 = vadd.f32 %v1017_v5, %v977_v3  ;;  %v1019_v11 = vpop.f32.mrb[17].mxu0  ;;  %v1060_v12 = vpop.f32.mrb[17].mxu1  ;;  %v1067_v36 = vadd.f32 %v1058_v7, %v979_v33  ;;  %v2469_v3 = vld [vmem:[%s2074_s17 + $0x60] ss:$16 sps:$4 sm:$0xff]  }
 0x518   : > { %v1066_v13 = vadd.f32 %v1019_v11, %v978_v4  ;;  %v1021_v48 = vpop.f32.mrb[18].mxu0  ;;  %v1062_v59 = vpop.f32.mrb[18].mxu1  ;;  %v1068_v63 = vadd.f32 %v1060_v12, %v980_v62  ;;  %v2474_v4 = vld [vmem:[%s2074_s17 + $0x84] ss:$16 sps:$4 sm:$0xff]  }
 0x519   : > { %v1733_v60 = vmul.f32 -1.442695, %v1065_v8  ;;  %v1022_v1 = vpop.f32.mrb[19].mxu0  ;;  %v1063_v61 = vpop.f32.mrb[19].mxu1 }
 0x51a   : > { %v1734_v6 = vmul.f32 -1.442695, %v1066_v13  ;;  %v1735_v34 = vmul.f32 -1.442695, %v1068_v63 }
 0x51b   : > { %1907 = vpow2.f32 %v1733_v60 }
 0x51c   : > { %1909 = vpow2.f32 %v1734_v6 }
 0x51d   : > { %1911 = vpow2.f32 %v1735_v34 }
 0x51e   : > { %1913 = vtanh.f32 %v1067_v36 }
 0x525   : > { %v1908_v37 = vpop.eup %1907 }
 0x526   : > { %v1910_v38 = vpop.eup %1909  ;;  %v1072_v39 = vadd.f32 1.0, %v1908_v37 }
 0x527   : > { %v1078_v40 = vadd.f32 1.0, %v1910_v38  ;;  %v1912_v41 = vpop.eup %1911 }
 0x528   : > { %1915 = vrcp.f32 %v1072_v39  ;;  %v1914_v43 = vpop.eup %1913  ;;  %v1085_v35 = vadd.f32 1.0, %v1912_v41  ;;  %v1983_v39 = vld [vmem:[%s2074_s17 + $0x2c] ss:$16 sps:$4 sm:$0xff]   ;;  %v1985_v41 = vld [vmem:[%s2074_s17 + $0x48] ss:$16 sps:$4 sm:$0xff]  }
 0x529   : > { %1917 = vrcp.f32 %v1078_v40  ;;  %v1984_v40 = vld [vmem:[%s2074_s17 + $0x4c] ss:$16 sps:$4 sm:$0xff]  }
 0x52a   : > { %1919 = vrcp.f32 %v1085_v35  ;;  %v1991_v35 = vld [vmem:[%s2074_s17 + $0xa4] ss:$16 sps:$4 sm:$0xff]  }
 0x532   : > { %v1916_v44 = vpop.eup %1915 }
 0x533   : > { %v1918_v45 = vpop.eup %1917  ;;  %v1090_v46 = vmul.f32 %v1916_v44, %v1914_v43  ;;  %v1987_v43 = vld [vmem:[%s2074_s17 + $0x68] ss:$16 sps:$4 sm:$0xff]   ;;  %v1988_v44 = vld [vmem:[%s2074_s17 + $0x8c] ss:$16 sps:$4 sm:$0xff]  }
 0x534   : > { %v1089_v47 = vmul.f32 %v1918_v45, %v2380_v54  ;;  %v1920_v50 = vpop.eup %1919  ;;  %v2435_v54 = vld [vmem:[%s2074_s17 + $0x8] ss:$16 sps:$4 sm:$0xff]   ;;  %v1989_v45 = vld [vmem:[%s2074_s17 + $0x80] ss:$16 sps:$4 sm:$0xff]  }
 0x536   : > { %v2424_v49 = vadd.f32 %v1090_v46, %v1089_v47  ;;  %v1990_v46 = vld [vmem:[%s2074_s17 + $0x88] ss:$16 sps:$4 sm:$0xff]   ;;  %v1992_v47 = vld [vmem:[%s2074_s17 + $0xac] ss:$16 sps:$4 sm:$0xff]  }
 0x538   : > { %1921 = vtanh.f32 %v2424_v49 }
 0x542   : > { %v1922_v51 = vpop.eup %1921 }
 0x543   : > { %v1093_v52 = vmul.f32 %v1922_v51, %v1920_v50  ;;  %v1994_v50 = vld [vmem:[%s2074_s17 + $0xa8] ss:$16 sps:$4 sm:$0xff]   ;;  %v1995_v51 = vld [vmem:[%s2074_s17 + $0xc4] ss:$16 sps:$4 sm:$0xff]  }
 0x545   : > { %v1096_v42 = vpack.c.bf16 %v1093_v52, %v1093_v52  ;;  %v1996_v52 = vld [vmem:[%s2074_s17 + $0xcc] ss:$16 sps:$4 sm:$0xff]  }
 0x547   : > { %1099 = vst [vmem:[%s1098_s24] sm:$0xf] %v1096_v42  ;;  %1146 = vmatmul.mubr.bf16.vlgmr.msra.gmra.mrb[20].mxu0 %v1096_v42  ;;  %1187 = vmatmul.mubr.bf16.vlgmr.msra.gmra.mrb[20].mxu1 %v1096_v42  ;;  %v1997_v42 = vld [vmem:[%s2074_s17 + $0xc0] ss:$16 sps:$4 sm:$0xff]  }
 0x548   : > { %1244 = vmatpush1.bf16.msra.mxu0 %v2431_v53  ;;  %1285 = vmatpush1.bf16.msra.mxu1 %v2435_v54 }
 0x549   : > { %1245 = vmatprep.subr.bf16.mxu0 %v2439_v55  ;;  %1286 = vmatprep.subr.bf16.mxu1 %v2111_v10  ;;  %v2459_v10 = vld [vmem:[%s2074_s17 + $0x40] ss:$16 sps:$4 sm:$0xff]  }
 0x54a   : > { %1275 = vmatprep.mubr.bf16.mxu0 %v2027_v0  ;;  %1316 = vmatprep.mubr.bf16.mxu1 %v2027_v0 }
 0x54c   : > { %1246 = vmatpush1.bf16.msra.mxu0 %v2446_v56  ;;  %1287 = vmatpush1.bf16.msra.mxu1 %v2450_v57 }
 0x54d   : > { %1247 = vmatprep.subr.bf16.mxu0 %v2454_v58  ;;  %1288 = vmatprep.subr.bf16.mxu1 %v2125_v14  ;;  %v1981_v14 = vld [vmem:[%s2074_s17 + $0x4] ss:$16 sps:$4 sm:$0xff]  }
 0x550   : > { %1248 = vmatpush1.bf16.msra.mxu0 %v2459_v10  ;;  %1289 = vmatpush1.bf16.msra.mxu1 %v2130_v15  ;;  %v1982_v15 = vld [vmem:[%s2074_s17 + $0xc] ss:$16 sps:$4 sm:$0xff]  }
 0x551   : > { %1249 = vmatprep.subr.bf16.mxu0 %v2464_v2  ;;  %1290 = vmatprep.subr.bf16.mxu1 %v2134_v16  ;;  %v1738_v16 = vld [vmem:[%s1593_s26 + $0x50] sm:$0xff] }
 0x554   : > { %1250 = vmatpush1.bf16.msra.mxu0 %v2469_v3  ;;  %1291 = vmatpush1.bf16.msra.mxu1 %v2146_v19 }
 0x555   : > { %1251 = vmatprep.subr.bf16.mxu0 %v2474_v4  ;;  %1292 = vmatprep.subr.bf16.mxu1 %v2150_v20 }
 0x558   : > { %1252 = vmatpush1.bf16.msra.mxu0 %v2138_v17  ;;  %1293 = vmatpush1.bf16.msra.mxu1 %v2162_v23  ;;  %v1107_v17 = vunpack.c.l.bf16 %v1738_v16 }
 0x559   : > { %1253 = vmatprep.subr.bf16.mxu0 %v2142_v18  ;;  %1294 = vmatprep.subr.bf16.mxu1 %v2166_v24  ;;  %v1108_v18 = vunpack.c.h.bf16 %v1738_v16 }
 0x55c   : > { %1254 = vmatpush1.bf16.msra.mxu0 %v2154_v21  ;;  %1295 = vmatpush1.bf16.msra.mxu1 %v2178_v27 }
 0x55d   : > { %1255 = vmatprep.subr.bf16.mxu0 %v2157_v22  ;;  %1296 = vmatprep.subr.bf16.mxu1 %v2182_v28  ;;  %v1739_v22 = vld [vmem:[%s1593_s26 + $0x58] sm:$0xff] }
 0x55e   : > { %v1109_v7 = vunpack.c.l.bf16 %v1739_v22 }
 0x560   : > { %1256 = vmatpush1.bf16.msra.mxu0 %v2170_v25  ;;  %1297 = vmatpush1.bf16.msra.mxu1 %v2191_v30 }
 0x561   : > { %1257 = vmatprep.subr.bf16.mxu0 %v2174_v26  ;;  %1298 = vmatprep.subr.bf16.mxu1 %v2195_v31 }
 0x564   : > { %1258 = vmatpush1.bf16.msra.mxu0 %v2186_v29  ;;  %1299 = vmatpush1.bf16.msra.mxu1 %v2200_v32  ;;  %v1110_v32 = vunpack.c.h.bf16 %v1739_v22 }
 0x565   : > { %1373 = vmatprep.subr.bf16.mxu0 %v1981_v14  ;;  %1414 = vmatprep.subr.bf16.mxu1 %v1982_v15  ;;  %v1747_v15 = vld [vmem:[%s1601_s3 + $0x68] sm:$0xff] }
 0x61a   : > { %v1147_v19 = vpop.f32.mrb[20].mxu0  ;;  %v1188_v20 = vpop.f32.mrb[20].mxu1 }
 0x61b   : > { %v1195_v21 = vadd.f32 %v1147_v19, %v1107_v17  ;;  %v1149_v23 = vpop.f32.mrb[21].mxu0  ;;  %v1190_v24 = vpop.f32.mrb[21].mxu1  ;;  %v1197_v9 = vadd.f32 %v1188_v20, %v1109_v7 }
 0x61c   : > { %v1196_v25 = vadd.f32 %v1149_v23, %v1108_v18  ;;  %v1151_v26 = vpop.f32.mrb[22].mxu0  ;;  %v1192_v27 = vpop.f32.mrb[22].mxu1  ;;  %v1198_v5 = vadd.f32 %v1190_v24, %v1110_v32 }
 0x61d   : > { %v1740_v28 = vmul.f32 -1.442695, %v1195_v21  ;;  %v1152_v29 = vpop.f32.mrb[23].mxu0  ;;  %v1193_v30 = vpop.f32.mrb[23].mxu1  ;;  %v1239_v27 = vunpack.c.l.bf16 %v1747_v15 }
 0x61e   : > { %v1741_v31 = vmul.f32 -1.442695, %v1196_v25  ;;  %v1742_v8 = vmul.f32 -1.442695, %v1198_v5  ;;  %v1240_v25 = vunpack.c.h.bf16 %v1747_v15 }
 0x61f   : > { %1923 = vpow2.f32 %v1740_v28 }
 0x620   : > { %1925 = vpow2.f32 %v1741_v31 }
 0x621   : > { %1927 = vpow2.f32 %v1742_v8 }
 0x622   : > { %1929 = vtanh.f32 %v1197_v9 }
 0x629   : > { %v1924_v11 = vpop.eup %1923 }
 0x62a   : > { %v1926_v12 = vpop.eup %1925  ;;  %v1202_v13 = vadd.f32 1.0, %v1924_v11 }
 0x62b   : > { %v1208_v48 = vadd.f32 1.0, %v1926_v12  ;;  %v1928_v59 = vpop.eup %1927 }
 0x62c   : > { %1931 = vrcp.f32 %v1202_v13  ;;  %v1930_v60 = vpop.eup %1929  ;;  %v1215_v62 = vadd.f32 1.0, %v1928_v59 }
 0x62d   : > { %1933 = vrcp.f32 %v1208_v48 }
 0x62e   : > { %1935 = vrcp.f32 %v1215_v62  ;;  %v1754_v62 = vld [vmem:[%s1609_s6 + $0x70] sm:$0xff] }
 0x636   : > { %v1932_v1 = vpop.eup %1931 }
 0x637   : > { %v1934_v61 = vpop.eup %1933  ;;  %v1220_v6 = vmul.f32 %v1932_v1, %v1930_v60 }
 0x638   : > { %v1219_v63 = vmul.f32 %v1934_v61, %v2424_v49  ;;  %v1936_v34 = vpop.eup %1935  ;;  %v1993_v49 = vld [vmem:[%s2074_s17 + $0xa0] ss:$16 sps:$4 sm:$0xff]  }
 0x63a   : > { %v2497_v33 = vadd.f32 %v1220_v6, %v1219_v63  ;;  %v1367_v63 = vunpack.c.l.bf16 %v1754_v62 }
 0x63c   : > { %1937 = vtanh.f32 %v2497_v33 }
 0x646   : > { %v1938_v36 = vpop.eup %1937 }
 0x647   : > { %v1223_v37 = vmul.f32 %v1938_v36, %v1936_v34  ;;  %v1368_v34 = vunpack.c.h.bf16 %v1754_v62 }
 0x649   : > { %v1226_v38 = vpack.c.bf16 %v1223_v37, %v1223_v37 }
 0x64b   : > { %1744 = vst [vmem:[%s1597_s29 + $0x14] sm:$0xf] %v1226_v38  ;;  %1276 = vmatmul.mubr.bf16.vlgmr.msra.gmra.mrb[24].mxu0 %v1226_v38  ;;  %1317 = vmatmul.mubr.bf16.vlgmr.msra.gmra.mrb[24].mxu1 %v1226_v38  ;;  %v1755_v38 = vld [vmem:[%s1609_s6 + $0x78] sm:$0xff] }
 0x64c   : > { %1374 = vmatpush1.bf16.msra.mxu0 %v2431_v53  ;;  %1415 = vmatpush1.bf16.msra.mxu1 %v2435_v54  ;;  %v1998_v53 = vld [vmem:[%s2074_s17 + $0xc8] ss:$16 sps:$4 sm:$0xff]   ;;  %v1999_v54 = vld [vmem:[%s2074_s17 + $0xe4] ss:$16 sps:$4 sm:$0xff]  }
 0x64d   : > { %1375 = vmatprep.subr.bf16.mxu0 %v2439_v55  ;;  %1416 = vmatprep.subr.bf16.mxu1 %v1983_v39  ;;  %v2000_v55 = vld [vmem:[%s2074_s17 + $0xec] ss:$16 sps:$4 sm:$0xff]  }
 0x64e   : > { %1405 = vmatprep.mubr.bf16.mxu0 %v2027_v0  ;;  %1446 = vmatprep.mubr.bf16.mxu1 %v2027_v0  ;;  %v1986_v0 = vld [vmem:[%s2074_s17 + $0x6c] ss:$16 sps:$4 sm:$0xff]  }
 0x650   : > { %1376 = vmatpush1.bf16.msra.mxu0 %v2446_v56  ;;  %1417 = vmatpush1.bf16.msra.mxu1 %v2450_v57  ;;  %v2001_v56 = vld [vmem:[%s2074_s17 + $0xe0] ss:$16 sps:$4 sm:$0xff]   ;;  %v2002_v57 = vld [vmem:[%s2074_s17 + $0xe8] ss:$16 sps:$4 sm:$0xff]   ;;  %s1751_s17 = smul.u32 4294967276, %s2017_s9 }
 0x651   : > { %1377 = vmatprep.subr.bf16.mxu0 %v2454_v58  ;;  %1418 = vmatprep.subr.bf16.mxu1 %v1984_v40  ;;  %v1746_v58 = vld [vmem:[%s1601_s3 + $0x60] sm:$0xff] }
 0x652   : > { %s1605_s4 = scalar_lea.vmem %s2256_s28, %s1751_s17 }
 0x654   : > { %1378 = vmatpush1.bf16.msra.mxu0 %v2459_v10  ;;  %1419 = vmatpush1.bf16.msra.mxu1 %v1985_v41  ;;  %v1237_v10 = vunpack.c.l.bf16 %v1746_v58 }
 0x655   : > { %1379 = vmatprep.subr.bf16.mxu0 %v2464_v2  ;;  %1420 = vmatprep.subr.bf16.mxu1 %v1986_v0  ;;  %v1238_v2 = vunpack.c.h.bf16 %v1746_v58 }
 0x658   : > { %1380 = vmatpush1.bf16.msra.mxu0 %v2469_v3  ;;  %1421 = vmatpush1.bf16.msra.mxu1 %v1987_v43 }
 0x659   : > { %1381 = vmatprep.subr.bf16.mxu0 %v2474_v4  ;;  %1422 = vmatprep.subr.bf16.mxu1 %v1988_v44 }
 0x65c   : > { %1382 = vmatpush1.bf16.msra.mxu0 %v1989_v45  ;;  %1423 = vmatpush1.bf16.msra.mxu1 %v1990_v46 }
 0x65d   : > { %1383 = vmatprep.subr.bf16.mxu0 %v1991_v35  ;;  %1424 = vmatprep.subr.bf16.mxu1 %v1992_v47  ;;  %v1370_v47 = vunpack.c.h.bf16 %v1755_v38 }
 0x660   : > { %1384 = vmatpush1.bf16.msra.mxu0 %v1993_v49  ;;  %1425 = vmatpush1.bf16.msra.mxu1 %v1994_v50  ;;  %v1369_v50 = vunpack.c.l.bf16 %v1755_v38 }
 0x661   : > { %1385 = vmatprep.subr.bf16.mxu0 %v1995_v51  ;;  %1426 = vmatprep.subr.bf16.mxu1 %v1996_v52 }
 0x664   : > { %1386 = vmatpush1.bf16.msra.mxu0 %v1997_v42  ;;  %1427 = vmatpush1.bf16.msra.mxu1 %v1998_v53 }
 0x665   : > { %1387 = vmatprep.subr.bf16.mxu0 %v1999_v54  ;;  %1428 = vmatprep.subr.bf16.mxu1 %v2000_v55 }
 0x668   : > { %1388 = vmatpush1.bf16.msra.mxu0 %v2001_v56  ;;  %1429 = vmatpush1.bf16.msra.mxu1 %v2002_v57 }
 0x71e   : > { %v1277_v3 = vpop.f32.mrb[24].mxu0  ;;  %v1318_v4 = vpop.f32.mrb[24].mxu1 }
 0x71f   : > { %v1325_v14 = vadd.f32 %v1277_v3, %v1237_v10  ;;  %v1279_v16 = vpop.f32.mrb[25].mxu0  ;;  %v1320_v17 = vpop.f32.mrb[25].mxu1  ;;  %v1327_v29 = vadd.f32 %v1318_v4, %v1239_v27 }
 0x720   : > { %v1326_v18 = vadd.f32 %v1279_v16, %v1238_v2  ;;  %v1281_v19 = vpop.f32.mrb[26].mxu0  ;;  %v1322_v20 = vpop.f32.mrb[26].mxu1  ;;  %v1328_v26 = vadd.f32 %v1320_v17, %v1240_v25 }
 0x721   : > { %v1748_v21 = vmul.f32 -1.442695, %v1325_v14  ;;  %v1282_v22 = vpop.f32.mrb[27].mxu0  ;;  %v1323_v23 = vpop.f32.mrb[27].mxu1 }
 0x722   : > { %v1749_v24 = vmul.f32 -1.442695, %v1326_v18  ;;  %v1750_v28 = vmul.f32 -1.442695, %v1328_v26 }
 0x723   : > { %1939 = vpow2.f32 %v1748_v21 }
 0x724   : > { %1941 = vpow2.f32 %v1749_v24 }
 0x725   : > { %1943 = vpow2.f32 %v1750_v28 }
 0x726   : > { %1945 = vtanh.f32 %v1327_v29 }
 0x72d   : > { %v1940_v30 = vpop.eup %1939 }
 0x72e   : > { %v1942_v31 = vpop.eup %1941  ;;  %v1332_v32 = vadd.f32 1.0, %v1940_v30 }
 0x72f   : > { %v1338_v5 = vadd.f32 1.0, %v1942_v31  ;;  %v1944_v7 = vpop.eup %1943 }
 0x730   : > { %1947 = vrcp.f32 %v1332_v32  ;;  %v1946_v8 = vpop.eup %1945  ;;  %v1345_v13 = vadd.f32 1.0, %v1944_v7 }
 0x731   : > { %1949 = vrcp.f32 %v1338_v5 }
 0x732   : > { %1951 = vrcp.f32 %v1345_v13 }
 0x73a   : > { %v1948_v9 = vpop.eup %1947 }
 0x73b   : > { %v1950_v11 = vpop.eup %1949  ;;  %v1350_v12 = vmul.f32 %v1948_v9, %v1946_v8 }
 0x73c   : > { %v1349_v48 = vmul.f32 %v1950_v11, %v2497_v33  ;;  %v1952_v60 = vpop.eup %1951 }
 0x73e   : > { %v1351_v59 = vadd.f32 %v1350_v12, %v1349_v48 }
 0x740   : > { %1953 = vtanh.f32 %v1351_v59 }
 0x74a   : > { %v1954_v1 = vpop.eup %1953 }
 0x74b   : > { %v1353_v61 = vmul.f32 %v1954_v1, %v1952_v60 }
 0x74d   : > { %v1356_v6 = vpack.c.bf16 %v1353_v61, %v1353_v61 }
 0x74f   : > { %1752 = vst [vmem:[%s1605_s4 + $0x18] sm:$0xf] %v1356_v6  ;;  %1406 = vmatmul.mubr.bf16.vlgmr.msra.gmra.mrb[28].mxu0 %v1356_v6  ;;  %1447 = vmatmul.mubr.bf16.vlgmr.msra.gmra.mrb[28].mxu1 %v1356_v6 }
 0x822   : > { %v1407_v36 = vpop.f32.mrb[28].mxu0  ;;  %v1448_v37 = vpop.f32.mrb[28].mxu1 }
 0x823   : > { %v1455_v33 = vadd.f32 %v1407_v36, %v1367_v63  ;;  %v1409_v39 = vpop.f32.mrb[29].mxu0  ;;  %v1450_v40 = vpop.f32.mrb[29].mxu1  ;;  %v1457_v52 = vadd.f32 %v1448_v37, %v1369_v50 }
 0x824   : > { %v1456_v41 = vadd.f32 %v1409_v39, %v1368_v34  ;;  %v1411_v0 = vpop.f32.mrb[30].mxu0  ;;  %v1452_v43 = vpop.f32.mrb[30].mxu1  ;;  %v1458_v49 = vadd.f32 %v1450_v40, %v1370_v47 }
 0x825   : > { %v1756_v44 = vmul.f32 -1.442695, %v1455_v33  ;;  %v1412_v45 = vpop.f32.mrb[31].mxu0  ;;  %v1453_v46 = vpop.f32.mrb[31].mxu1 }
 0x826   : > { %v1757_v35 = vmul.f32 -1.442695, %v1456_v41  ;;  %v1758_v51 = vmul.f32 -1.442695, %v1458_v49 }
 0x827   : > { %1955 = vpow2.f32 %v1756_v44 }
 0x828   : > { %1957 = vpow2.f32 %v1757_v35 }
 0x829   : > { %1959 = vpow2.f32 %v1758_v51 }
 0x82a   : > { %1961 = vtanh.f32 %v1457_v52 }
 0x831   : > { %v1956_v42 = vpop.eup %1955 }
 0x832   : > { %v1958_v53 = vpop.eup %1957  ;;  %v1462_v54 = vadd.f32 1.0, %v1956_v42 }
 0x833   : > { %v1468_v55 = vadd.f32 1.0, %v1958_v53  ;;  %v1960_v56 = vpop.eup %1959 }
 0x834   : > { %1963 = vrcp.f32 %v1462_v54  ;;  %v1962_v57 = vpop.eup %1961  ;;  %v1475_v3 = vadd.f32 1.0, %v1960_v56 }
 0x835   : > { %1965 = vrcp.f32 %v1468_v55 }
 0x836   : > { %1967 = vrcp.f32 %v1475_v3 }
 0x83e   : > { %v1964_v58 = vpop.eup %1963 }
 0x83f   : > { %v1966_v10 = vpop.eup %1965  ;;  %v1480_v2 = vmul.f32 %v1964_v58, %v1962_v57 }
 0x840   : > { %v1479_v4 = vmul.f32 %v1966_v10, %v1351_v59  ;;  %v1968_v15 = vpop.eup %1967 }
 0x842   : > { %v1481_v14 = vadd.f32 %v1480_v2, %v1479_v4 }
 0x844   : > { %1969 = vtanh.f32 %v1481_v14 }
 0x84e   : > { %v1970_v16 = vpop.eup %1969 }
 0x84f   : > { %v1483_v17 = vmul.f32 %v1970_v16, %v1968_v15 }
 0x851   : > { %v1486_v18 = vpack.c.bf16 %v1483_v17, %v1483_v17 }
 0x853   : > { %1760 = vst [vmem:[%s1613_s7 + $0x1c] sm:$0xf] %v1486_v18 }
 0x854 PF: > { %s12_s11 = sadd.s32 1, %s2025_s11   ;;  %s2555_s9 = smov %s2021_s10 }
 0x855   : > { %p9_p5 = scmp.ge.s32.totalorder %s12_s11, 4   ;;  %s2556_s10 = smov %s2558_s12 }
 0x857   :  { %11 = sbr.rel (!%p9_p5) target bundleno = 2 (0x2), region = 81 }

</bundles_post_ra>
